<compile_context>
chip_gen: v7x
topology: tpu7x:2x2x1
jax: 0.10.0
libtpu: 0.0.40
codegen_flags: <defaults>
</compile_context>

<pallas_src>
import functools

import jax
import jax.numpy as jnp
import numpy as np
from jax import lax
from jax.experimental import pallas as pl
from jax.experimental.pallas import tpu as pltpu


# ---------------------------------------------------------------------------
# Row-block picker: largest R dividing Ho with im2col M = R*Wo around target_m.
# R must be Ho (full extent) or give an (R*Wo) block divisible by 8 so the
# flattened output block obeys the (8,128) tiling rule.  Keeps per-block
# accumulators small enough for the 32 MiB scoped-VMEM default on all gens
# (incl. v7x's 64 MiB physical VMEM).
# ---------------------------------------------------------------------------
def _pick_row_block(Ho, Wo, target_m=1024):
    if Ho * Wo <= target_m:
        return Ho
    best = Ho
    for r in range(1, Ho):
        if Ho % r == 0 and (r * Wo) % 8 == 0 and r * Wo <= target_m:
            best = r
    return best


# ---------------------------------------------------------------------------
# Pallas kernel: one (batch, row-block) step of a stride-1 KxK correlation with
# fused bias + LeakyReLU and an optional fused 1x1 projection (conv4).
#   x_ref : (1, Hp, Wp, Cin)    full padded image (resident per batch element)
#   w_ref : (K, K, Cin, C1)     HWIO weight
#   b_ref : (1, C1)             bias
#   [pw_ref: (C1, Cf), pb_ref: (1, Cf)]   fused 1x1 projection (optional)
#   o_ref : (1, R*Wo, Cf)       lane-dense flattened output row-block
# ---------------------------------------------------------------------------
def _conv_block_kernel(x_ref, w_ref, b_ref, *rest, K, R, Wo, neg_slope,
                       has_proj):
    if has_proj:
        pw_ref, pb_ref, o_ref = rest
    else:
        (o_ref,) = rest

    cin = x_ref.shape[-1]
    c1 = w_ref.shape[-1]
    m = R * Wo
    row0 = pl.program_id(1) * R

    acc = jnp.zeros((m, c1), jnp.float32)
    # Static unroll over the K*K taps; each tap is ONE big (R*Wo, Cin)x(Cin, C1)
    # MXU matmul over the whole row-block (no per-row loop).
    for kh in range(K):
        for kw in range(K):
            xs = x_ref[0, pl.ds(row0 + kh, R), pl.ds(kw, Wo), :]   # (R, Wo, Cin)
            acc = acc + jnp.dot(xs.reshape(m, cin), w_ref[kh, kw],
                                preferred_element_type=jnp.float32)

    acc = acc + b_ref[...]                       # bias once per row-block
    if neg_slope is not None:
        acc = jnp.where(acc >= 0, acc, neg_slope * acc)   # fused LeakyReLU
    if has_proj:                                 # fused 1x1 conv (no activation)
        acc = jnp.dot(acc, pw_ref[...], preferred_element_type=jnp.float32)
        acc = acc + pb_ref[...]
    o_ref[0] = acc.astype(o_ref.dtype)


def conv_block_pallas(x_nhwc, w_hwio, b, *, pad, neg_slope=None,
                      proj_w=None, proj_b=None):
    """Stride-1 KxK conv (NHWC) + bias (+LeakyReLU) (+fused 1x1 projection)."""
    N, H, W, Cin = x_nhwc.shape
    K = int(w_hwio.shape[0])
    C1 = int(w_hwio.shape[-1])
    (pad_t, pad_b), (pad_l, pad_r) = pad
    xp = jnp.pad(x_nhwc, ((0, 0), (pad_t, pad_b), (pad_l, pad_r), (0, 0)))
    Hp, Wp = H + pad_t + pad_b, W + pad_l + pad_r
    Ho, Wo = Hp - K + 1, Wp - K + 1

    has_proj = proj_w is not None
    Cf = int(proj_w.shape[-1]) if has_proj else C1
    R = _pick_row_block(Ho, Wo)
    n_rb = Ho // R

    kernel = functools.partial(_conv_block_kernel, K=K, R=R, Wo=Wo,
                               neg_slope=neg_slope, has_proj=has_proj)
    in_specs = [
        pl.BlockSpec((1, Hp, Wp, Cin), lambda n, r: (n, 0, 0, 0)),
        pl.BlockSpec((K, K, Cin, C1), lambda n, r: (0, 0, 0, 0)),
        pl.BlockSpec((1, C1), lambda n, r: (0, 0)),
    ]
    args = [xp, w_hwio, b.reshape(1, C1)]
    if has_proj:
        in_specs += [pl.BlockSpec((C1, Cf), lambda n, r: (0, 0)),
                     pl.BlockSpec((1, Cf), lambda n, r: (0, 0))]
        args += [proj_w, proj_b.reshape(1, Cf)]

    out = pl.pallas_call(
        kernel,
        out_shape=jax.ShapeDtypeStruct((N, Ho * Wo, Cf), x_nhwc.dtype),
        grid=(N, n_rb),
        in_specs=in_specs,
        out_specs=pl.BlockSpec((1, R * Wo, Cf), lambda n, r: (n, r, 0)),
        compiler_params=pltpu.CompilerParams(
            dimension_semantics=("parallel", "parallel")),
    )(*args)
    return out.reshape(N, Ho, Wo, Cf)


# ---------------------------------------------------------------------------
# Polyphase lowering of ConvTranspose2d(k=5, stride=2, padding=2, out_pad=1).
# Output phase p (=oh%2) of row 2a+p reads input rows {a-1,a,a+1} (p=0: taps
# kh=4,2,0) or {a,a+1} (p=1: taps kh=3,1); same for columns.  All 4 phases are
# expressed as a single 3x3 stride-1 conv (pad 1) with a combined weight whose
# output-channel blocks are the phases.
# ---------------------------------------------------------------------------
_PHASE_TAPS = {0: ((0, 4), (1, 2), (2, 0)),   # (window offset dh, kernel tap kh)
               1: ((1, 3), (2, 1))}


def _poly_weight(wt):
    """(Cin, Cout, 5, 5) ConvTranspose2d weight -> (3, 3, Cin, 4*Cout)."""
    cin, cout = int(wt.shape[0]), int(wt.shape[1])
    w = jnp.transpose(wt, (2, 3, 0, 1))          # (5, 5, Cin, Cout)
    wc = jnp.zeros((3, 3, cin, 2, 2, cout), wt.dtype)
    for p in (0, 1):
        for q in (0, 1):
            for dh, kh in _PHASE_TAPS[p]:
                for dw, kw in _PHASE_TAPS[q]:
                    wc = wc.at[dh, dw, :, p, q, :].set(w[kh, kw])
    return wc.reshape(3, 3, cin, 4 * cout)


def upsample_pallas(x_nhwc, wt, b, *, neg_slope=0.2):
    """PyTorch ConvTranspose2d(5, s=2, p=2, out_pad=1) + LeakyReLU, polyphase."""
    N, H, W, _ = x_nhwc.shape
    C = int(wt.shape[1])
    y4 = conv_block_pallas(x_nhwc, _poly_weight(wt), jnp.tile(b, 4),
                           pad=((1, 1), (1, 1)), neg_slope=neg_slope)
    # interleave the 4 phases: (N,H,W,2,2,C) -> (N,2H,2W,C)  (layout plumbing)
    y4 = y4.reshape(N, H, W, 2, 2, C)
    return jnp.transpose(y4, (0, 1, 3, 2, 4, 5)).reshape(N, 2 * H, 2 * W, C)


# ---------------------------------------------------------------------------
# HyperDecoder forward (matches the PyTorch Sequential exactly).
# ---------------------------------------------------------------------------
def init_hyper_decoder_params(key, in_channel, out_channel, channel):
    ks = jax.random.split(key, 8)
    s = 0.2
    return {
        # Upsample == ConvTranspose2d(in, ch, 5, stride=2, pad=2, out_pad=1)
        "up1_w": s * jax.random.normal(ks[0], (in_channel, channel, 5, 5), jnp.float32),
        "up1_b": s * jax.random.normal(ks[1], (channel,), jnp.float32),
        "up2_w": s * jax.random.normal(ks[2], (channel, channel, 5, 5), jnp.float32),
        "up2_b": s * jax.random.normal(ks[3], (channel,), jnp.float32),
        # Conv2d(ch, ch, 3, pad=1)  (OIHW)
        "conv3_w": s * jax.random.normal(ks[4], (channel, channel, 3, 3), jnp.float32),
        "conv3_b": s * jax.random.normal(ks[5], (channel,), jnp.float32),
        # Conv2d(ch, out_ch, 1)  (OIHW)
        "conv4_w": s * jax.random.normal(ks[6], (out_channel, channel, 1, 1), jnp.float32),
        "conv4_b": s * jax.random.normal(ks[7], (out_channel,), jnp.float32),
    }


def hyper_decoder_forward(params, x_nchw):
    x = jnp.transpose(x_nchw, (0, 2, 3, 1))          # NCHW -> NHWC
    x = upsample_pallas(x, params["up1_w"], params["up1_b"])
    x = upsample_pallas(x, params["up2_w"], params["up2_b"])
    w3 = jnp.transpose(params["conv3_w"], (2, 3, 1, 0))      # OIHW -> HWIO
    w4 = params["conv4_w"][:, :, 0, 0].T                     # (channel, out_ch)
    # conv3 (3x3, LeakyReLU) with conv4 (1x1, no activation) fused as epilogue.
    x = conv_block_pallas(x, w3, params["conv3_b"], pad=((1, 1), (1, 1)),
                          neg_slope=0.2, proj_w=w4, proj_b=params["conv4_b"])
    return jnp.transpose(x, (0, 3, 1, 2))            # NHWC -> NCHW


# ---------------------------------------------------------------------------
# Pure-JAX reference (lax.conv_general_dilated) for the correctness check.
# ---------------------------------------------------------------------------
def hyper_decoder_ref(params, x_nchw):
    dn = ("NHWC", "HWIO", "NHWC")

    def lrelu(y):
        return jnp.where(y >= 0, y, 0.2 * y)

    x = jnp.transpose(x_nchw, (0, 2, 3, 1))

    def convt(x, wt, b):
        w = jnp.transpose(wt, (2, 3, 0, 1))[::-1, ::-1]
        y = lax.conv_general_dilated(x, w, (1, 1), [(2, 3), (2, 3)],
                                     lhs_dilation=(2, 2),
                                     dimension_numbers=dn) + b
        return lrelu(y)

    x = convt(x, params["up1_w"], params["up1_b"])
    x = convt(x, params["up2_w"], params["up2_b"])
    w3 = jnp.transpose(params["conv3_w"], (2, 3, 1, 0))
    x = lrelu(lax.conv_general_dilated(x, w3, (1, 1), [(1, 1), (1, 1)],
                                       dimension_numbers=dn) + params["conv3_b"])
    w4 = jnp.transpose(params["conv4_w"], (2, 3, 1, 0))
    x = lax.conv_general_dilated(x, w4, (1, 1), [(0, 0), (0, 0)],
                                 dimension_numbers=dn) + params["conv4_b"]
    return jnp.transpose(x, (0, 3, 1, 2))


if __name__ == "__main__":
    # Small synthetic config consistent with the module's constructor:
    #   HyperDecoder(in_channel=8, out_channel=32, channel=16)
    N, in_channel, channel, out_channel = 2, 8, 16, 32
    H = W = 4  # output spatial = 4*H after two stride-2 upsamples

    key = jax.random.PRNGKey(0)
    kp, kx = jax.random.split(key)
    params = init_hyper_decoder_params(kp, in_channel, out_channel, channel)
    x = jax.random.normal(kx, (N, in_channel, H, W), jnp.float32)  # NCHW

    fwd = jax.jit(hyper_decoder_forward)
    out = jax.block_until_ready(fwd(params, x))
    assert out.shape == (N, out_channel, 4 * H, 4 * W), out.shape

    ref = jax.block_until_ready(jax.jit(hyper_decoder_ref)(params, x))
    out_np, ref_np = np.asarray(out), np.asarray(ref)
    max_err = float(np.max(np.abs(out_np - ref_np)))
    peak = float(np.max(np.abs(ref_np))) + 1e-12
    # 2% of peak magnitude: tight enough to catch any structural/indexing bug,
    # robust to matmul-precision path differences between conv and the kernel.
    if max_err > 2e-2 * peak + 1e-5:
        raise AssertionError(
            f"mismatch vs reference: max abs err {max_err:.3e}, peak {peak:.3e}")

    print("KERNEL_OK")
</pallas_src>

<mosaic_0001>
module attributes {stable_mosaic.version = 11 : i64} {
  func.func @_conv_block_kernel(%arg0: i32, %arg1: i32, %arg2: memref<1x6x6x8xf32, #tpu.memory_space<vmem>>, %arg3: memref<3x3x8x64xf32, #tpu.memory_space<vmem>>, %arg4: memref<1x64xf32, #tpu.memory_space<vmem>>, %arg5: memref<1x16x64xf32, #tpu.memory_space<vmem>>) attributes {dimension_semantics = [#tpu.dimension_semantics<parallel>, #tpu.dimension_semantics<parallel>], iteration_bounds = array<i64: 2, 1>, scalar_prefetch = 0 : i64, scratch_operands = 0 : i64, tpu.core_type = #tpu.core_type<tc>, window_params = [{transform_indices = @transform_0, window_bounds = array<i64: 1, 6, 6, 8>}, {pipeline_mode = #tpu.pipeline_mode<synchronous>, transform_indices = @transform_1, window_bounds = array<i64: 3, 3, 8, 64>}, {pipeline_mode = #tpu.pipeline_mode<synchronous>, transform_indices = @transform_2, window_bounds = array<i64: 1, 64>}, {transform_indices = @transform_3, window_bounds = array<i64: 1, 16, 64>}]} {
    %c4_i32 = arith.constant 4 : i32
    %0 = arith.muli %arg1, %c4_i32 : i32
    %cst = arith.constant 0.000000e+00 : f32
    %1 = vector.broadcast %cst : f32 to vector<16x64xf32>
    %c0_i32 = arith.constant 0 : i32
    %2 = arith.addi %0, %c0_i32 : i32
    %c0 = arith.constant 0 : index
    %3 = arith.index_cast %2 : i32 to index
    %c0_0 = arith.constant 0 : index
    %c0_1 = arith.constant 0 : index
    %4 = vector.load %arg2[%c0, %3, %c0_0, %c0_1] : memref<1x6x6x8xf32, #tpu.memory_space<vmem>>, vector<1x4x4x8xf32>
    %5 = vector.shape_cast %4 : vector<1x4x4x8xf32> to vector<4x4x8xf32>
    %6 = vector.shape_cast %5 : vector<4x4x8xf32> to vector<16x8xf32>
    %c0_2 = arith.constant 0 : index
    %c0_3 = arith.constant 0 : index
    %c0_4 = arith.constant 0 : index
    %c0_5 = arith.constant 0 : index
    %7 = vector.load %arg3[%c0_2, %c0_3, %c0_4, %c0_5] : memref<3x3x8x64xf32, #tpu.memory_space<vmem>>, vector<1x1x8x64xf32>
    %8 = vector.shape_cast %7 : vector<1x1x8x64xf32> to vector<8x64xf32>
    %cst_6 = arith.constant dense<0.000000e+00> : vector<16x64xf32>
    %9 = tpu.matmul %6, %8, %cst_6 {dimension_numbers = #tpu.dot_dimension_numbers<[1], [0], [0], [1], [0, 0, 1, 1], [], []>} : vector<16x8xf32>, vector<8x64xf32>, vector<16x64xf32> -> vector<16x64xf32>
    %10 = arith.addf %1, %9 : vector<16x64xf32>
    %c0_i32_7 = arith.constant 0 : i32
    %11 = arith.addi %0, %c0_i32_7 : i32
    %c0_8 = arith.constant 0 : index
    %12 = arith.index_cast %11 : i32 to index
    %c1 = arith.constant 1 : index
    %c0_9 = arith.constant 0 : index
    %13 = vector.load %arg2[%c0_8, %12, %c1, %c0_9] : memref<1x6x6x8xf32, #tpu.memory_space<vmem>>, vector<1x4x4x8xf32>
    %14 = vector.shape_cast %13 : vector<1x4x4x8xf32> to vector<4x4x8xf32>
    %15 = vector.shape_cast %14 : vector<4x4x8xf32> to vector<16x8xf32>
    %c0_10 = arith.constant 0 : index
    %c1_11 = arith.constant 1 : index
    %c0_12 = arith.constant 0 : index
    %c0_13 = arith.constant 0 : index
    %16 = vector.load %arg3[%c0_10, %c1_11, %c0_12, %c0_13] : memref<3x3x8x64xf32, #tpu.memory_space<vmem>>, vector<1x1x8x64xf32>
    %17 = vector.shape_cast %16 : vector<1x1x8x64xf32> to vector<8x64xf32>
    %cst_14 = arith.constant dense<0.000000e+00> : vector<16x64xf32>
    %18 = tpu.matmul %15, %17, %cst_14 {dimension_numbers = #tpu.dot_dimension_numbers<[1], [0], [0], [1], [0, 0, 1, 1], [], []>} : vector<16x8xf32>, vector<8x64xf32>, vector<16x64xf32> -> vector<16x64xf32>
    %19 = arith.addf %10, %18 : vector<16x64xf32>
    %c0_i32_15 = arith.constant 0 : i32
    %20 = arith.addi %0, %c0_i32_15 : i32
    %c0_16 = arith.constant 0 : index
    %21 = arith.index_cast %20 : i32 to index
    %c2 = arith.constant 2 : index
    %c0_17 = arith.constant 0 : index
    %22 = vector.load %arg2[%c0_16, %21, %c2, %c0_17] : memref<1x6x6x8xf32, #tpu.memory_space<vmem>>, vector<1x4x4x8xf32>
    %23 = vector.shape_cast %22 : vector<1x4x4x8xf32> to vector<4x4x8xf32>
    %24 = vector.shape_cast %23 : vector<4x4x8xf32> to vector<16x8xf32>
    %c0_18 = arith.constant 0 : index
    %c2_19 = arith.constant 2 : index
    %c0_20 = arith.constant 0 : index
    %c0_21 = arith.constant 0 : index
    %25 = vector.load %arg3[%c0_18, %c2_19, %c0_20, %c0_21] : memref<3x3x8x64xf32, #tpu.memory_space<vmem>>, vector<1x1x8x64xf32>
    %26 = vector.shape_cast %25 : vector<1x1x8x64xf32> to vector<8x64xf32>
    %cst_22 = arith.constant dense<0.000000e+00> : vector<16x64xf32>
    %27 = tpu.matmul %24, %26, %cst_22 {dimension_numbers = #tpu.dot_dimension_numbers<[1], [0], [0], [1], [0, 0, 1, 1], [], []>} : vector<16x8xf32>, vector<8x64xf32>, vector<16x64xf32> -> vector<16x64xf32>
    %28 = arith.addf %19, %27 : vector<16x64xf32>
    %c1_i32 = arith.constant 1 : i32
    %29 = arith.addi %0, %c1_i32 : i32
    %c0_23 = arith.constant 0 : index
    %30 = arith.index_cast %29 : i32 to index
    %c0_24 = arith.constant 0 : index
    %c0_25 = arith.constant 0 : index
    %31 = vector.load %arg2[%c0_23, %30, %c0_24, %c0_25] : memref<1x6x6x8xf32, #tpu.memory_space<vmem>>, vector<1x4x4x8xf32>
    %32 = vector.shape_cast %31 : vector<1x4x4x8xf32> to vector<4x4x8xf32>
    %33 = vector.shape_cast %32 : vector<4x4x8xf32> to vector<16x8xf32>
    %c1_26 = arith.constant 1 : index
    %c0_27 = arith.constant 0 : index
    %c0_28 = arith.constant 0 : index
    %c0_29 = arith.constant 0 : index
    %34 = vector.load %arg3[%c1_26, %c0_27, %c0_28, %c0_29] : memref<3x3x8x64xf32, #tpu.memory_space<vmem>>, vector<1x1x8x64xf32>
    %35 = vector.shape_cast %34 : vector<1x1x8x64xf32> to vector<8x64xf32>
    %cst_30 = arith.constant dense<0.000000e+00> : vector<16x64xf32>
    %36 = tpu.matmul %33, %35, %cst_30 {dimension_numbers = #tpu.dot_dimension_numbers<[1], [0], [0], [1], [0, 0, 1, 1], [], []>} : vector<16x8xf32>, vector<8x64xf32>, vector<16x64xf32> -> vector<16x64xf32>
    %37 = arith.addf %28, %36 : vector<16x64xf32>
    %c1_i32_31 = arith.constant 1 : i32
    %38 = arith.addi %0, %c1_i32_31 : i32
    %c0_32 = arith.constant 0 : index
    %39 = arith.index_cast %38 : i32 to index
    %c1_33 = arith.constant 1 : index
    %c0_34 = arith.constant 0 : index
    %40 = vector.load %arg2[%c0_32, %39, %c1_33, %c0_34] : memref<1x6x6x8xf32, #tpu.memory_space<vmem>>, vector<1x4x4x8xf32>
    %41 = vector.shape_cast %40 : vector<1x4x4x8xf32> to vector<4x4x8xf32>
    %42 = vector.shape_cast %41 : vector<4x4x8xf32> to vector<16x8xf32>
    %c1_35 = arith.constant 1 : index
    %c1_36 = arith.constant 1 : index
    %c0_37 = arith.constant 0 : index
    %c0_38 = arith.constant 0 : index
    %43 = vector.load %arg3[%c1_35, %c1_36, %c0_37, %c0_38] : memref<3x3x8x64xf32, #tpu.memory_space<vmem>>, vector<1x1x8x64xf32>
    %44 = vector.shape_cast %43 : vector<1x1x8x64xf32> to vector<8x64xf32>
    %cst_39 = arith.constant dense<0.000000e+00> : vector<16x64xf32>
    %45 = tpu.matmul %42, %44, %cst_39 {dimension_numbers = #tpu.dot_dimension_numbers<[1], [0], [0], [1], [0, 0, 1, 1], [], []>} : vector<16x8xf32>, vector<8x64xf32>, vector<16x64xf32> -> vector<16x64xf32>
    %46 = arith.addf %37, %45 : vector<16x64xf32>
    %c1_i32_40 = arith.constant 1 : i32
    %47 = arith.addi %0, %c1_i32_40 : i32
    %c0_41 = arith.constant 0 : index
    %48 = arith.index_cast %47 : i32 to index
    %c2_42 = arith.constant 2 : index
    %c0_43 = arith.constant 0 : index
    %49 = vector.load %arg2[%c0_41, %48, %c2_42, %c0_43] : memref<1x6x6x8xf32, #tpu.memory_space<vmem>>, vector<1x4x4x8xf32>
    %50 = vector.shape_cast %49 : vector<1x4x4x8xf32> to vector<4x4x8xf32>
    %51 = vector.shape_cast %50 : vector<4x4x8xf32> to vector<16x8xf32>
    %c1_44 = arith.constant 1 : index
    %c2_45 = arith.constant 2 : index
    %c0_46 = arith.constant 0 : index
    %c0_47 = arith.constant 0 : index
    %52 = vector.load %arg3[%c1_44, %c2_45, %c0_46, %c0_47] : memref<3x3x8x64xf32, #tpu.memory_space<vmem>>, vector<1x1x8x64xf32>
    %53 = vector.shape_cast %52 : vector<1x1x8x64xf32> to vector<8x64xf32>
    %cst_48 = arith.constant dense<0.000000e+00> : vector<16x64xf32>
    %54 = tpu.matmul %51, %53, %cst_48 {dimension_numbers = #tpu.dot_dimension_numbers<[1], [0], [0], [1], [0, 0, 1, 1], [], []>} : vector<16x8xf32>, vector<8x64xf32>, vector<16x64xf32> -> vector<16x64xf32>
    %55 = arith.addf %46, %54 : vector<16x64xf32>
    %c2_i32 = arith.constant 2 : i32
    %56 = arith.addi %0, %c2_i32 : i32
    %c0_49 = arith.constant 0 : index
    %57 = arith.index_cast %56 : i32 to index
    %c0_50 = arith.constant 0 : index
    %c0_51 = arith.constant 0 : index
    %58 = vector.load %arg2[%c0_49, %57, %c0_50, %c0_51] : memref<1x6x6x8xf32, #tpu.memory_space<vmem>>, vector<1x4x4x8xf32>
    %59 = vector.shape_cast %58 : vector<1x4x4x8xf32> to vector<4x4x8xf32>
    %60 = vector.shape_cast %59 : vector<4x4x8xf32> to vector<16x8xf32>
    %c2_52 = arith.constant 2 : index
    %c0_53 = arith.constant 0 : index
    %c0_54 = arith.constant 0 : index
    %c0_55 = arith.constant 0 : index
    %61 = vector.load %arg3[%c2_52, %c0_53, %c0_54, %c0_55] : memref<3x3x8x64xf32, #tpu.memory_space<vmem>>, vector<1x1x8x64xf32>
    %62 = vector.shape_cast %61 : vector<1x1x8x64xf32> to vector<8x64xf32>
    %cst_56 = arith.constant dense<0.000000e+00> : vector<16x64xf32>
    %63 = tpu.matmul %60, %62, %cst_56 {dimension_numbers = #tpu.dot_dimension_numbers<[1], [0], [0], [1], [0, 0, 1, 1], [], []>} : vector<16x8xf32>, vector<8x64xf32>, vector<16x64xf32> -> vector<16x64xf32>
    %64 = arith.addf %55, %63 : vector<16x64xf32>
    %c2_i32_57 = arith.constant 2 : i32
    %65 = arith.addi %0, %c2_i32_57 : i32
    %c0_58 = arith.constant 0 : index
    %66 = arith.index_cast %65 : i32 to index
    %c1_59 = arith.constant 1 : index
    %c0_60 = arith.constant 0 : index
    %67 = vector.load %arg2[%c0_58, %66, %c1_59, %c0_60] : memref<1x6x6x8xf32, #tpu.memory_space<vmem>>, vector<1x4x4x8xf32>
    %68 = vector.shape_cast %67 : vector<1x4x4x8xf32> to vector<4x4x8xf32>
    %69 = vector.shape_cast %68 : vector<4x4x8xf32> to vector<16x8xf32>
    %c2_61 = arith.constant 2 : index
    %c1_62 = arith.constant 1 : index
    %c0_63 = arith.constant 0 : index
    %c0_64 = arith.constant 0 : index
    %70 = vector.load %arg3[%c2_61, %c1_62, %c0_63, %c0_64] : memref<3x3x8x64xf32, #tpu.memory_space<vmem>>, vector<1x1x8x64xf32>
    %71 = vector.shape_cast %70 : vector<1x1x8x64xf32> to vector<8x64xf32>
    %cst_65 = arith.constant dense<0.000000e+00> : vector<16x64xf32>
    %72 = tpu.matmul %69, %71, %cst_65 {dimension_numbers = #tpu.dot_dimension_numbers<[1], [0], [0], [1], [0, 0, 1, 1], [], []>} : vector<16x8xf32>, vector<8x64xf32>, vector<16x64xf32> -> vector<16x64xf32>
    %73 = arith.addf %64, %72 : vector<16x64xf32>
    %c2_i32_66 = arith.constant 2 : i32
    %74 = arith.addi %0, %c2_i32_66 : i32
    %c0_67 = arith.constant 0 : index
    %75 = arith.index_cast %74 : i32 to index
    %c2_68 = arith.constant 2 : index
    %c0_69 = arith.constant 0 : index
    %76 = vector.load %arg2[%c0_67, %75, %c2_68, %c0_69] : memref<1x6x6x8xf32, #tpu.memory_space<vmem>>, vector<1x4x4x8xf32>
    %77 = vector.shape_cast %76 : vector<1x4x4x8xf32> to vector<4x4x8xf32>
    %78 = vector.shape_cast %77 : vector<4x4x8xf32> to vector<16x8xf32>
    %c2_70 = arith.constant 2 : index
    %c2_71 = arith.constant 2 : index
    %c0_72 = arith.constant 0 : index
    %c0_73 = arith.constant 0 : index
    %79 = vector.load %arg3[%c2_70, %c2_71, %c0_72, %c0_73] : memref<3x3x8x64xf32, #tpu.memory_space<vmem>>, vector<1x1x8x64xf32>
    %80 = vector.shape_cast %79 : vector<1x1x8x64xf32> to vector<8x64xf32>
    %cst_74 = arith.constant dense<0.000000e+00> : vector<16x64xf32>
    %81 = tpu.matmul %78, %80, %cst_74 {dimension_numbers = #tpu.dot_dimension_numbers<[1], [0], [0], [1], [0, 0, 1, 1], [], []>} : vector<16x8xf32>, vector<8x64xf32>, vector<16x64xf32> -> vector<16x64xf32>
    %82 = arith.addf %73, %81 : vector<16x64xf32>
    %c0_75 = arith.constant 0 : index
    %c0_76 = arith.constant 0 : index
    %83 = vector.load %arg4[%c0_75, %c0_76] : memref<1x64xf32, #tpu.memory_space<vmem>>, vector<1x64xf32>
    %84 = vector.broadcast %83 : vector<1x64xf32> to vector<16x64xf32>
    %85 = arith.addf %82, %84 : vector<16x64xf32>
    %cst_77 = arith.constant 0.000000e+00 : f32
    %86 = vector.broadcast %cst_77 : f32 to vector<16x64xf32>
    %87 = arith.cmpf oge, %85, %86 : vector<16x64xf32>
    %cst_78 = arith.constant 2.000000e-01 : f32
    %88 = vector.broadcast %cst_78 : f32 to vector<16x64xf32>
    %89 = arith.mulf %88, %85 : vector<16x64xf32>
    %90 = arith.select %87, %85, %89 : vector<16x64xi1>, vector<16x64xf32>
    %c0_79 = arith.constant 0 : index
    %c0_80 = arith.constant 0 : index
    %c0_81 = arith.constant 0 : index
    %91 = vector.load %arg5[%c0_79, %c0_80, %c0_81] : memref<1x16x64xf32, #tpu.memory_space<vmem>>, vector<1x16x64xf32>
    %92 = vector.shape_cast %91 : vector<1x16x64xf32> to vector<16x64xf32>
    %93 = vector.shape_cast %90 : vector<16x64xf32> to vector<1x16x64xf32>
    tpu.vector_store %arg5[%c0_79, %c0_80, %c0_81], %93 {strides = array<i32>} : memref<1x16x64xf32, #tpu.memory_space<vmem>>, vector<1x16x64xf32>,
    return
  }
  func.func @transform_0(%arg0: i32, %arg1: i32) -> (i32, i32, i32, i32) {
    %c0_i32 = arith.constant 0 : i32
    %c0_i32_0 = arith.constant 0 : i32
    %c0_i32_1 = arith.constant 0 : i32
    %c0_i32_2 = arith.constant 0 : i32
    return %arg0, %c0_i32, %c0_i32_0, %c0_i32_1 : i32, i32, i32, i32
  }
  func.func @transform_1(%arg0: i32, %arg1: i32) -> (i32, i32, i32, i32) {
    %c0_i32 = arith.constant 0 : i32
    %c0_i32_0 = arith.constant 0 : i32
    %c0_i32_1 = arith.constant 0 : i32
    %c0_i32_2 = arith.constant 0 : i32
    %c0_i32_3 = arith.constant 0 : i32
    return %c0_i32, %c0_i32_0, %c0_i32_1, %c0_i32_2 : i32, i32, i32, i32
  }
  func.func @transform_2(%arg0: i32, %arg1: i32) -> (i32, i32) {
    %c0_i32 = arith.constant 0 : i32
    %c0_i32_0 = arith.constant 0 : i32
    %c0_i32_1 = arith.constant 0 : i32
    return %c0_i32, %c0_i32_0 : i32, i32
  }
  func.func @transform_3(%arg0: i32, %arg1: i32) -> (i32, i32, i32) {
    %c0_i32 = arith.constant 0 : i32
    %c0_i32_0 = arith.constant 0 : i32
    return %arg0, %arg1, %c0_i32 : i32, i32, i32
  }
}

module attributes {stable_mosaic.version = 11 : i64} {
  func.func @_conv_block_kernel(%arg0: i32, %arg1: i32, %arg2: memref<1x10x10x16xf32, #tpu.memory_space<vmem>>, %arg3: memref<3x3x16x64xf32, #tpu.memory_space<vmem>>, %arg4: memref<1x64xf32, #tpu.memory_space<vmem>>, %arg5: memref<1x64x64xf32, #tpu.memory_space<vmem>>) attributes {dimension_semantics = [#tpu.dimension_semantics<parallel>, #tpu.dimension_semantics<parallel>], iteration_bounds = array<i64: 2, 1>, scalar_prefetch = 0 : i64, scratch_operands = 0 : i64, tpu.core_type = #tpu.core_type<tc>, window_params = [{transform_indices = @transform_0, window_bounds = array<i64: 1, 10, 10, 16>}, {pipeline_mode = #tpu.pipeline_mode<synchronous>, transform_indices = @transform_1, window_bounds = array<i64: 3, 3, 16, 64>}, {pipeline_mode = #tpu.pipeline_mode<synchronous>, transform_indices = @transform_2, window_bounds = array<i64: 1, 64>}, {transform_indices = @transform_3, window_bounds = array<i64: 1, 64, 64>}]} {
    %c8_i32 = arith.constant 8 : i32
    %0 = arith.muli %arg1, %c8_i32 : i32
    %cst = arith.constant 0.000000e+00 : f32
    %1 = vector.broadcast %cst : f32 to vector<64x64xf32>
    %c0_i32 = arith.constant 0 : i32
    %2 = arith.addi %0, %c0_i32 : i32
    %c0 = arith.constant 0 : index
    %3 = arith.index_cast %2 : i32 to index
    %c0_0 = arith.constant 0 : index
    %c0_1 = arith.constant 0 : index
    %4 = vector.load %arg2[%c0, %3, %c0_0, %c0_1] : memref<1x10x10x16xf32, #tpu.memory_space<vmem>>, vector<1x8x8x16xf32>
    %5 = vector.shape_cast %4 : vector<1x8x8x16xf32> to vector<8x8x16xf32>
    %6 = vector.shape_cast %5 : vector<8x8x16xf32> to vector<64x16xf32>
    %c0_2 = arith.constant 0 : index
    %c0_3 = arith.constant 0 : index
    %c0_4 = arith.constant 0 : index
    %c0_5 = arith.constant 0 : index
    %7 = vector.load %arg3[%c0_2, %c0_3, %c0_4, %c0_5] : memref<3x3x16x64xf32, #tpu.memory_space<vmem>>, vector<1x1x16x64xf32>
    %8 = vector.shape_cast %7 : vector<1x1x16x64xf32> to vector<16x64xf32>
    %cst_6 = arith.constant dense<0.000000e+00> : vector<64x64xf32>
    %9 = tpu.matmul %6, %8, %cst_6 {dimension_numbers = #tpu.dot_dimension_numbers<[1], [0], [0], [1], [0, 0, 1, 1], [], []>} : vector<64x16xf32>, vector<16x64xf32>, vector<64x64xf32> -> vector<64x64xf32>
    %10 = arith.addf %1, %9 : vector<64x64xf32>
    %c0_i32_7 = arith.constant 0 : i32
    %11 = arith.addi %0, %c0_i32_7 : i32
    %c0_8 = arith.constant 0 : index
    %12 = arith.index_cast %11 : i32 to index
    %c1 = arith.constant 1 : index
    %c0_9 = arith.constant 0 : index
    %13 = vector.load %arg2[%c0_8, %12, %c1, %c0_9] : memref<1x10x10x16xf32, #tpu.memory_space<vmem>>, vector<1x8x8x16xf32>
    %14 = vector.shape_cast %13 : vector<1x8x8x16xf32> to vector<8x8x16xf32>
    %15 = vector.shape_cast %14 : vector<8x8x16xf32> to vector<64x16xf32>
    %c0_10 = arith.constant 0 : index
    %c1_11 = arith.constant 1 : index
    %c0_12 = arith.constant 0 : index
    %c0_13 = arith.constant 0 : index
    %16 = vector.load %arg3[%c0_10, %c1_11, %c0_12, %c0_13] : memref<3x3x16x64xf32, #tpu.memory_space<vmem>>, vector<1x1x16x64xf32>
    %17 = vector.shape_cast %16 : vector<1x1x16x64xf32> to vector<16x64xf32>
    %cst_14 = arith.constant dense<0.000000e+00> : vector<64x64xf32>
    %18 = tpu.matmul %15, %17, %cst_14 {dimension_numbers = #tpu.dot_dimension_numbers<[1], [0], [0], [1], [0, 0, 1, 1], [], []>} : vector<64x16xf32>, vector<16x64xf32>, vector<64x64xf32> -> vector<64x64xf32>
    %19 = arith.addf %10, %18 : vector<64x64xf32>
    %c0_i32_15 = arith.constant 0 : i32
    %20 = arith.addi %0, %c0_i32_15 : i32
    %c0_16 = arith.constant 0 : index
    %21 = arith.index_cast %20 : i32 to index
    %c2 = arith.constant 2 : index
    %c0_17 = arith.constant 0 : index
    %22 = vector.load %arg2[%c0_16, %21, %c2, %c0_17] : memref<1x10x10x16xf32, #tpu.memory_space<vmem>>, vector<1x8x8x16xf32>
    %23 = vector.shape_cast %22 : vector<1x8x8x16xf32> to vector<8x8x16xf32>
    %24 = vector.shape_cast %23 : vector<8x8x16xf32> to vector<64x16xf32>
    %c0_18 = arith.constant 0 : index
    %c2_19 = arith.constant 2 : index
    %c0_20 = arith.constant 0 : index
    %c0_21 = arith.constant 0 : index
    %25 = vector.load %arg3[%c0_18, %c2_19, %c0_20, %c0_21] : memref<3x3x16x64xf32, #tpu.memory_space<vmem>>, vector<1x1x16x64xf32>
    %26 = vector.shape_cast %25 : vector<1x1x16x64xf32> to vector<16x64xf32>
    %cst_22 = arith.constant dense<0.000000e+00> : vector<64x64xf32>
    %27 = tpu.matmul %24, %26, %cst_22 {dimension_numbers = #tpu.dot_dimension_numbers<[1], [0], [0], [1], [0, 0, 1, 1], [], []>} : vector<64x16xf32>, vector<16x64xf32>, vector<64x64xf32> -> vector<64x64xf32>
    %28 = arith.addf %19, %27 : vector<64x64xf32>
    %c1_i32 = arith.constant 1 : i32
    %29 = arith.addi %0, %c1_i32 : i32
    %c0_23 = arith.constant 0 : index
    %30 = arith.index_cast %29 : i32 to index
    %c0_24 = arith.constant 0 : index
    %c0_25 = arith.constant 0 : index
    %31 = vector.load %arg2[%c0_23, %30, %c0_24, %c0_25] : memref<1x10x10x16xf32, #tpu.memory_space<vmem>>, vector<1x8x8x16xf32>
    %32 = vector.shape_cast %31 : vector<1x8x8x16xf32> to vector<8x8x16xf32>
    %33 = vector.shape_cast %32 : vector<8x8x16xf32> to vector<64x16xf32>
    %c1_26 = arith.constant 1 : index
    %c0_27 = arith.constant 0 : index
    %c0_28 = arith.constant 0 : index
    %c0_29 = arith.constant 0 : index
    %34 = vector.load %arg3[%c1_26, %c0_27, %c0_28, %c0_29] : memref<3x3x16x64xf32, #tpu.memory_space<vmem>>, vector<1x1x16x64xf32>
    %35 = vector.shape_cast %34 : vector<1x1x16x64xf32> to vector<16x64xf32>
    %cst_30 = arith.constant dense<0.000000e+00> : vector<64x64xf32>
    %36 = tpu.matmul %33, %35, %cst_30 {dimension_numbers = #tpu.dot_dimension_numbers<[1], [0], [0], [1], [0, 0, 1, 1], [], []>} : vector<64x16xf32>, vector<16x64xf32>, vector<64x64xf32> -> vector<64x64xf32>
    %37 = arith.addf %28, %36 : vector<64x64xf32>
    %c1_i32_31 = arith.constant 1 : i32
    %38 = arith.addi %0, %c1_i32_31 : i32
    %c0_32 = arith.constant 0 : index
    %39 = arith.index_cast %38 : i32 to index
    %c1_33 = arith.constant 1 : index
    %c0_34 = arith.constant 0 : index
    %40 = vector.load %arg2[%c0_32, %39, %c1_33, %c0_34] : memref<1x10x10x16xf32, #tpu.memory_space<vmem>>, vector<1x8x8x16xf32>
    %41 = vector.shape_cast %40 : vector<1x8x8x16xf32> to vector<8x8x16xf32>
    %42 = vector.shape_cast %41 : vector<8x8x16xf32> to vector<64x16xf32>
    %c1_35 = arith.constant 1 : index
    %c1_36 = arith.constant 1 : index
    %c0_37 = arith.constant 0 : index
    %c0_38 = arith.constant 0 : index
    %43 = vector.load %arg3[%c1_35, %c1_36, %c0_37, %c0_38] : memref<3x3x16x64xf32, #tpu.memory_space<vmem>>, vector<1x1x16x64xf32>
    %44 = vector.shape_cast %43 : vector<1x1x16x64xf32> to vector<16x64xf32>
    %cst_39 = arith.constant dense<0.000000e+00> : vector<64x64xf32>
    %45 = tpu.matmul %42, %44, %cst_39 {dimension_numbers = #tpu.dot_dimension_numbers<[1], [0], [0], [1], [0, 0, 1, 1], [], []>} : vector<64x16xf32>, vector<16x64xf32>, vector<64x64xf32> -> vector<64x64xf32>
    %46 = arith.addf %37, %45 : vector<64x64xf32>
    %c1_i32_40 = arith.constant 1 : i32
    %47 = arith.addi %0, %c1_i32_40 : i32
    %c0_41 = arith.constant 0 : index
    %48 = arith.index_cast %47 : i32 to index
    %c2_42 = arith.constant 2 : index
    %c0_43 = arith.constant 0 : index
    %49 = vector.load %arg2[%c0_41, %48, %c2_42, %c0_43] : memref<1x10x10x16xf32, #tpu.memory_space<vmem>>, vector<1x8x8x16xf32>
    %50 = vector.shape_cast %49 : vector<1x8x8x16xf32> to vector<8x8x16xf32>
    %51 = vector.shape_cast %50 : vector<8x8x16xf32> to vector<64x16xf32>
    %c1_44 = arith.constant 1 : index
    %c2_45 = arith.constant 2 : index
    %c0_46 = arith.constant 0 : index
    %c0_47 = arith.constant 0 : index
    %52 = vector.load %arg3[%c1_44, %c2_45, %c0_46, %c0_47] : memref<3x3x16x64xf32, #tpu.memory_space<vmem>>, vector<1x1x16x64xf32>
    %53 = vector.shape_cast %52 : vector<1x1x16x64xf32> to vector<16x64xf32>
    %cst_48 = arith.constant dense<0.000000e+00> : vector<64x64xf32>
    %54 = tpu.matmul %51, %53, %cst_48 {dimension_numbers = #tpu.dot_dimension_numbers<[1], [0], [0], [1], [0, 0, 1, 1], [], []>} : vector<64x16xf32>, vector<16x64xf32>, vector<64x64xf32> -> vector<64x64xf32>
    %55 = arith.addf %46, %54 : vector<64x64xf32>
    %c2_i32 = arith.constant 2 : i32
    %56 = arith.addi %0, %c2_i32 : i32
    %c0_49 = arith.constant 0 : index
    %57 = arith.index_cast %56 : i32 to index
    %c0_50 = arith.constant 0 : index
    %c0_51 = arith.constant 0 : index
    %58 = vector.load %arg2[%c0_49, %57, %c0_50, %c0_51] : memref<1x10x10x16xf32, #tpu.memory_space<vmem>>, vector<1x8x8x16xf32>
    %59 = vector.shape_cast %58 : vector<1x8x8x16xf32> to vector<8x8x16xf32>
    %60 = vector.shape_cast %59 : vector<8x8x16xf32> to vector<64x16xf32>
    %c2_52 = arith.constant 2 : index
    %c0_53 = arith.constant 0 : index
    %c0_54 = arith.constant 0 : index
    %c0_55 = arith.constant 0 : index
    %61 = vector.load %arg3[%c2_52, %c0_53, %c0_54, %c0_55] : memref<3x3x16x64xf32, #tpu.memory_space<vmem>>, vector<1x1x16x64xf32>
    %62 = vector.shape_cast %61 : vector<1x1x16x64xf32> to vector<16x64xf32>
    %cst_56 = arith.constant dense<0.000000e+00> : vector<64x64xf32>
    %63 = tpu.matmul %60, %62, %cst_56 {dimension_numbers = #tpu.dot_dimension_numbers<[1], [0], [0], [1], [0, 0, 1, 1], [], []>} : vector<64x16xf32>, vector<16x64xf32>, vector<64x64xf32> -> vector<64x64xf32>
    %64 = arith.addf %55, %63 : vector<64x64xf32>
    %c2_i32_57 = arith.constant 2 : i32
    %65 = arith.addi %0, %c2_i32_57 : i32
    %c0_58 = arith.constant 0 : index
    %66 = arith.index_cast %65 : i32 to index
    %c1_59 = arith.constant 1 : index
    %c0_60 = arith.constant 0 : index
    %67 = vector.load %arg2[%c0_58, %66, %c1_59, %c0_60] : memref<1x10x10x16xf32, #tpu.memory_space<vmem>>, vector<1x8x8x16xf32>
    %68 = vector.shape_cast %67 : vector<1x8x8x16xf32> to vector<8x8x16xf32>
    %69 = vector.shape_cast %68 : vector<8x8x16xf32> to vector<64x16xf32>
    %c2_61 = arith.constant 2 : index
    %c1_62 = arith.constant 1 : index
    %c0_63 = arith.constant 0 : index
    %c0_64 = arith.constant 0 : index
    %70 = vector.load %arg3[%c2_61, %c1_62, %c0_63, %c0_64] : memref<3x3x16x64xf32, #tpu.memory_space<vmem>>, vector<1x1x16x64xf32>
    %71 = vector.shape_cast %70 : vector<1x1x16x64xf32> to vector<16x64xf32>
    %cst_65 = arith.constant dense<0.000000e+00> : vector<64x64xf32>
    %72 = tpu.matmul %69, %71, %cst_65 {dimension_numbers = #tpu.dot_dimension_numbers<[1], [0], [0], [1], [0, 0, 1, 1], [], []>} : vector<64x16xf32>, vector<16x64xf32>, vector<64x64xf32> -> vector<64x64xf32>
    %73 = arith.addf %64, %72 : vector<64x64xf32>
    %c2_i32_66 = arith.constant 2 : i32
    %74 = arith.addi %0, %c2_i32_66 : i32
    %c0_67 = arith.constant 0 : index
    %75 = arith.index_cast %74 : i32 to index
    %c2_68 = arith.constant 2 : index
    %c0_69 = arith.constant 0 : index
    %76 = vector.load %arg2[%c0_67, %75, %c2_68, %c0_69] : memref<1x10x10x16xf32, #tpu.memory_space<vmem>>, vector<1x8x8x16xf32>
    %77 = vector.shape_cast %76 : vector<1x8x8x16xf32> to vector<8x8x16xf32>
    %78 = vector.shape_cast %77 : vector<8x8x16xf32> to vector<64x16xf32>
    %c2_70 = arith.constant 2 : index
    %c2_71 = arith.constant 2 : index
    %c0_72 = arith.constant 0 : index
    %c0_73 = arith.constant 0 : index
    %79 = vector.load %arg3[%c2_70, %c2_71, %c0_72, %c0_73] : memref<3x3x16x64xf32, #tpu.memory_space<vmem>>, vector<1x1x16x64xf32>
    %80 = vector.shape_cast %79 : vector<1x1x16x64xf32> to vector<16x64xf32>
    %cst_74 = arith.constant dense<0.000000e+00> : vector<64x64xf32>
    %81 = tpu.matmul %78, %80, %cst_74 {dimension_numbers = #tpu.dot_dimension_numbers<[1], [0], [0], [1], [0, 0, 1, 1], [], []>} : vector<64x16xf32>, vector<16x64xf32>, vector<64x64xf32> -> vector<64x64xf32>
    %82 = arith.addf %73, %81 : vector<64x64xf32>
    %c0_75 = arith.constant 0 : index
    %c0_76 = arith.constant 0 : index
    %83 = vector.load %arg4[%c0_75, %c0_76] : memref<1x64xf32, #tpu.memory_space<vmem>>, vector<1x64xf32>
    %84 = vector.broadcast %83 : vector<1x64xf32> to vector<64x64xf32>
    %85 = arith.addf %82, %84 : vector<64x64xf32>
    %cst_77 = arith.constant 0.000000e+00 : f32
    %86 = vector.broadcast %cst_77 : f32 to vector<64x64xf32>
    %87 = arith.cmpf oge, %85, %86 : vector<64x64xf32>
    %cst_78 = arith.constant 2.000000e-01 : f32
    %88 = vector.broadcast %cst_78 : f32 to vector<64x64xf32>
    %89 = arith.mulf %88, %85 : vector<64x64xf32>
    %90 = arith.select %87, %85, %89 : vector<64x64xi1>, vector<64x64xf32>
    %c0_79 = arith.constant 0 : index
    %c0_80 = arith.constant 0 : index
    %c0_81 = arith.constant 0 : index
    %91 = vector.load %arg5[%c0_79, %c0_80, %c0_81] : memref<1x64x64xf32, #tpu.memory_space<vmem>>, vector<1x64x64xf32>
    %92 = vector.shape_cast %91 : vector<1x64x64xf32> to vector<64x64xf32>
    %93 = vector.shape_cast %90 : vector<64x64xf32> to vector<1x64x64xf32>
    tpu.vector_store %arg5[%c0_79, %c0_80, %c0_81], %93 {strides = array<i32>} : memref<1x64x64xf32, #tpu.memory_space<vmem>>, vector<1x64x64xf32>,
    return
  }
  func.func @transform_0(%arg0: i32, %arg1: i32) -> (i32, i32, i32, i32) {
    %c0_i32 = arith.constant 0 : i32
    %c0_i32_0 = arith.constant 0 : i32
    %c0_i32_1 = arith.constant 0 : i32
    %c0_i32_2 = arith.constant 0 : i32
    return %arg0, %c0_i32, %c0_i32_0, %c0_i32_1 : i32, i32, i32, i32
  }
  func.func @transform_1(%arg0: i32, %arg1: i32) -> (i32, i32, i32, i32) {
    %c0_i32 = arith.constant 0 : i32
    %c0_i32_0 = arith.constant 0 : i32
    %c0_i32_1 = arith.constant 0 : i32
    %c0_i32_2 = arith.constant 0 : i32
    %c0_i32_3 = arith.constant 0 : i32
    return %c0_i32, %c0_i32_0, %c0_i32_1, %c0_i32_2 : i32, i32, i32, i32
  }
  func.func @transform_2(%arg0: i32, %arg1: i32) -> (i32, i32) {
    %c0_i32 = arith.constant 0 : i32
    %c0_i32_0 = arith.constant 0 : i32
    %c0_i32_1 = arith.constant 0 : i32
    return %c0_i32, %c0_i32_0 : i32, i32
  }
  func.func @transform_3(%arg0: i32, %arg1: i32) -> (i32, i32, i32) {
    %c0_i32 = arith.constant 0 : i32
    %c0_i32_0 = arith.constant 0 : i32
    return %arg0, %arg1, %c0_i32 : i32, i32, i32
  }
}

module attributes {stable_mosaic.version = 11 : i64} {
  func.func @_conv_block_kernel(%arg0: i32, %arg1: i32, %arg2: memref<1x18x18x16xf32, #tpu.memory_space<vmem>>, %arg3: memref<3x3x16x16xf32, #tpu.memory_space<vmem>>, %arg4: memref<1x16xf32, #tpu.memory_space<vmem>>, %arg5: memref<16x32xf32, #tpu.memory_space<vmem>>, %arg6: memref<1x32xf32, #tpu.memory_space<vmem>>, %arg7: memref<1x256x32xf32, #tpu.memory_space<vmem>>) attributes {dimension_semantics = [#tpu.dimension_semantics<parallel>, #tpu.dimension_semantics<parallel>], iteration_bounds = array<i64: 2, 1>, scalar_prefetch = 0 : i64, scratch_operands = 0 : i64, tpu.core_type = #tpu.core_type<tc>, window_params = [{transform_indices = @transform_0, window_bounds = array<i64: 1, 18, 18, 16>}, {pipeline_mode = #tpu.pipeline_mode<synchronous>, transform_indices = @transform_1, window_bounds = array<i64: 3, 3, 16, 16>}, {pipeline_mode = #tpu.pipeline_mode<synchronous>, transform_indices = @transform_2, window_bounds = array<i64: 1, 16>}, {pipeline_mode = #tpu.pipeline_mode<synchronous>, transform_indices = @transform_3, window_bounds = array<i64: 16, 32>}, {pipeline_mode = #tpu.pipeline_mode<synchronous>, transform_indices = @transform_4, window_bounds = array<i64: 1, 32>}, {transform_indices = @transform_5, window_bounds = array<i64: 1, 256, 32>}]} {
    %c16_i32 = arith.constant 16 : i32
    %0 = arith.muli %arg1, %c16_i32 : i32
    %cst = arith.constant 0.000000e+00 : f32
    %1 = vector.broadcast %cst : f32 to vector<256x16xf32>
    %c0_i32 = arith.constant 0 : i32
    %2 = arith.addi %0, %c0_i32 : i32
    %c0 = arith.constant 0 : index
    %3 = arith.index_cast %2 : i32 to index
    %c0_0 = arith.constant 0 : index
    %c0_1 = arith.constant 0 : index
    %4 = vector.load %arg2[%c0, %3, %c0_0, %c0_1] : memref<1x18x18x16xf32, #tpu.memory_space<vmem>>, vector<1x16x16x16xf32>
    %5 = vector.shape_cast %4 : vector<1x16x16x16xf32> to vector<16x16x16xf32>
    %6 = vector.shape_cast %5 : vector<16x16x16xf32> to vector<256x16xf32>
    %c0_2 = arith.constant 0 : index
    %c0_3 = arith.constant 0 : index
    %c0_4 = arith.constant 0 : index
    %c0_5 = arith.constant 0 : index
    %7 = vector.load %arg3[%c0_2, %c0_3, %c0_4, %c0_5] : memref<3x3x16x16xf32, #tpu.memory_space<vmem>>, vector<1x1x16x16xf32>
    %8 = vector.shape_cast %7 : vector<1x1x16x16xf32> to vector<16x16xf32>
    %cst_6 = arith.constant dense<0.000000e+00> : vector<256x16xf32>
    %9 = tpu.matmul %6, %8, %cst_6 {dimension_numbers = #tpu.dot_dimension_numbers<[1], [0], [0], [1], [0, 0, 1, 1], [], []>} : vector<256x16xf32>, vector<16x16xf32>, vector<256x16xf32> -> vector<256x16xf32>
    %10 = arith.addf %1, %9 : vector<256x16xf32>
    %c0_i32_7 = arith.constant 0 : i32
    %11 = arith.addi %0, %c0_i32_7 : i32
    %c0_8 = arith.constant 0 : index
    %12 = arith.index_cast %11 : i32 to index
    %c1 = arith.constant 1 : index
    %c0_9 = arith.constant 0 : index
    %13 = vector.load %arg2[%c0_8, %12, %c1, %c0_9] : memref<1x18x18x16xf32, #tpu.memory_space<vmem>>, vector<1x16x16x16xf32>
    %14 = vector.shape_cast %13 : vector<1x16x16x16xf32> to vector<16x16x16xf32>
    %15 = vector.shape_cast %14 : vector<16x16x16xf32> to vector<256x16xf32>
    %c0_10 = arith.constant 0 : index
    %c1_11 = arith.constant 1 : index
    %c0_12 = arith.constant 0 : index
    %c0_13 = arith.constant 0 : index
    %16 = vector.load %arg3[%c0_10, %c1_11, %c0_12, %c0_13] : memref<3x3x16x16xf32, #tpu.memory_space<vmem>>, vector<1x1x16x16xf32>
    %17 = vector.shape_cast %16 : vector<1x1x16x16xf32> to vector<16x16xf32>
    %cst_14 = arith.constant dense<0.000000e+00> : vector<256x16xf32>
    %18 = tpu.matmul %15, %17, %cst_14 {dimension_numbers = #tpu.dot_dimension_numbers<[1], [0], [0], [1], [0, 0, 1, 1], [], []>} : vector<256x16xf32>, vector<16x16xf32>, vector<256x16xf32> -> vector<256x16xf32>
    %19 = arith.addf %10, %18 : vector<256x16xf32>
    %c0_i32_15 = arith.constant 0 : i32
    %20 = arith.addi %0, %c0_i32_15 : i32
    %c0_16 = arith.constant 0 : index
    %21 = arith.index_cast %20 : i32 to index
    %c2 = arith.constant 2 : index
    %c0_17 = arith.constant 0 : index
    %22 = vector.load %arg2[%c0_16, %21, %c2, %c0_17] : memref<1x18x18x16xf32, #tpu.memory_space<vmem>>, vector<1x16x16x16xf32>
    %23 = vector.shape_cast %22 : vector<1x16x16x16xf32> to vector<16x16x16xf32>
    %24 = vector.shape_cast %23 : vector<16x16x16xf32> to vector<256x16xf32>
    %c0_18 = arith.constant 0 : index
    %c2_19 = arith.constant 2 : index
    %c0_20 = arith.constant 0 : index
    %c0_21 = arith.constant 0 : index
    %25 = vector.load %arg3[%c0_18, %c2_19, %c0_20, %c0_21] : memref<3x3x16x16xf32, #tpu.memory_space<vmem>>, vector<1x1x16x16xf32>
    %26 = vector.shape_cast %25 : vector<1x1x16x16xf32> to vector<16x16xf32>
    %cst_22 = arith.constant dense<0.000000e+00> : vector<256x16xf32>
    %27 = tpu.matmul %24, %26, %cst_22 {dimension_numbers = #tpu.dot_dimension_numbers<[1], [0], [0], [1], [0, 0, 1, 1], [], []>} : vector<256x16xf32>, vector<16x16xf32>, vector<256x16xf32> -> vector<256x16xf32>
    %28 = arith.addf %19, %27 : vector<256x16xf32>
    %c1_i32 = arith.constant 1 : i32
    %29 = arith.addi %0, %c1_i32 : i32
    %c0_23 = arith.constant 0 : index
    %30 = arith.index_cast %29 : i32 to index
    %c0_24 = arith.constant 0 : index
    %c0_25 = arith.constant 0 : index
    %31 = vector.load %arg2[%c0_23, %30, %c0_24, %c0_25] : memref<1x18x18x16xf32, #tpu.memory_space<vmem>>, vector<1x16x16x16xf32>
    %32 = vector.shape_cast %31 : vector<1x16x16x16xf32> to vector<16x16x16xf32>
    %33 = vector.shape_cast %32 : vector<16x16x16xf32> to vector<256x16xf32>
    %c1_26 = arith.constant 1 : index
    %c0_27 = arith.constant 0 : index
    %c0_28 = arith.constant 0 : index
    %c0_29 = arith.constant 0 : index
    %34 = vector.load %arg3[%c1_26, %c0_27, %c0_28, %c0_29] : memref<3x3x16x16xf32, #tpu.memory_space<vmem>>, vector<1x1x16x16xf32>
    %35 = vector.shape_cast %34 : vector<1x1x16x16xf32> to vector<16x16xf32>
    %cst_30 = arith.constant dense<0.000000e+00> : vector<256x16xf32>
    %36 = tpu.matmul %33, %35, %cst_30 {dimension_numbers = #tpu.dot_dimension_numbers<[1], [0], [0], [1], [0, 0, 1, 1], [], []>} : vector<256x16xf32>, vector<16x16xf32>, vector<256x16xf32> -> vector<256x16xf32>
    %37 = arith.addf %28, %36 : vector<256x16xf32>
    %c1_i32_31 = arith.constant 1 : i32
    %38 = arith.addi %0, %c1_i32_31 : i32
    %c0_32 = arith.constant 0 : index
    %39 = arith.index_cast %38 : i32 to index
    %c1_33 = arith.constant 1 : index
    %c0_34 = arith.constant 0 : index
    %40 = vector.load %arg2[%c0_32, %39, %c1_33, %c0_34] : memref<1x18x18x16xf32, #tpu.memory_space<vmem>>, vector<1x16x16x16xf32>
    %41 = vector.shape_cast %40 : vector<1x16x16x16xf32> to vector<16x16x16xf32>
    %42 = vector.shape_cast %41 : vector<16x16x16xf32> to vector<256x16xf32>
    %c1_35 = arith.constant 1 : index
    %c1_36 = arith.constant 1 : index
    %c0_37 = arith.constant 0 : index
    %c0_38 = arith.constant 0 : index
    %43 = vector.load %arg3[%c1_35, %c1_36, %c0_37, %c0_38] : memref<3x3x16x16xf32, #tpu.memory_space<vmem>>, vector<1x1x16x16xf32>
    %44 = vector.shape_cast %43 : vector<1x1x16x16xf32> to vector<16x16xf32>
    %cst_39 = arith.constant dense<0.000000e+00> : vector<256x16xf32>
    %45 = tpu.matmul %42, %44, %cst_39 {dimension_numbers = #tpu.dot_dimension_numbers<[1], [0], [0], [1], [0, 0, 1, 1], [], []>} : vector<256x16xf32>, vector<16x16xf32>, vector<256x16xf32> -> vector<256x16xf32>
    %46 = arith.addf %37, %45 : vector<256x16xf32>
    %c1_i32_40 = arith.constant 1 : i32
    %47 = arith.addi %0, %c1_i32_40 : i32
    %c0_41 = arith.constant 0 : index
    %48 = arith.index_cast %47 : i32 to index
    %c2_42 = arith.constant 2 : index
    %c0_43 = arith.constant 0 : index
    %49 = vector.load %arg2[%c0_41, %48, %c2_42, %c0_43] : memref<1x18x18x16xf32, #tpu.memory_space<vmem>>, vector<1x16x16x16xf32>
    %50 = vector.shape_cast %49 : vector<1x16x16x16xf32> to vector<16x16x16xf32>
    %51 = vector.shape_cast %50 : vector<16x16x16xf32> to vector<256x16xf32>
    %c1_44 = arith.constant 1 : index
    %c2_45 = arith.constant 2 : index
    %c0_46 = arith.constant 0 : index
    %c0_47 = arith.constant 0 : index
    %52 = vector.load %arg3[%c1_44, %c2_45, %c0_46, %c0_47] : memref<3x3x16x16xf32, #tpu.memory_space<vmem>>, vector<1x1x16x16xf32>
    %53 = vector.shape_cast %52 : vector<1x1x16x16xf32> to vector<16x16xf32>
    %cst_48 = arith.constant dense<0.000000e+00> : vector<256x16xf32>
    %54 = tpu.matmul %51, %53, %cst_48 {dimension_numbers = #tpu.dot_dimension_numbers<[1], [0], [0], [1], [0, 0, 1, 1], [], []>} : vector<256x16xf32>, vector<16x16xf32>, vector<256x16xf32> -> vector<256x16xf32>
    %55 = arith.addf %46, %54 : vector<256x16xf32>
    %c2_i32 = arith.constant 2 : i32
    %56 = arith.addi %0, %c2_i32 : i32
    %c0_49 = arith.constant 0 : index
    %57 = arith.index_cast %56 : i32 to index
    %c0_50 = arith.constant 0 : index
    %c0_51 = arith.constant 0 : index
    %58 = vector.load %arg2[%c0_49, %57, %c0_50, %c0_51] : memref<1x18x18x16xf32, #tpu.memory_space<vmem>>, vector<1x16x16x16xf32>
    %59 = vector.shape_cast %58 : vector<1x16x16x16xf32> to vector<16x16x16xf32>
    %60 = vector.shape_cast %59 : vector<16x16x16xf32> to vector<256x16xf32>
    %c2_52 = arith.constant 2 : index
    %c0_53 = arith.constant 0 : index
    %c0_54 = arith.constant 0 : index
    %c0_55 = arith.constant 0 : index
    %61 = vector.load %arg3[%c2_52, %c0_53, %c0_54, %c0_55] : memref<3x3x16x16xf32, #tpu.memory_space<vmem>>, vector<1x1x16x16xf32>
    %62 = vector.shape_cast %61 : vector<1x1x16x16xf32> to vector<16x16xf32>
    %cst_56 = arith.constant dense<0.000000e+00> : vector<256x16xf32>
    %63 = tpu.matmul %60, %62, %cst_56 {dimension_numbers = #tpu.dot_dimension_numbers<[1], [0], [0], [1], [0, 0, 1, 1], [], []>} : vector<256x16xf32>, vector<16x16xf32>, vector<256x16xf32> -> vector<256x16xf32>
    %64 = arith.addf %55, %63 : vector<256x16xf32>
    %c2_i32_57 = arith.constant 2 : i32
    %65 = arith.addi %0, %c2_i32_57 : i32
    %c0_58 = arith.constant 0 : index
    %66 = arith.index_cast %65 : i32 to index
    %c1_59 = arith.constant 1 : index
    %c0_60 = arith.constant 0 : index
    %67 = vector.load %arg2[%c0_58, %66, %c1_59, %c0_60] : memref<1x18x18x16xf32, #tpu.memory_space<vmem>>, vector<1x16x16x16xf32>
    %68 = vector.shape_cast %67 : vector<1x16x16x16xf32> to vector<16x16x16xf32>
    %69 = vector.shape_cast %68 : vector<16x16x16xf32> to vector<256x16xf32>
    %c2_61 = arith.constant 2 : index
    %c1_62 = arith.constant 1 : index
    %c0_63 = arith.constant 0 : index
    %c0_64 = arith.constant 0 : index
    %70 = vector.load %arg3[%c2_61, %c1_62, %c0_63, %c0_64] : memref<3x3x16x16xf32, #tpu.memory_space<vmem>>, vector<1x1x16x16xf32>
    %71 = vector.shape_cast %70 : vector<1x1x16x16xf32> to vector<16x16xf32>
    %cst_65 = arith.constant dense<0.000000e+00> : vector<256x16xf32>
    %72 = tpu.matmul %69, %71, %cst_65 {dimension_numbers = #tpu.dot_dimension_numbers<[1], [0], [0], [1], [0, 0, 1, 1], [], []>} : vector<256x16xf32>, vector<16x16xf32>, vector<256x16xf32> -> vector<256x16xf32>
    %73 = arith.addf %64, %72 : vector<256x16xf32>
    %c2_i32_66 = arith.constant 2 : i32
    %74 = arith.addi %0, %c2_i32_66 : i32
    %c0_67 = arith.constant 0 : index
    %75 = arith.index_cast %74 : i32 to index
    %c2_68 = arith.constant 2 : index
    %c0_69 = arith.constant 0 : index
    %76 = vector.load %arg2[%c0_67, %75, %c2_68, %c0_69] : memref<1x18x18x16xf32, #tpu.memory_space<vmem>>, vector<1x16x16x16xf32>
    %77 = vector.shape_cast %76 : vector<1x16x16x16xf32> to vector<16x16x16xf32>
    %78 = vector.shape_cast %77 : vector<16x16x16xf32> to vector<256x16xf32>
    %c2_70 = arith.constant 2 : index
    %c2_71 = arith.constant 2 : index
    %c0_72 = arith.constant 0 : index
    %c0_73 = arith.constant 0 : index
    %79 = vector.load %arg3[%c2_70, %c2_71, %c0_72, %c0_73] : memref<3x3x16x16xf32, #tpu.memory_space<vmem>>, vector<1x1x16x16xf32>
    %80 = vector.shape_cast %79 : vector<1x1x16x16xf32> to vector<16x16xf32>
    %cst_74 = arith.constant dense<0.000000e+00> : vector<256x16xf32>
    %81 = tpu.matmul %78, %80, %cst_74 {dimension_numbers = #tpu.dot_dimension_numbers<[1], [0], [0], [1], [0, 0, 1, 1], [], []>} : vector<256x16xf32>, vector<16x16xf32>, vector<256x16xf32> -> vector<256x16xf32>
    %82 = arith.addf %73, %81 : vector<256x16xf32>
    %c0_75 = arith.constant 0 : index
    %c0_76 = arith.constant 0 : index
    %83 = vector.load %arg4[%c0_75, %c0_76] : memref<1x16xf32, #tpu.memory_space<vmem>>, vector<1x16xf32>
    %84 = vector.broadcast %83 : vector<1x16xf32> to vector<256x16xf32>
    %85 = arith.addf %82, %84 : vector<256x16xf32>
    %cst_77 = arith.constant 0.000000e+00 : f32
    %86 = vector.broadcast %cst_77 : f32 to vector<256x16xf32>
    %87 = arith.cmpf oge, %85, %86 : vector<256x16xf32>
    %cst_78 = arith.constant 2.000000e-01 : f32
    %88 = vector.broadcast %cst_78 : f32 to vector<256x16xf32>
    %89 = arith.mulf %88, %85 : vector<256x16xf32>
    %90 = arith.select %87, %85, %89 : vector<256x16xi1>, vector<256x16xf32>
    %c0_79 = arith.constant 0 : index
    %c0_80 = arith.constant 0 : index
    %91 = vector.load %arg5[%c0_79, %c0_80] : memref<16x32xf32, #tpu.memory_space<vmem>>, vector<16x32xf32>
    %cst_81 = arith.constant dense<0.000000e+00> : vector<256x32xf32>
    %92 = tpu.matmul %90, %91, %cst_81 {dimension_numbers = #tpu.dot_dimension_numbers<[1], [0], [0], [1], [0, 0, 1, 1], [], []>} : vector<256x16xf32>, vector<16x32xf32>, vector<256x32xf32> -> vector<256x32xf32>
    %c0_82 = arith.constant 0 : index
    %c0_83 = arith.constant 0 : index
    %93 = vector.load %arg6[%c0_82, %c0_83] : memref<1x32xf32, #tpu.memory_space<vmem>>, vector<1x32xf32>
    %94 = vector.broadcast %93 : vector<1x32xf32> to vector<256x32xf32>
    %95 = arith.addf %92, %94 : vector<256x32xf32>
    %c0_84 = arith.constant 0 : index
    %c0_85 = arith.constant 0 : index
    %c0_86 = arith.constant 0 : index
    %96 = vector.load %arg7[%c0_84, %c0_85, %c0_86] : memref<1x256x32xf32, #tpu.memory_space<vmem>>, vector<1x256x32xf32>
    %97 = vector.shape_cast %96 : vector<1x256x32xf32> to vector<256x32xf32>
    %98 = vector.shape_cast %95 : vector<256x32xf32> to vector<1x256x32xf32>
    tpu.vector_store %arg7[%c0_84, %c0_85, %c0_86], %98 {strides = array<i32>} : memref<1x256x32xf32, #tpu.memory_space<vmem>>, vector<1x256x32xf32>,
    return
  }
  func.func @transform_0(%arg0: i32, %arg1: i32) -> (i32, i32, i32, i32) {
    %c0_i32 = arith.constant 0 : i32
    %c0_i32_0 = arith.constant 0 : i32
    %c0_i32_1 = arith.constant 0 : i32
    %c0_i32_2 = arith.constant 0 : i32
    return %arg0, %c0_i32, %c0_i32_0, %c0_i32_1 : i32, i32, i32, i32
  }
  func.func @transform_1(%arg0: i32, %arg1: i32) -> (i32, i32, i32, i32) {
    %c0_i32 = arith.constant 0 : i32
    %c0_i32_0 = arith.constant 0 : i32
    %c0_i32_1 = arith.constant 0 : i32
    %c0_i32_2 = arith.constant 0 : i32
    %c0_i32_3 = arith.constant 0 : i32
    return %c0_i32, %c0_i32_0, %c0_i32_1, %c0_i32_2 : i32, i32, i32, i32
  }
  func.func @transform_2(%arg0: i32, %arg1: i32) -> (i32, i32) {
    %c0_i32 = arith.constant 0 : i32
    %c0_i32_0 = arith.constant 0 : i32
    %c0_i32_1 = arith.constant 0 : i32
    return %c0_i32, %c0_i32_0 : i32, i32
  }
  func.func @transform_3(%arg0: i32, %arg1: i32) -> (i32, i32) {
    %c0_i32 = arith.constant 0 : i32
    %c0_i32_0 = arith.constant 0 : i32
    %c0_i32_1 = arith.constant 0 : i32
    return %c0_i32, %c0_i32_0 : i32, i32
  }
  func.func @transform_4(%arg0: i32, %arg1: i32) -> (i32, i32) {
    %c0_i32 = arith.constant 0 : i32
    %c0_i32_0 = arith.constant 0 : i32
    %c0_i32_1 = arith.constant 0 : i32
    return %c0_i32, %c0_i32_0 : i32, i32
  }
  func.func @transform_5(%arg0: i32, %arg1: i32) -> (i32, i32, i32) {
    %c0_i32 = arith.constant 0 : i32
    %c0_i32_0 = arith.constant 0 : i32
    return %arg0, %arg1, %c0_i32 : i32, i32, i32
  }
}

</mosaic_0001>

<bundles_post_ra>
// kernel: tile.13
= control target key start
LH: loop header
LB: loop body
LE: loop exit
PB: predicated region body
PF: predicated region fallthrough
CT: control target
= control target key end

     0   :  { %s22_s0 = inlined_call_operand.vmem [shape: f32[16], index: 0, kind: input, shape index: {}]   ;;  %s23_s1 = inlined_call_operand.vmem [shape: f32[4,16], index: 1, kind: output, shape index: {}]  }
   0x1   :  { %v4_v0 = vld [vmem:[%s22_s0] ss:$0 sm:$0xff] }
   0x2   :  { %5 = vst [vmem:[%s23_s1] sm:$0xf] %v4_v0 }

// kernel: tile.14
= control target key start
LH: loop header
LB: loop body
LE: loop exit
PB: predicated region body
PF: predicated region fallthrough
CT: control target
= control target key end

     0   :  { %vm7_vm0 = vcmask 130048   ;;  %s37_s8 = smov 16   ;;  %s38_s9 = smov 32   ;;  %vm13_vm1 = vcmask 523648   ;;  %vm19_vm2 = vcmask 392448   ;;  %vm25_vm3 = vcmask 261248   ;;  %s55_s0 = inlined_call_operand.vmem [shape: f32[4,16], index: 0, kind: input, shape index: {}]   ;;  %s56_s1 = inlined_call_operand.vmem [shape: f32[1,64], index: 1, kind: output, shape index: {}]  }
   0x1   :  { %v4_v0 = vld [vmem:[%s55_s0] sm:$0xf]  ;;  %s36_s0 = smov 48  }
   0x2   :  { %5 = vst [vmem:[#allocation1] sm:$0xf] %v4_v0 }
   0x9   :  { %v10_v1 = vld [vmem:[#allocation1 + $0x3] sm:$0x1]   ;;  %v22_v2 = vld [vmem:[#allocation1 + $0x1] sm:$0x1]   ;;  %v6_v3 = vld [vmem:[#allocation1] sm:$0x1]  }
   0xa   :  { %11 = vrot.lane.b32.xlu0 %v10_v1, %s36_s0  ;;  %23 = vrot.lane.b32.xlu1 %v22_v2, %s37_s8  ;;  %v16_v4 = vld [vmem:[#allocation1 + $0x2] sm:$0x1]   ;;  %8 = vst.msk [vmem:[#allocation0] sm:$0x1] %vm7_vm0, %v6_v3  }
   0xe   :  { %17 = vrot.lane.b32.xlu0 %v16_v4, %s38_s9 }
  0x7c   :  { %v12_v5 = vpop.permute.xlu0 %11   ;;  %v24_v6 = vpop.permute.xlu1 %23  }
  0x7d   :  { %14 = vst.msk [vmem:[#allocation0] sm:$0x1] %vm13_vm1, %v12_v5  }
  0x80   :  { %v18_v7 = vpop.permute.xlu0 %17  }
  0x81   :  { %20 = vst.msk [vmem:[#allocation0] sm:$0x1] %vm19_vm2, %v18_v7  }
  0x82   :  { %26 = vst.msk [vmem:[#allocation0] sm:$0x1] %vm25_vm3, %v24_v6  }
  0x89   :  { %v30_v8 = vld [vmem:[#allocation0] sm:$0x1] }
  0x8a   :  { %32 = vst [vmem:[%s56_s1] sm:$0x1] %v30_v8 }

// kernel: hyper_decoder_forward.3
= control target key start
LH: loop header
LB: loop body
LE: loop exit
PB: predicated region body
PF: predicated region fallthrough
CT: control target
= control target key end

     0   :  { %s1382_s12 = smov 0   ;;  %s1384_s13 = smov 0   ;;  %s1487_s0 = inlined_call_operand.vmem [shape: f32[2,6,6,8], index: 0, kind: input, shape index: {}]   ;;  %s1488_s1 = inlined_call_operand.vmem [shape: f32[3,3,8,64], index: 1, kind: input, shape index: {}]   ;;  %s1489_s2 = inlined_call_operand.vmem [shape: f32[1,64], index: 2, kind: input, shape index: {}]   ;;  %s1490_s3 = inlined_call_operand.vmem [shape: f32[2,16,64], index: 3, kind: output, shape index: {}]  }
   0x1   :  { %s1386_s14 = smov 0  }
   0x2 LB: > { %s25_s15 = sadd.s32 1, %s1356_s13  ;;  %p1149_p0 = scmp.ge.s32.totalorder %s1360_s14, 1  ;;  %s1360_s14 = sphi %s1386_s14, %s13_s14   ;;  %s1356_s13 = sphi %s1384_s13, %s1492_s13   ;;  %s1352_s12 = sphi %s1382_s12, %s1491_s12  }
   0x3   : > { %p27_p1 = scmp.ge.s32.totalorder %s25_s15, 2  ;;  %p151_p2 = scmp.lt.s32.totalorder %s1360_s14, 3 }
   0x5   : > { %s1494_s15 = smov (%p27_p1, %s25_s15), 0  ;;  %p152_p3 = pnand %p1149_p0, %p151_p2 }
   0x6   : > { %v1172_v0 = vld [vmem:[%s1488_s1 + $0x20] sm:$0xff] (!%p152_p3)  ;;  %v1153_v1 = vld [vmem:[%s1488_s1 + $0x8] sm:$0xff] (!%p152_p3)  ;;  %p179_p4 = scmp.lt.s32.totalorder (!%p152_p3), %s1352_s12, 1  ;;  %vm214_vm0 = vcmask (!%p152_p3), 64512   ;;  %v1186_v7 = vld [vmem:[%s1488_s1 + $0x30] sm:$0xff] (!%p152_p3)  ;;  %vm1051_vm2 = vcmask (!%p152_p3), 523264  }
   0x7   : > { %155 = sbr.rel (%p152_p3) target bundleno = 274 (0x112), region = 32  ;;  %v1179_v2 = vld [vmem:[%s1488_s1 + $0x28] sm:$0xff] (!%p152_p3)  ;;  %1254 = vmatprep.subr.mxu0 (!%p152_p3), %v1172_v0  ;;  %1234 = vmatprep.subr.mxu1 (!%p152_p3), %v1153_v1  ;;  %v201_v3 = vld [vmem:[%s1488_s1] sm:$0xff] (!%p152_p3)  ;;  %v1158_v9 = vld [vmem:[%s1488_s1 + $0x10] sm:$0xff] (!%p152_p3) }
   0x8   : > { %1255 = vmatpush3.msra.mxu0 (!%p152_p3), %v1172_v0  ;;  %1235 = vmatpush3.msra.mxu1 (!%p152_p3), %v1153_v1  ;;  %v1193_v16 = vld [vmem:[%s1488_s1 + $0x38] sm:$0xff] (!%p152_p3)  ;;  %v1200_v22 = vld [vmem:[%s1488_s1 + $0x40] sm:$0xff] (!%p152_p3) }
   0x9   : > { %1259 = vmatprep.subr.mxu0 (!%p152_p3), %v1179_v2  ;;  %1239 = vmatprep.subr.mxu1 (!%p152_p3), %v201_v3  ;;  %v1165_v17 = vld [vmem:[%s1488_s1 + $0x18] sm:$0xff] (!%p152_p3)  ;;  %v1203_v30 = vld [vmem:[%s1489_s2] ss:$0 sm:$0xff] (!%p152_p3) }
   0xe   : > { %s1496_s12 = smov (!%p179_p4, %s1352_s12), 1 }
   0xf   : > { %s1295_s24 = smul.u32 48, %s1496_s12  ;;  %s1206_s17 = sshll.u32 %s1496_s12, 4 }
  0x10   : > { %s192_s20 = scalar_lea.vmem %s1490_s3, %s1206_s17 }
  0x11   : > { %s1418_s27 = scalar_lea.vmem %s1487_s0, %s1295_s24 }
  0x12   : > { %v1320_v4 = vld [vmem:[%s1418_s27 + $0x1] ss:$8 sps:$4 sm:$0xff]   ;;  %v1322_v6 = vld [vmem:[%s1418_s27 + $0x11] ss:$8 sps:$4 sm:$0xff]  }
  0x13   : > { %v1321_v5 = vld [vmem:[%s1418_s27 + $0x9] ss:$8 sps:$4 sm:$0xff]   ;;  %1236 = vmatprep.mubr.msk.f32.mxu1 %vm214_vm0, %v1320_v4  ;;  %v1323_v8 = vld [vmem:[%s1418_s27 + $0x19] ss:$8 sps:$4 sm:$0xff]  }
  0x14   : > { %1256 = vmatprep.mubr.msk.f32.mxu0 %vm214_vm0, %v1321_v5  ;;  %1237 = vmatmul.mubr.msk.f32.vlgmr.msra.gmra.mrb[0].mxu1 %vm214_vm0, %v1322_v6  ;;  %v1324_v10 = vld [vmem:[%s1418_s27] ss:$8 sps:$4 sm:$0xff]   ;;  %v1326_v12 = vld [vmem:[%s1418_s27 + $0x10] ss:$8 sps:$4 sm:$0xff]  }
  0x15   : > { %1257 = vmatmul.mubr.msk.f32.vlgmr.msra.gmra.mrb[0].mxu0 %vm214_vm0, %v1323_v8  ;;  %1240 = vmatpush3.msra.mxu1 %v201_v3  ;;  %v1325_v11 = vld [vmem:[%s1418_s27 + $0xa] ss:$8 sps:$4 sm:$0xff]   ;;  %v1327_v13 = vld [vmem:[%s1418_s27 + $0x1a] ss:$8 sps:$4 sm:$0xff]  }
  0x16   : > { %1260 = vmatpush3.msra.mxu0 %v1179_v2  ;;  %1241 = vmatprep.mubr.msk.f32.mxu1 %vm214_vm0, %v1324_v10  ;;  %v1328_v14 = vld [vmem:[%s1418_s27 + $0x2] ss:$8 sps:$4 sm:$0xff]   ;;  %v1329_v15 = vld [vmem:[%s1418_s27 + $0x10] ss:$8 sps:$4 sm:$0xff]  }
  0x17   : > { %1261 = vmatprep.mubr.msk.f32.mxu0 %vm214_vm0, %v1325_v11  ;;  %1264 = vmatprep.subr.mxu0 %v1186_v7  ;;  %v1330_v18 = vld [vmem:[%s1418_s27 + $0x12] ss:$8 sps:$4 sm:$0xff]   ;;  %v1331_v19 = vld [vmem:[%s1418_s27 + $0x20] ss:$8 sps:$4 sm:$0xff]  }
  0x18   : > { %1244 = vmatprep.subr.mxu1 %v1158_v9  ;;  %v1332_v20 = vld [vmem:[%s1418_s27 + $0x8] ss:$8 sps:$4 sm:$0xff]   ;;  %v1334_v23 = vld [vmem:[%s1418_s27 + $0x18] ss:$8 sps:$4 sm:$0xff]  }
  0x19   : > { %v1333_v21 = vld [vmem:[%s1418_s27 + $0x11] ss:$8 sps:$4 sm:$0xff]   ;;  %v1335_v24 = vld [vmem:[%s1418_s27 + $0x21] ss:$8 sps:$4 sm:$0xff]  }
  0x1a   : > { %v1336_v25 = vld [vmem:[%s1418_s27 + $0x12] ss:$8 sps:$4 sm:$0xff]   ;;  %v1337_v26 = vld [vmem:[%s1418_s27 + $0x22] ss:$8 sps:$4 sm:$0xff]  }
  0x1c   : > { %1242 = vmatmul.mubr.msk.f32.vlgmr.msra.gmra.mrb[0].mxu1 %vm214_vm0, %v1326_v12 }
  0x1d   : > { %1262 = vmatmul.mubr.msk.f32.vlgmr.msra.gmra.mrb[0].mxu0 %vm214_vm0, %v1327_v13  ;;  %1245 = vmatpush3.msra.mxu1 %v1158_v9 }
  0x1e   : > { %1265 = vmatpush3.msra.mxu0 %v1186_v7  ;;  %1246 = vmatprep.mubr.msk.f32.mxu1 %vm214_vm0, %v1328_v14 }
  0x1f   : > { %1266 = vmatprep.mubr.msk.f32.mxu0 %vm214_vm0, %v1329_v15  ;;  %1269 = vmatprep.subr.mxu0 %v1193_v16 }
  0x20   : > { %1249 = vmatprep.subr.mxu1 %v1165_v17 }
  0x24   : > { %1247 = vmatmul.mubr.msk.f32.vlgmr.msra.gmra.mrb[0].mxu1 %vm214_vm0, %v1330_v18 }
  0x25   : > { %1267 = vmatmul.mubr.msk.f32.vlgmr.msra.gmra.mrb[0].mxu0 %vm214_vm0, %v1331_v19  ;;  %1250 = vmatpush3.msra.mxu1 %v1165_v17 }
  0x26   : > { %1270 = vmatpush3.msra.mxu0 %v1193_v16  ;;  %1251 = vmatprep.mubr.msk.f32.mxu1 %vm214_vm0, %v1332_v20 }
  0x27   : > { %1271 = vmatprep.mubr.msk.f32.mxu0 %vm214_vm0, %v1333_v21  ;;  %1274 = vmatprep.subr.mxu0 %v1200_v22 }
  0x2c   : > { %1252 = vmatmul.mubr.msk.f32.vlgmr.msra.gmra.mrb[0].mxu1 %vm214_vm0, %v1334_v23 }
  0x2d   : > { %1272 = vmatmul.mubr.msk.f32.vlgmr.msra.gmra.mrb[0].mxu0 %vm214_vm0, %v1335_v24 }
  0x2e   : > { %1275 = vmatpush3.msra.mxu0 %v1200_v22  ;;  %1276 = vmatprep.mubr.msk.f32.mxu0 %vm214_vm0, %v1336_v25 }
  0x35   : > { %1277 = vmatmul.mubr.msk.f32.vlgmr.msra.gmra.mrb[0].mxu0 %vm214_vm0, %v1337_v26 }
  0xff   : > { %v1253_v27 = vpop.f32.mrb[0].mxu1 }
 0x100   : > { %v557_v28 = vpop.f32.mrb[1].mxu1 }
 0x108   : > { %v1278_v29 = vpop.f32.mrb[0].mxu0 }
 0x109   : > { %v1279_v31 = vadd.f32 %v1278_v29, %v1253_v27  ;;  %v1025_v32 = vpop.f32.mrb[1].mxu0 }
 0x10a   : > { %v1280_v33 = vadd.f32 %v1025_v32, %v557_v28 }
 0x10b   : > { %v1044_v34 = vadd.f32 %v1279_v31, %v1203_v30 }
 0x10c   : > { %v1043_v35 = vadd.f32 %v1280_v33, %v1203_v30 }
 0x10d   : > { %vm1046_vm1 = vcmp.ge.f32.partialorder %v1044_v34, 0.0  ;;  %v1048_v36 = vmul.f32 0.2, %v1044_v34 }
 0x10e   : > { %vm1045_vm3 = vcmp.ge.f32.partialorder %v1043_v35, 0.0  ;;  %v1047_v37 = vmul.f32 0.2, %v1043_v35 }
 0x10f   : > { %v1050_v38 = vsel %vm1046_vm1, %v1044_v34, %v1048_v36 }
 0x110   : > { %1053 = vst.msk [vmem:[%s192_s20 + $0x8] sm:$0xff] %vm1051_vm2, %v1050_v38  ;;  %v1049_v39 = vsel %vm1045_vm3, %v1043_v35, %v1047_v37 }
 0x111   : > { %1052 = vst.msk [vmem:[%s192_s20] sm:$0xff] %vm1051_vm2, %v1049_v39 }
 0x112 PF: > { %s13_s14 = sadd.s32 1, %s1360_s14   ;;  %s1491_s12 = smov %s1356_s13 }
 0x113   : > { %p10_p5 = scmp.ge.s32.totalorder %s13_s14, 4   ;;  %s1492_s13 = smov %s1494_s15 }
 0x115   :  { %12 = sbr.rel (!%p10_p5) target bundleno = 2 (0x2), region = 73 }

// kernel: hyper_decoder_forward.4
= control target key start
LH: loop header
LB: loop body
LE: loop exit
PB: predicated region body
PF: predicated region fallthrough
CT: control target
= control target key end

     0   :  { %s2211_s12 = smov 0   ;;  %s2213_s13 = smov 0   ;;  %s2501_s0 = inlined_call_operand.vmem [shape: f32[2,10,10,16], index: 0, kind: input, shape index: {}]   ;;  %s2502_s1 = inlined_call_operand.vmem [shape: f32[3,3,16,64], index: 1, kind: input, shape index: {}]   ;;  %s2503_s2 = inlined_call_operand.vmem [shape: f32[1,64], index: 2, kind: input, shape index: {}]   ;;  %s2504_s3 = inlined_call_operand.vmem [shape: f32[2,64,64], index: 3, kind: output, shape index: {}]  }
   0x1   :  { %s2215_s14 = smov 0  }
   0x2 LB: > { %s25_s15 = sadd.s32 1, %s2185_s13  ;;  %p1662_p0 = scmp.ge.s32.totalorder %s2189_s14, 1  ;;  %s2189_s14 = sphi %s2215_s14, %s13_s14   ;;  %s2185_s13 = sphi %s2213_s13, %s2506_s13   ;;  %s2181_s12 = sphi %s2211_s12, %s2505_s12  }
   0x3   : > { %p27_p1 = scmp.ge.s32.totalorder %s25_s15, 2  ;;  %p151_p2 = scmp.lt.s32.totalorder %s2189_s14, 3 }
   0x5   : > { %s2508_s15 = smov (%p27_p1, %s25_s15), 0  ;;  %p152_p3 = pnand %p1662_p0, %p151_p2 }
   0x6   : > { %v1666_v0 = vld [vmem:[%s2502_s1 + $0x10] sm:$0xff] (!%p152_p3)  ;;  %v1667_v1 = vld [vmem:[%s2502_s1 + $0x18] sm:$0xff] (!%p152_p3)  ;;  %v1720_v2 = vld [vmem:[%s2502_s1 + $0x40] sm:$0xff] (!%p152_p3)  ;;  %p179_p4 = scmp.lt.s32.totalorder (!%p152_p3), %s2181_s12, 1  ;;  %vm218_vm0 = vcmask (!%p152_p3), 130048   ;;  %vm1558_vm2 = vcmask (!%p152_p3), 523264  }
   0x7   : > { %155 = sbr.rel (%p152_p3) target bundleno = 309 (0x135), region = 32  ;;  %v2040_v3 = vpack.c.bf16 (!%p152_p3), %v1667_v1, %v1666_v0  ;;  %v1721_v4 = vld [vmem:[%s2502_s1 + $0x48] sm:$0xff] (!%p152_p3)  ;;  %v205_v5 = vld [vmem:[%s2502_s1] sm:$0xff] (!%p152_p3)  ;;  %v1738_v9 = vld [vmem:[%s2502_s1 + $0x50] sm:$0xff] (!%p152_p3) }
   0x8   : > { %v206_v6 = vld [vmem:[%s2502_s1 + $0x8] sm:$0xff] (!%p152_p3)  ;;  %v2247_v7 = vpack.c.bf16 (!%p152_p3), %v1721_v4, %v1720_v2  ;;  %v1739_v10 = vld [vmem:[%s2502_s1 + $0x58] sm:$0xff] (!%p152_p3)  ;;  %v1756_v12 = vld [vmem:[%s2502_s1 + $0x60] sm:$0xff] (!%p152_p3) }
   0x9   : > { %v2044_v8 = vpack.c.bf16 (!%p152_p3), %v206_v6, %v205_v5  ;;  %2041 = vmatprep.subr.bf16.mxu1 (!%p152_p3), %v2040_v3  ;;  %v2060_v11 = vpack.c.bf16 (!%p152_p3), %v1739_v10, %v1738_v9  ;;  %v1757_v13 = vld [vmem:[%s2502_s1 + $0x68] sm:$0xff] (!%p152_p3)  ;;  %v1684_v14 = vld [vmem:[%s2502_s1 + $0x20] sm:$0xff] (!%p152_p3)  ;;  %v1774_v24 = vld [vmem:[%s2502_s1 + $0x70] sm:$0xff] (!%p152_p3) }
   0xa   : > { %2057 = vmatprep.subr.bf16.mxu0 (!%p152_p3), %v2247_v7  ;;  %2043 = vmatpush3.bf16.msra.mxu1 (!%p152_p3), %v2040_v3  ;;  %v1685_v15 = vld [vmem:[%s2502_s1 + $0x28] sm:$0xff] (!%p152_p3)  ;;  %v2064_v20 = vpack.c.bf16 (!%p152_p3), %v1757_v13, %v1756_v12  ;;  %v1775_v25 = vld [vmem:[%s2502_s1 + $0x78] sm:$0xff] (!%p152_p3)  ;;  %v1702_v35 = vld [vmem:[%s2502_s1 + $0x30] sm:$0xff] (!%p152_p3) }
   0xb   : > { %2059 = vmatpush3.bf16.msra.mxu0 (!%p152_p3), %v2247_v7  ;;  %2045 = vmatprep.subr.bf16.mxu1 (!%p152_p3), %v2044_v8  ;;  %v2048_v21 = vpack.c.bf16 (!%p152_p3), %v1685_v15, %v1684_v14  ;;  %v2068_v29 = vpack.c.bf16 (!%p152_p3), %v1775_v25, %v1774_v24  ;;  %v1703_v36 = vld [vmem:[%s2502_s1 + $0x38] sm:$0xff] (!%p152_p3)  ;;  %v1792_v45 = vld [vmem:[%s2502_s1 + $0x80] sm:$0xff] (!%p152_p3)  ;;  %v1793_v46 = vld [vmem:[%s2502_s1 + $0x88] sm:$0xff] (!%p152_p3) }
   0xc   : > { %2061 = vmatprep.subr.bf16.mxu0 (!%p152_p3), %v2060_v11  ;;  %v2052_v40 = vpack.c.bf16 (!%p152_p3), %v1703_v36, %v1702_v35  ;;  %v2072_v49 = vpack.c.bf16 (!%p152_p3), %v1793_v46, %v1792_v45  ;;  %v1802_v62 = vld [vmem:[%s2503_s2] ss:$0 sm:$0xff] (!%p152_p3) }
   0xe   : > { %s2510_s12 = smov (!%p179_p4, %s2181_s12), 1 }
   0xf   : > { %s2142_s5 = smul.u32 160, %s2510_s12  ;;  %s1805_s8 = sshll.u32 %s2510_s12, 6 }
  0x10   : > { %s2474_s11 = scalar_lea.vmem %s2504_s3, %s1805_s8 }
  0x11   : > { %s2275_s20 = scalar_lea.vmem %s2501_s0, %s2142_s5 }
  0x12   : > { %v207_v16 = vld [vmem:[%s2275_s20 + $0x1] sm:$0xff]  ;;  %v1712_v17 = vld [vmem:[%s2275_s20 + $0x11] sm:$0xff] }
  0x13   : > { %v2280_v18 = vld [vmem:[%s2275_s20 + $0x21] sm:$0xff]  ;;  %1900 = vmatprep.mubr.msk.f32.mxu1 %vm218_vm0, %v207_v16  ;;  %1964 = vmatprep.mubr.msk.f32.mxu0 %vm218_vm0, %v1712_v17  ;;  %v2285_v19 = vld [vmem:[%s2275_s20 + $0x31] sm:$0xff] }
  0x14   : > { %1901 = vmatmul.mubr.msk.f32.vlgmr.msra.gmra.mrb[0].mxu1 %vm218_vm0, %v1712_v17  ;;  %1965 = vmatmul.mubr.msk.f32.vlgmr.msra.gmra.mrb[0].mxu0 %vm218_vm0, %v2280_v18  ;;  %v2291_v22 = vld [vmem:[%s2275_s20 + $0x41] sm:$0xff]  ;;  %v2298_v23 = vld [vmem:[%s2275_s20 + $0x12] sm:$0xff] }
  0x15   : > { %2047 = vmatpush3.bf16.msra.mxu1 %v2044_v8  ;;  %2063 = vmatpush3.bf16.msra.mxu0 %v2060_v11  ;;  %v2315_v26 = vld [vmem:[%s2275_s20 + $0x51] sm:$0xff]  ;;  %v2318_v27 = vld [vmem:[%s2275_s20 + $0x22] sm:$0xff] }
  0x16   : > { %1903 = vmatprep.mubr.msk.f32.mxu1 %vm218_vm0, %v2280_v18  ;;  %1967 = vmatprep.mubr.msk.f32.mxu0 %vm218_vm0, %v2285_v19  ;;  %v2321_v28 = vld [vmem:[%s2275_s20 + $0x61] sm:$0xff]  ;;  %v2324_v30 = vld [vmem:[%s2275_s20 + $0x32] sm:$0xff] }
  0x17   : > { %2065 = vmatprep.subr.bf16.mxu0 %v2064_v20  ;;  %2049 = vmatprep.subr.bf16.mxu1 %v2048_v21  ;;  %v2333_v31 = vld [vmem:[%s2275_s20 + $0x71] sm:$0xff]  ;;  %v2336_v32 = vld [vmem:[%s2275_s20 + $0x42] sm:$0xff] }
  0x18   : > { %1904 = vmatmul.mubr.msk.f32.gmra.mrb[2].mxu1 %vm218_vm0, %v2285_v19  ;;  %1968 = vmatmul.mubr.msk.f32.gmra.mrb[2].mxu0 %vm218_vm0, %v2291_v22  ;;  %v197_v33 = vld [vmem:[%s2275_s20] sm:$0xff]  ;;  %v2342_v34 = vld [vmem:[%s2275_s20 + $0x52] sm:$0xff] }
  0x19   : > { %1906 = vmatprep.mubr.msk.f32.mxu1 %vm218_vm0, %v2291_v22  ;;  %1980 = vmatprep.mubr.msk.f32.mxu0 %vm218_vm0, %v2298_v23  ;;  %v198_v37 = vld [vmem:[%s2275_s20 + $0x10] sm:$0xff]  ;;  %v2359_v38 = vld [vmem:[%s2275_s20 + $0x62] sm:$0xff] }
  0x1a   : > { %v199_v39 = vld [vmem:[%s2275_s20 + $0x20] sm:$0xff]  ;;  %v2363_v41 = vld [vmem:[%s2275_s20 + $0x72] sm:$0xff] }
  0x1b   : > { %v200_v42 = vld [vmem:[%s2275_s20 + $0x30] sm:$0xff]  ;;  %v2371_v43 = vld [vmem:[%s2275_s20 + $0x82] sm:$0xff] }
  0x1c   : > { %1907 = vmatmul.mubr.msk.f32.gmra.mrb[4].mxu1 %vm218_vm0, %v2315_v26  ;;  %1981 = vmatmul.mubr.msk.f32.vlgmr.msra.gmra.mrb[0].mxu0 %vm218_vm0, %v2318_v27  ;;  %v201_v44 = vld [vmem:[%s2275_s20 + $0x40] sm:$0xff]  ;;  %v202_v47 = vld [vmem:[%s2275_s20 + $0x50] sm:$0xff] }
  0x1d   : > { %2067 = vmatpush3.bf16.msra.mxu0 %v2064_v20  ;;  %1909 = vmatprep.mubr.msk.f32.mxu1 %vm218_vm0, %v2321_v28  ;;  %v203_v48 = vld [vmem:[%s2275_s20 + $0x60] sm:$0xff]  ;;  %v204_v50 = vld [vmem:[%s2275_s20 + $0x70] sm:$0xff] }
  0x1e   : > { %1983 = vmatprep.mubr.msk.f32.mxu0 %vm218_vm0, %v2324_v30  ;;  %2069 = vmatprep.subr.bf16.mxu0 %v2068_v29  ;;  %v477_v51 = vld [vmem:[%s2275_s20 + $0x2] sm:$0xff]  ;;  %v1755_v53 = vld [vmem:[%s2275_s20 + $0x90] sm:$0xff] }
  0x1f   : > { %v1754_v52 = vld [vmem:[%s2275_s20 + $0x80] sm:$0xff]  ;;  %v1773_v55 = vld [vmem:[%s2275_s20 + $0x91] sm:$0xff] }
  0x20   : > { %1910 = vmatmul.mubr.msk.f32.gmra.mrb[6].mxu1 %vm218_vm0, %v2333_v31  ;;  %1984 = vmatmul.mubr.msk.f32.gmra.mrb[2].mxu0 %vm218_vm0, %v2336_v32  ;;  %v1772_v54 = vld [vmem:[%s2275_s20 + $0x81] sm:$0xff]  ;;  %v1791_v56 = vld [vmem:[%s2275_s20 + $0x92] sm:$0xff] }
  0x21   : > { %1916 = vmatprep.mubr.msk.f32.mxu1 %vm218_vm0, %v197_v33  ;;  %1986 = vmatprep.mubr.msk.f32.mxu0 %vm218_vm0, %v2342_v34 }
  0x24   : > { %1917 = vmatmul.mubr.msk.f32.vlgmr.msra.gmra.mrb[0].mxu1 %vm218_vm0, %v198_v37  ;;  %1987 = vmatmul.mubr.msk.f32.gmra.mrb[4].mxu0 %vm218_vm0, %v2359_v38 }
  0x25   : > { %2051 = vmatpush3.bf16.msra.mxu1 %v2048_v21  ;;  %1919 = vmatprep.mubr.msk.f32.mxu1 %vm218_vm0, %v199_v39 }
  0x26   : > { %1989 = vmatprep.mubr.msk.f32.mxu0 %vm218_vm0, %v2363_v41  ;;  %2053 = vmatprep.subr.bf16.mxu1 %v2052_v40 }
  0x28   : > { %1920 = vmatmul.mubr.msk.f32.gmra.mrb[2].mxu1 %vm218_vm0, %v200_v42  ;;  %1990 = vmatmul.mubr.msk.f32.gmra.mrb[6].mxu0 %vm218_vm0, %v2371_v43 }
  0x29   : > { %1922 = vmatprep.mubr.msk.f32.mxu1 %vm218_vm0, %v201_v44  ;;  %1996 = vmatprep.mubr.msk.f32.mxu0 %vm218_vm0, %v199_v39 }
  0x2c   : > { %1923 = vmatmul.mubr.msk.f32.gmra.mrb[4].mxu1 %vm218_vm0, %v202_v47  ;;  %1997 = vmatmul.mubr.msk.f32.vlgmr.msra.gmra.mrb[0].mxu0 %vm218_vm0, %v200_v42 }
  0x2d   : > { %2071 = vmatpush3.bf16.msra.mxu0 %v2068_v29  ;;  %1925 = vmatprep.mubr.msk.f32.mxu1 %vm218_vm0, %v203_v48 }
  0x2e   : > { %1999 = vmatprep.mubr.msk.f32.mxu0 %vm218_vm0, %v201_v44  ;;  %2073 = vmatprep.subr.bf16.mxu0 %v2072_v49 }
  0x30   : > { %1926 = vmatmul.mubr.msk.f32.gmra.mrb[6].mxu1 %vm218_vm0, %v204_v50  ;;  %2000 = vmatmul.mubr.msk.f32.gmra.mrb[2].mxu0 %vm218_vm0, %v202_v47 }
  0x31   : > { %1932 = vmatprep.mubr.msk.f32.mxu1 %vm218_vm0, %v477_v51  ;;  %2002 = vmatprep.mubr.msk.f32.mxu0 %vm218_vm0, %v203_v48 }
  0x34   : > { %1933 = vmatmul.mubr.msk.f32.vlgmr.msra.gmra.mrb[0].mxu1 %vm218_vm0, %v2298_v23  ;;  %2003 = vmatmul.mubr.msk.f32.gmra.mrb[4].mxu0 %vm218_vm0, %v204_v50 }
  0x35   : > { %2055 = vmatpush3.bf16.msra.mxu1 %v2052_v40  ;;  %1935 = vmatprep.mubr.msk.f32.mxu1 %vm218_vm0, %v2318_v27 }
  0x36   : > { %2005 = vmatprep.mubr.msk.f32.mxu0 %vm218_vm0, %v1754_v52  ;;  %2076 = vmatprep.subr.bf16.mxu1 %v2247_v7 }
  0x38   : > { %1936 = vmatmul.mubr.msk.f32.gmra.mrb[2].mxu1 %vm218_vm0, %v2324_v30  ;;  %2006 = vmatmul.mubr.msk.f32.gmra.mrb[6].mxu0 %vm218_vm0, %v1755_v53 }
  0x39   : > { %1938 = vmatprep.mubr.msk.f32.mxu1 %vm218_vm0, %v2336_v32  ;;  %2012 = vmatprep.mubr.msk.f32.mxu0 %vm218_vm0, %v2280_v18 }
  0x3c   : > { %1939 = vmatmul.mubr.msk.f32.gmra.mrb[4].mxu1 %vm218_vm0, %v2342_v34  ;;  %2013 = vmatmul.mubr.msk.f32.vlgmr.msra.gmra.mrb[0].mxu0 %vm218_vm0, %v2285_v19 }
  0x3d   : > { %2075 = vmatpush3.bf16.msra.mxu0 %v2072_v49  ;;  %1941 = vmatprep.mubr.msk.f32.mxu1 %vm218_vm0, %v2359_v38 }
  0x3e   : > { %2015 = vmatprep.mubr.msk.f32.mxu0 %vm218_vm0, %v2291_v22 }
  0x40   : > { %1942 = vmatmul.mubr.msk.f32.gmra.mrb[6].mxu1 %vm218_vm0, %v2363_v41  ;;  %2016 = vmatmul.mubr.msk.f32.gmra.mrb[2].mxu0 %vm218_vm0, %v2315_v26 }
  0x41   : > { %1948 = vmatprep.mubr.msk.f32.mxu1 %vm218_vm0, %v198_v37  ;;  %2018 = vmatprep.mubr.msk.f32.mxu0 %vm218_vm0, %v2321_v28 }
  0x44   : > { %1949 = vmatmul.mubr.msk.f32.vlgmr.msra.gmra.mrb[0].mxu1 %vm218_vm0, %v199_v39  ;;  %2019 = vmatmul.mubr.msk.f32.gmra.mrb[4].mxu0 %vm218_vm0, %v2333_v31 }
  0x45   : > { %2077 = vmatpush3.bf16.msra.mxu1 %v2247_v7  ;;  %1951 = vmatprep.mubr.msk.f32.mxu1 %vm218_vm0, %v200_v42 }
  0x46   : > { %2021 = vmatprep.mubr.msk.f32.mxu0 %vm218_vm0, %v1772_v54 }
  0x48   : > { %1952 = vmatmul.mubr.msk.f32.gmra.mrb[2].mxu1 %vm218_vm0, %v201_v44  ;;  %2022 = vmatmul.mubr.msk.f32.gmra.mrb[6].mxu0 %vm218_vm0, %v1773_v55 }
  0x49   : > { %1954 = vmatprep.mubr.msk.f32.mxu1 %vm218_vm0, %v202_v47  ;;  %2028 = vmatprep.mubr.msk.f32.mxu0 %vm218_vm0, %v2318_v27 }
  0x4c   : > { %1955 = vmatmul.mubr.msk.f32.gmra.mrb[4].mxu1 %vm218_vm0, %v203_v48  ;;  %2029 = vmatmul.mubr.msk.f32.vlgmr.msra.gmra.mrb[0].mxu0 %vm218_vm0, %v2324_v30 }
  0x4d   : > { %1957 = vmatprep.mubr.msk.f32.mxu1 %vm218_vm0, %v204_v50  ;;  %2031 = vmatprep.mubr.msk.f32.mxu0 %vm218_vm0, %v2336_v32 }
  0x50   : > { %1958 = vmatmul.mubr.msk.f32.gmra.mrb[6].mxu1 %vm218_vm0, %v1754_v52  ;;  %2032 = vmatmul.mubr.msk.f32.gmra.mrb[2].mxu0 %vm218_vm0, %v2342_v34 }
  0x51   : > { %1970 = vmatprep.mubr.msk.f32.mxu1 %vm218_vm0, %v2315_v26  ;;  %2034 = vmatprep.mubr.msk.f32.mxu0 %vm218_vm0, %v2359_v38 }
  0x54   : > { %1971 = vmatmul.mubr.msk.f32.vlgmr.msra.gmra.mrb[4].mxu1 %vm218_vm0, %v2321_v28  ;;  %2035 = vmatmul.mubr.msk.f32.gmra.mrb[4].mxu0 %vm218_vm0, %v2363_v41 }
  0x55   : > { %1973 = vmatprep.mubr.msk.f32.mxu1 %vm218_vm0, %v2333_v31  ;;  %2037 = vmatprep.mubr.msk.f32.mxu0 %vm218_vm0, %v2371_v43 }
  0x58   : > { %1974 = vmatmul.mubr.msk.f32.gmra.mrb[6].mxu1 %vm218_vm0, %v1772_v54  ;;  %2038 = vmatmul.mubr.msk.f32.gmra.mrb[6].mxu0 %vm218_vm0, %v1791_v56 }
 0x117   : > { %v1950_v57 = vpop.f32.mrb[0].mxu1 }
 0x118   : > { %v729_v58 = vpop.f32.mrb[1].mxu1 }
 0x11b   : > { %v1953_v59 = vpop.f32.mrb[2].mxu1 }
 0x11c   : > { %v739_v60 = vpop.f32.mrb[3].mxu1 }
 0x11f   : > { %v2030_v61 = vpop.f32.mrb[0].mxu0 }
 0x120   : > { %v2078_v63 = vadd.f32 %v2030_v61, %v1950_v57  ;;  %v1472_v0 = vpop.f32.mrb[1].mxu0 }
 0x121   : > { %v2079_v1 = vadd.f32 %v1472_v0, %v729_v58 }
 0x122   : > { %v1527_v2 = vadd.f32 %v2078_v63, %v1802_v62 }
 0x123   : > { %v1526_v3 = vadd.f32 %v2079_v1, %v1802_v62  ;;  %v2033_v4 = vpop.f32.mrb[2].mxu0 }
 0x124   : > { %vm1535_vm1 = vcmp.ge.f32.partialorder %v1527_v2, 0.0  ;;  %v1543_v5 = vmul.f32 0.2, %v1527_v2  ;;  %v2080_v6 = vadd.f32 %v2033_v4, %v1953_v59  ;;  %v1482_v7 = vpop.f32.mrb[3].mxu0 }
 0x125   : > { %vm1534_vm3 = vcmp.ge.f32.partialorder %v1526_v3, 0.0  ;;  %v1542_v8 = vmul.f32 0.2, %v1526_v3  ;;  %v2081_v9 = vadd.f32 %v1482_v7, %v739_v60 }
 0x126   : > { %v1551_v10 = vsel %vm1535_vm1, %v1527_v2, %v1543_v5  ;;  %v1529_v11 = vadd.f32 %v2080_v6, %v1802_v62 }
 0x127   : > { %1560 = vst.msk [vmem:[%s2474_s11 + $0x8] sm:$0xff] %vm1558_vm2, %v1551_v10  ;;  %v1550_v12 = vsel %vm1534_vm3, %v1526_v3, %v1542_v8  ;;  %v1528_v13 = vadd.f32 %v2081_v9, %v1802_v62  ;;  %v1972_v14 = vpop.f32.mrb[4].mxu1  ;;  %v2036_v15 = vpop.f32.mrb[4].mxu0 }
 0x128   : > { %1559 = vst.msk [vmem:[%s2474_s11] sm:$0xff] %vm1558_vm2, %v1550_v12  ;;  %vm1537_vm4 = vcmp.ge.f32.partialorder %v1529_v11, 0.0  ;;  %v1545_v16 = vmul.f32 0.2, %v1529_v11  ;;  %v2082_v17 = vadd.f32 %v2036_v15, %v1972_v14  ;;  %v897_v18 = vpop.f32.mrb[5].mxu1  ;;  %v1492_v19 = vpop.f32.mrb[5].mxu0 }
 0x129   : > { %vm1536_vm5 = vcmp.ge.f32.partialorder %v1528_v13, 0.0  ;;  %v1544_v20 = vmul.f32 0.2, %v1528_v13  ;;  %v2083_v21 = vadd.f32 %v1492_v19, %v897_v18 }
 0x12a   : > { %v1553_v22 = vsel %vm1537_vm4, %v1529_v11, %v1545_v16  ;;  %v1531_v23 = vadd.f32 %v2082_v17, %v1802_v62 }
 0x12b   : > { %1562 = vst.msk [vmem:[%s2474_s11 + $0x18] sm:$0xff] %vm1558_vm2, %v1553_v22  ;;  %v1552_v24 = vsel %vm1536_vm5, %v1528_v13, %v1544_v20  ;;  %v1530_v25 = vadd.f32 %v2083_v21, %v1802_v62  ;;  %v1975_v26 = vpop.f32.mrb[6].mxu1  ;;  %v2039_v27 = vpop.f32.mrb[6].mxu0 }
 0x12c   : > { %1561 = vst.msk [vmem:[%s2474_s11 + $0x10] sm:$0xff] %vm1558_vm2, %v1552_v24  ;;  %vm1539_vm6 = vcmp.ge.f32.partialorder %v1531_v23, 0.0  ;;  %v1547_v28 = vmul.f32 0.2, %v1531_v23  ;;  %v2084_v29 = vadd.f32 %v2039_v27, %v1975_v26  ;;  %v907_v30 = vpop.f32.mrb[7].mxu1  ;;  %v1502_v31 = vpop.f32.mrb[7].mxu0 }
 0x12d   : > { %vm1538_vm7 = vcmp.ge.f32.partialorder %v1530_v25, 0.0  ;;  %v1546_v32 = vmul.f32 0.2, %v1530_v25  ;;  %v2085_v33 = vadd.f32 %v1502_v31, %v907_v30 }
 0x12e   : > { %v1555_v34 = vsel %vm1539_vm6, %v1531_v23, %v1547_v28  ;;  %v1533_v35 = vadd.f32 %v2084_v29, %v1802_v62 }
 0x12f   : > { %1564 = vst.msk [vmem:[%s2474_s11 + $0x28] sm:$0xff] %vm1558_vm2, %v1555_v34  ;;  %v1554_v36 = vsel %vm1538_vm7, %v1530_v25, %v1546_v32  ;;  %v1532_v37 = vadd.f32 %v2085_v33, %v1802_v62 }
 0x130   : > { %1563 = vst.msk [vmem:[%s2474_s11 + $0x20] sm:$0xff] %vm1558_vm2, %v1554_v36  ;;  %vm1541_vm8 = vcmp.ge.f32.partialorder %v1533_v35, 0.0  ;;  %v1549_v38 = vmul.f32 0.2, %v1533_v35 }
 0x131   : > { %vm1540_vm9 = vcmp.ge.f32.partialorder %v1532_v37, 0.0  ;;  %v1548_v39 = vmul.f32 0.2, %v1532_v37 }
 0x132   : > { %v1557_v40 = vsel %vm1541_vm8, %v1533_v35, %v1549_v38 }
 0x133   : > { %1566 = vst.msk [vmem:[%s2474_s11 + $0x38] sm:$0xff] %vm1558_vm2, %v1557_v40  ;;  %v1556_v41 = vsel %vm1540_vm9, %v1532_v37, %v1548_v39 }
 0x134   : > { %1565 = vst.msk [vmem:[%s2474_s11 + $0x30] sm:$0xff] %vm1558_vm2, %v1556_v41 }
 0x135 PF: > { %s13_s14 = sadd.s32 1, %s2189_s14   ;;  %s2505_s12 = smov %s2185_s13 }
 0x136   : > { %p10_p5 = scmp.ge.s32.totalorder %s13_s14, 4   ;;  %s2506_s13 = smov %s2508_s15 }
 0x138   :  { %12 = sbr.rel (!%p10_p5) target bundleno = 2 (0x2), region = 73 }

// kernel: hyper_decoder_forward.5
= control target key start
LH: loop header
LB: loop body
LE: loop exit
PB: predicated region body
PF: predicated region fallthrough
CT: control target
= control target key end

     0   :  { %10 = vsyncpa [#allocation3], 0  ;;  %s7447_s0 = inlined_call_operand.vmem [shape: f32[2,18,18,16], index: 0, kind: input, shape index: {}]   ;;  %s7448_s1 = inlined_call_operand.vmem [shape: f32[3,3,16,16], index: 1, kind: input, shape index: {}]   ;;  %s7449_s2 = inlined_call_operand.vmem [shape: f32[1,16], index: 2, kind: input, shape index: {}]   ;;  %s7450_s3 = inlined_call_operand.vmem [shape: f32[16,32], index: 3, kind: input, shape index: {}]   ;;  %s7451_s4 = inlined_call_operand.vmem [shape: f32[1,32], index: 4, kind: input, shape index: {}]   ;;  %s7452_s5 = inlined_call_operand.hbm [shape: f32[2,256,32], index: 5, kind: output, shape index: {}]  }
   0x1   :  { %12 = vsyncpa [#allocation3 + $0x1], 0  ;;  %s6142_s18 = smov 0   ;;  %s6144_s19 = smov 0  }
   0x2   :  { %s6146_s20 = smov 0   ;;  %s6148_s21 = smov 0  }
   0x3   :  { %s6150_s22 = smov 0   ;;  %s6152_s23 = smov 0  }
   0x4 LB: > { %s4272_s24 = sadd.s32 4294967295, %s6107_s23   ;;  %s4273_s25 = sadd.s32 4294967294, %s6107_s23   ;;  %s6107_s23 = sphi %s6152_s23, %s18_s23   ;;  %s6103_s22 = sphi %s6150_s22, %s7572_s22   ;;  %s6099_s21 = sphi %s6148_s21, %s7571_s21   ;;  %s6095_s20 = sphi %s6146_s20, %s7570_s20   ;;  %s6091_s19 = sphi %s6144_s19, %s7569_s19   ;;  %s6087_s18 = sphi %s6142_s18, %s7568_s18  }
   0x5   : > { %s30_s26 = sadd.s32 1, %s6103_s22  ;;  %s149_s27 = sadd.s32 1, %s6095_s20 }
   0x6   : > { %p32_p0 = scmp.ge.s32.totalorder %s30_s26, 2  ;;  %p159_p1 = scmp.ne.s32.totalorder %s6095_s20, %s6091_s19 }
   0x7   : > { %p160_p2 = scmp.eq.s32.totalorder %s4272_s24, 1  ;;  %p165_p3 = scmp.ne.s32.totalorder %s6091_s19, %s6087_s18 }
   0x8   : > { %s7574_s26 = smov (%p32_p0, %s30_s26), 0  ;;  %p166_p5 = scmp.eq.s32.totalorder %s4273_s25, 1 }
   0x9   : > { %p6182_p4 = por %p160_p2, %p159_p1  ;;  %s144_s29 = ssub.s32 %s6103_s22, %s7574_s26 }
   0xa   : > { %p4276_p6 = scmp.ge.s32.totalorder %s6107_s23, 1  ;;  %p147_p7 = scmp.eq.s32.totalorder %s144_s29, 0 }
   0xb   : > { %p6189_p8 = por %p166_p5, %p165_p3  ;;  %p204_p9 = scmp.lt.s32.totalorder %s6107_s23, 3 }
   0xc   : > { %s6195_s6 = scalar_select %p147_p7, %s6095_s20, %s149_s27  }
   0xd   : > { %p205_p10 = pnand %p4276_p6, %p204_p9 }
   0xf   : > { %208 = sbr.rel (%p205_p10) target bundleno = 798 (0x31e), region = 40 }
  0x16   : > { %v4477_v0 = vld [vmem:[%s7448_s1 + $0x40] sm:$0xff]  ;;  %v4478_v1 = vld [vmem:[%s7448_s1 + $0x48] sm:$0xff]  ;;  %v4279_v2 = vld [vmem:[%s7448_s1 + $0x10] sm:$0xff]  ;;  %p232_p11 = scmp.lt.s32.totalorder %s6099_s21, 1  ;;  %vm310_vm0 = vcmask 130048   ;;  %s4814_s14 = sshll.u32 %s6099_s21, 12 }
  0x17   : > { %v5691_v3 = vpack.c.bf16 %v4478_v1, %v4477_v0  ;;  %v4280_v4 = vld [vmem:[%s7448_s1 + $0x18] sm:$0xff]  ;;  %v4543_v5 = vld [vmem:[%s7448_s1 + $0x50] sm:$0xff]  ;;  %v273_v9 = vld [vmem:[%s7448_s1] sm:$0xff]  ;;  %s7390_s24 = scalar_lea.hbm %s7452_s5, %s4814_s14  ;;  %s6109_s29 = smov [#allocation2]  }
  0x18   : > { %v4544_v6 = vld [vmem:[%s7448_s1 + $0x58] sm:$0xff]  ;;  %v5675_v7 = vpack.c.bf16 %v4280_v4, %v4279_v2  ;;  %s233_s25 = scalar_select %p232_p11, %s6099_s21, 1  ;;  %v274_v10 = vld [vmem:[%s7448_s1 + $0x8] sm:$0xff]  ;;  %v4609_v12 = vld [vmem:[%s7448_s1 + $0x60] sm:$0xff] }
  0x19   : > { %v5695_v8 = vpack.c.bf16 %v4544_v6, %v4543_v5  ;;  %5692 = vmatprep.subr.bf16.mxu0 %v5691_v3  ;;  %v5679_v11 = vpack.c.bf16 %v274_v10, %v273_v9  ;;  %v4610_v13 = vld [vmem:[%s7448_s1 + $0x68] sm:$0xff]  ;;  %v4345_v14 = vld [vmem:[%s7448_s1 + $0x20] sm:$0xff]  ;;  %v4675_v54 = vld [vmem:[%s7448_s1 + $0x70] sm:$0xff]  ;;  %s6033_s7 = sshll.u32 %s6109_s29, 4  ;;  %s6034_s7 = int_to_ptr.vmem [resolvable:$false] %s6033_s7 }
  0x1a   : > { %5676 = vmatprep.subr.bf16.mxu1 %v5675_v7  ;;  %5694 = vmatpush3.bf16.msra.mxu0 %v5691_v3  ;;  %s5971_s9 = smul.u32 432, %s233_s25  ;;  %v4346_v15 = vld [vmem:[%s7448_s1 + $0x28] sm:$0xff]  ;;  %v6249_v21 = vpack.c.bf16 %v4610_v13, %v4609_v12  ;;  %v4676_v55 = vld [vmem:[%s7448_s1 + $0x78] sm:$0xff]  ;;  %v4411_v56 = vld [vmem:[%s7448_s1 + $0x30] sm:$0xff] }
  0x1b   : > { %5678 = vmatpush3.bf16.msra.mxu1 %v5675_v7  ;;  %5696 = vmatprep.subr.bf16.mxu0 %v5695_v8  ;;  %v6251_v22 = vpack.c.bf16 %v4346_v15, %v4345_v14  ;;  %v4412_v57 = vld [vmem:[%s7448_s1 + $0x38] sm:$0xff]  ;;  %v6491_v62 = vpack.c.bf16 %v4676_v55, %v4675_v54 }
  0x1c   : > { %s6238_s27 = scalar_lea.vmem %s7447_s0, %s5971_s9  ;;  %5680 = vmatprep.subr.bf16.mxu1 %v5679_v11  ;;  %v6493_v63 = vpack.c.bf16 %v4412_v57, %v4411_v56  ;;  %s229_s9 = sand.u32 1, %s6091_s19  }
  0x1d   : > { %v275_v16 = vld [vmem:[%s6238_s27 + $0x1] sm:$0xff]  ;;  %v4445_v17 = vld [vmem:[%s6238_s27 + $0x19] sm:$0xff]  ;;  %v276_v18 = vld [vmem:[%s6238_s27 + $0x9] sm:$0xff]  ;;  %s4277_s10 = sshll.u32 %s229_s9, 8  ;;  %s7401_s21 = scalar_lea.sflag [#allocation3], %s229_s9 }
  0x1e   : > { %5159 = vmatprep.mubr.msk.f32.mxu1 %vm310_vm0, %v275_v16  ;;  %5367 = vmatprep.mubr.msk.f32.mxu0 %vm310_vm0, %v4445_v17  ;;  %v4446_v19 = vld [vmem:[%s6238_s27 + $0x21] sm:$0xff]  ;;  %v6247_v20 = vld [vmem:[%s6238_s27 + $0x31] sm:$0xff]  ;;  %v6257_v23 = vld [vmem:[%s6238_s27 + $0x39] sm:$0xff]  ;;  %s7294_s13 = scalar_lea.vmem [#allocation2], %s4277_s10 }
  0x1f   : > { %7494 = vst [vmem:[#allocation5_spill] sm:$0xff] %v6247_v20  ;;  %5160 = vmatmul.mubr.msk.f32.vlgmr.msra.gmra.mrb[0].mxu1 %vm310_vm0, %v276_v18  ;;  %5368 = vmatmul.mubr.msk.f32.vlgmr.msra.gmra.mrb[0].mxu0 %vm310_vm0, %v4446_v19  ;;  %7495 = vst [vmem:[#allocation6_spill] sm:$0xff] %v6257_v23  ;;  %v6262_v24 = vld [vmem:[%s6238_s27 + $0x49] sm:$0xff]  ;;  %v6274_v25 = vld [vmem:[%s6238_s27 + $0x51] sm:$0xff]  ;;  %s4189_s15 = sshll.u32 %s7294_s13, 4  ;;  %s7392_s15 = int_to_ptr.vmem [resolvable:$true] %s4189_s15 }
  0x20   : > { %5698 = vmatpush3.bf16.msra.mxu0 %v5695_v8  ;;  %5162 = vmatprep.mubr.msk.f32.mxu1 %vm310_vm0, %v4445_v17  ;;  %7496 = vst [vmem:[#allocation7_spill] sm:$0xff] %v6262_v24  ;;  %7497 = vst [vmem:[#allocation8_spill] sm:$0xff] %v6274_v25  ;;  %v6277_v26 = vld [vmem:[%s6238_s27 + $0x61] sm:$0xff]  ;;  %v6288_v27 = vld [vmem:[%s6238_s27 + $0x69] sm:$0xff]  ;;  %s6029_s25 = scalar_lea.vmem %s7392_s15, 4096  ;;  %p6036_p1 = scmp.lt.s32.totalorder %s7392_s15, %s6034_s7 }
  0x21   : > { %5370 = vmatprep.mubr.msk.f32.mxu0 %vm310_vm0, %v6247_v20  ;;  %5682 = vmatpush3.bf16.msra.mxu1 %v5679_v11  ;;  %7498 = vst [vmem:[#allocation9_spill] sm:$0xff] %v6277_v26  ;;  %7499 = vst [vmem:[#allocation10_spill] sm:$0xff] %v6288_v27  ;;  %v6291_v28 = vld [vmem:[%s6238_s27 + $0x79] sm:$0xff]  ;;  %v6302_v29 = vld [vmem:[%s6238_s27 + $0x81] sm:$0xff]  ;;  %p6030_p12 = scmp.ne.s32.totalorder %s7392_s15, %s6029_s25 }
  0x22   : > { %5700 = vmatprep.subr.bf16.mxu0 %v6249_v21  ;;  %5684 = vmatprep.subr.bf16.mxu1 %v6251_v22  ;;  %7500 = vst [vmem:[#allocation11_spill] sm:$0xff] %v6291_v28  ;;  %7501 = vst [vmem:[#allocation12_spill] sm:$0xff] %v6302_v29  ;;  %v6305_v30 = vld [vmem:[%s6238_s27 + $0x91] sm:$0xff]  ;;  %v6316_v31 = vld [vmem:[%s6238_s27 + $0x99] sm:$0xff] }
  0x23   : > { %5163 = vmatmul.mubr.msk.f32.gmra.mrb[2].mxu1 %vm310_vm0, %v4446_v19  ;;  %5371 = vmatmul.mubr.msk.f32.gmra.mrb[2].mxu0 %vm310_vm0, %v6257_v23  ;;  %7502 = vst [vmem:[#allocation13_spill] sm:$0xff] %v6305_v30  ;;  %7503 = vst [vmem:[#allocation14_spill] sm:$0xff] %v6316_v31  ;;  %v6319_v32 = vld [vmem:[%s6238_s27 + $0xa9] sm:$0xff]  ;;  %v6330_v33 = vld [vmem:[%s6238_s27 + $0xb1] sm:$0xff]  ;;  %p6031_p13 = pnand %p6030_p12, %p6182_p4 }
  0x24   : > { %5165 = vmatprep.mubr.msk.f32.mxu1 %vm310_vm0, %v6247_v20  ;;  %5373 = vmatprep.mubr.msk.f32.mxu0 %vm310_vm0, %v6262_v24  ;;  %7504 = vst [vmem:[#allocation15_spill] sm:$0xff] %v6319_v32  ;;  %7505 = vst [vmem:[#allocation16_spill] sm:$0xff] %v6330_v33  ;;  %v6333_v34 = vld [vmem:[%s6238_s27 + $0xc1] sm:$0xff]  ;;  %v6344_v35 = vld [vmem:[%s6238_s27 + $0xc9] sm:$0xff] }
  0x25   : > { %7506 = vst [vmem:[#allocation17_spill] sm:$0xff] %v6333_v34  ;;  %7507 = vst [vmem:[#allocation18_spill] sm:$0xff] %v6344_v35  ;;  %v6347_v36 = vld [vmem:[%s6238_s27 + $0xd9] sm:$0xff]  ;;  %v6358_v37 = vld [vmem:[%s6238_s27 + $0xe1] sm:$0xff]  ;;  %p6032_p0 = pneg %p6031_p13 }
  0x26   : > { %7508 = vst [vmem:[#allocation19_spill] sm:$0xff] %v6347_v36  ;;  %7509 = vst [vmem:[#allocation20_spill] sm:$0xff] %v6358_v37  ;;  %v6361_v38 = vld [vmem:[%s6238_s27 + $0xf1] sm:$0xff]  ;;  %v6372_v39 = vld [vmem:[%s6238_s27 + $0xf9] sm:$0xff] }
  0x27   : > { %5166 = vmatmul.mubr.msk.f32.gmra.mrb[4].mxu1 %vm310_vm0, %v6257_v23  ;;  %5374 = vmatmul.mubr.msk.f32.gmra.mrb[4].mxu0 %vm310_vm0, %v6274_v25  ;;  %7510 = vst [vmem:[#allocation21_spill] sm:$0xff] %v6361_v38  ;;  %7511 = vst [vmem:[#allocation22_spill] sm:$0xff] %v6372_v39  ;;  %v6375_v40 = vld [vmem:[%s6238_s27 + $0x109] sm:$0xff]  ;;  %v6386_v41 = vld [vmem:[%s6238_s27 + $0x111] sm:$0xff] }
  0x28   : > { %5168 = vmatprep.mubr.msk.f32.mxu1 %vm310_vm0, %v6262_v24  ;;  %5376 = vmatprep.mubr.msk.f32.mxu0 %vm310_vm0, %v6277_v26  ;;  %7512 = vst [vmem:[#allocation23_spill] sm:$0xff] %v6375_v40  ;;  %7513 = vst [vmem:[#allocation24_spill] sm:$0xff] %v6386_v41  ;;  %v6389_v42 = vld [vmem:[%s6238_s27 + $0x121] sm:$0xff]  ;;  %v6400_v43 = vld [vmem:[%s6238_s27 + $0x129] sm:$0xff] }
  0x29   : > { %7514 = vst [vmem:[#allocation25_spill] sm:$0xff] %v6389_v42  ;;  %7515 = vst [vmem:[#allocation26_spill] sm:$0xff] %v6400_v43  ;;  %v6403_v44 = vld [vmem:[%s6238_s27 + $0x139] sm:$0xff]  ;;  %v6414_v45 = vld [vmem:[%s6238_s27 + $0x141] sm:$0xff] }
  0x2a   : > { %7516 = vst [vmem:[#allocation27_spill] sm:$0xff] %v6403_v44  ;;  %7517 = vst [vmem:[#allocation28_spill] sm:$0xff] %v6414_v45  ;;  %v6417_v46 = vld [vmem:[%s6238_s27 + $0x151] sm:$0xff]  ;;  %v6428_v47 = vld [vmem:[%s6238_s27 + $0x159] sm:$0xff] }
  0x2b   : > { %5169 = vmatmul.mubr.msk.f32.gmra.mrb[6].mxu1 %vm310_vm0, %v6274_v25  ;;  %5377 = vmatmul.mubr.msk.f32.gmra.mrb[6].mxu0 %vm310_vm0, %v6288_v27  ;;  %7518 = vst [vmem:[#allocation29_spill] sm:$0xff] %v6417_v46  ;;  %7519 = vst [vmem:[#allocation30_spill] sm:$0xff] %v6428_v47  ;;  %v6431_v48 = vld [vmem:[%s6238_s27 + $0x169] sm:$0xff]  ;;  %v6442_v49 = vld [vmem:[%s6238_s27 + $0x171] sm:$0xff] }
  0x2c   : > { %5171 = vmatprep.mubr.msk.f32.mxu1 %vm310_vm0, %v6277_v26  ;;  %5379 = vmatprep.mubr.msk.f32.mxu0 %vm310_vm0, %v6291_v28  ;;  %7520 = vst [vmem:[#allocation31_spill] sm:$0xff] %v6431_v48  ;;  %7521 = vst [vmem:[#allocation32_spill] sm:$0xff] %v6442_v49  ;;  %v6445_v50 = vld [vmem:[%s6238_s27 + $0x181] sm:$0xff]  ;;  %v6456_v51 = vld [vmem:[%s6238_s27 + $0x189] sm:$0xff] }
  0x2d   : > { %7522 = vst [vmem:[#allocation33_spill] sm:$0xff] %v6445_v50  ;;  %7523 = vst [vmem:[#allocation34_spill] sm:$0xff] %v6456_v51  ;;  %v241_v52 = vld [vmem:[%s6238_s27] sm:$0xff]  ;;  %v242_v58 = vld [vmem:[%s6238_s27 + $0x8] sm:$0xff] }
  0x2e   : > { %v6460_v53 = vld [vmem:[%s6238_s27 + $0x1a] sm:$0xff]  ;;  %v6483_v59 = vld [vmem:[%s6238_s27 + $0x22] sm:$0xff]  ;;  %v6489_v61 = vld [vmem:[%s6238_s27 + $0x32] sm:$0xff] }
  0x2f   : > { %5172 = vmatmul.mubr.msk.f32.gmra.mrb[8].mxu1 %vm310_vm0, %v6288_v27  ;;  %5380 = vmatmul.mubr.msk.f32.gmra.mrb[8].mxu0 %vm310_vm0, %v6302_v29  ;;  %v6486_v60 = vld [vmem:[%s6238_s27 + $0x18] sm:$0xff]  ;;  %v6502_v0 = vld [vmem:[%s6238_s27 + $0x20] sm:$0xff]  ;;  %v6510_v2 = vld [vmem:[%s6238_s27 + $0x30] sm:$0xff] }
  0x30   : > { %5174 = vmatprep.mubr.msk.f32.mxu1 %vm310_vm0, %v6291_v28  ;;  %5382 = vmatprep.mubr.msk.f32.mxu0 %vm310_vm0, %v6305_v30  ;;  %7524 = vst [vmem:[#allocation35_spill] sm:$0xff] %v6486_v60  ;;  %7525 = vst [vmem:[#allocation36_spill] sm:$0xff] %v6502_v0  ;;  %v6505_v1 = vld [vmem:[%s6238_s27 + $0x3a] sm:$0xff]  ;;  %v6513_v3 = vld [vmem:[%s6238_s27 + $0x4a] sm:$0xff] }
  0x31   : > { %v6527_v4 = vld [vmem:[%s6238_s27 + $0x38] sm:$0xff]  ;;  %v6533_v6 = vld [vmem:[%s6238_s27 + $0x48] sm:$0xff]  ;;  %v6547_v8 = vld [vmem:[%s6238_s27 + $0x50] sm:$0xff] }
  0x32   : > { %v6530_v5 = vld [vmem:[%s6238_s27 + $0x52] sm:$0xff]  ;;  %v6536_v7 = vld [vmem:[%s6238_s27 + $0x62] sm:$0xff]  ;;  %v6550_v9 = vld [vmem:[%s6238_s27 + $0x6a] sm:$0xff] }
  0x33   : > { %5175 = vmatmul.mubr.msk.f32.gmra.mrb[10].mxu1 %vm310_vm0, %v6302_v29  ;;  %5383 = vmatmul.mubr.msk.f32.gmra.mrb[10].mxu0 %vm310_vm0, %v6316_v31  ;;  %v6553_v10 = vld [vmem:[%s6238_s27 + $0x60] sm:$0xff]  ;;  %v6567_v12 = vld [vmem:[%s6238_s27 + $0x68] sm:$0xff]  ;;  %v6573_v14 = vld [vmem:[%s6238_s27 + $0x78] sm:$0xff] }
  0x34   : > { %5177 = vmatprep.mubr.msk.f32.mxu1 %vm310_vm0, %v6305_v30  ;;  %5385 = vmatprep.mubr.msk.f32.mxu0 %vm310_vm0, %v6319_v32  ;;  %v6556_v11 = vld [vmem:[%s6238_s27 + $0x7a] sm:$0xff]  ;;  %v6570_v13 = vld [vmem:[%s6238_s27 + $0x82] sm:$0xff]  ;;  %v6576_v15 = vld [vmem:[%s6238_s27 + $0x92] sm:$0xff] }
  0x35   : > { %v6587_v16 = vld [vmem:[%s6238_s27 + $0x80] sm:$0xff]  ;;  %v6593_v18 = vld [vmem:[%s6238_s27 + $0x90] sm:$0xff]  ;;  %v6767_v27 = vld [vmem:[%s6238_s27 + $0x158] sm:$0xff] }
  0x36   : > { %v6590_v17 = vld [vmem:[%s6238_s27 + $0x9a] sm:$0xff]  ;;  %v6596_v19 = vld [vmem:[%s6238_s27 + $0xaa] sm:$0xff]  ;;  %v6616_v54 = vld [vmem:[%s6238_s27 + $0xc2] sm:$0xff] }
  0x37   : > { %5178 = vmatmul.mubr.msk.f32.gmra.mrb[12].mxu1 %vm310_vm0, %v6316_v31  ;;  %5386 = vmatmul.mubr.msk.f32.gmra.mrb[12].mxu0 %vm310_vm0, %v6330_v33  ;;  %v6627_v55 = vld [vmem:[%s6238_s27 + $0xb0] sm:$0xff]  ;;  %v6633_v57 = vld [vmem:[%s6238_s27 + $0xc0] sm:$0xff]  ;;  %v6773_v25 = vld [vmem:[%s6238_s27 + $0x168] sm:$0xff] }
  0x38   : > { %5180 = vmatprep.mubr.msk.f32.mxu1 %vm310_vm0, %v6319_v32  ;;  %5388 = vmatprep.mubr.msk.f32.mxu0 %vm310_vm0, %v6333_v34  ;;  %v6630_v56 = vld [vmem:[%s6238_s27 + $0xca] sm:$0xff]  ;;  %v6736_v32 = vld [vmem:[%s6238_s27 + $0x152] sm:$0xff]  ;;  %v6747_v31 = vld [vmem:[%s6238_s27 + $0x140] sm:$0xff] }
  0x39   : > { %v6750_v30 = vld [vmem:[%s6238_s27 + $0x15a] sm:$0xff]  ;;  %v6753_v29 = vld [vmem:[%s6238_s27 + $0x150] sm:$0xff]  ;;  %v6776_v24 = vld [vmem:[%s6238_s27 + $0x182] sm:$0xff] }
  0x3a   : > { %7526 = vst [vmem:[#allocation37_spill] sm:$0xff] %v6750_v30  ;;  %v6756_v28 = vld [vmem:[%s6238_s27 + $0x16a] sm:$0xff]  ;;  %v6770_v26 = vld [vmem:[%s6238_s27 + $0x172] sm:$0xff]  ;;  %7529 = vst [vmem:[#allocation40_spill] sm:$0xff] %v6776_v24 }
  0x3b   : > { %5181 = vmatmul.mubr.msk.f32.gmra.mrb[14].mxu1 %vm310_vm0, %v6330_v33  ;;  %5389 = vmatmul.mubr.msk.f32.gmra.mrb[14].mxu0 %vm310_vm0, %v6344_v35  ;;  %v6733_v33 = vld [vmem:[%s6238_s27 + $0x138] sm:$0xff]  ;;  %7527 = vst [vmem:[#allocation38_spill] sm:$0xff] %v6756_v28  ;;  %7528 = vst [vmem:[#allocation39_spill] sm:$0xff] %v6770_v26  ;;  %v6787_v23 = vld [vmem:[%s6238_s27 + $0x170] sm:$0xff] }
  0x3c   : > { %5183 = vmatprep.mubr.msk.f32.mxu1 %vm310_vm0, %v6333_v34  ;;  %5391 = vmatprep.mubr.msk.f32.mxu0 %vm310_vm0, %v6347_v36  ;;  %v6730_v34 = vld [vmem:[%s6238_s27 + $0x142] sm:$0xff] }
  0x3d   : > { %v953_v20 = vld [vmem:[%s6238_s27 + $0x2] sm:$0xff] }
  0x3f   : > { %5184 = vmatmul.mubr.msk.f32.gmra.mrb[16].mxu1 %vm310_vm0, %v6344_v35  ;;  %5392 = vmatmul.mubr.msk.f32.gmra.mrb[16].mxu0 %vm310_vm0, %v6358_v37  ;;  %v6727_v35 = vld [vmem:[%s6238_s27 + $0x128] sm:$0xff] }
  0x40   : > { %5186 = vmatprep.mubr.msk.f32.mxu1 %vm310_vm0, %v6347_v36  ;;  %5394 = vmatprep.mubr.msk.f32.mxu0 %vm310_vm0, %v6361_v38  ;;  %v6716_v36 = vld [vmem:[%s6238_s27 + $0x13a] sm:$0xff] }
  0x43   : > { %5187 = vmatmul.mubr.msk.f32.gmra.mrb[18].mxu1 %vm310_vm0, %v6358_v37  ;;  %5395 = vmatmul.mubr.msk.f32.gmra.mrb[18].mxu0 %vm310_vm0, %v6372_v39  ;;  %v6713_v37 = vld [vmem:[%s6238_s27 + $0x120] sm:$0xff] }
  0x44   : > { %5189 = vmatprep.mubr.msk.f32.mxu1 %vm310_vm0, %v6361_v38  ;;  %5397 = vmatprep.mubr.msk.f32.mxu0 %vm310_vm0, %v6375_v40  ;;  %v6710_v38 = vld [vmem:[%s6238_s27 + $0x12a] sm:$0xff] }
  0x47   : > { %5190 = vmatmul.mubr.msk.f32.gmra.mrb[20].mxu1 %vm310_vm0, %v6372_v39  ;;  %5398 = vmatmul.mubr.msk.f32.gmra.mrb[20].mxu0 %vm310_vm0, %v6386_v41  ;;  %v6707_v39 = vld [vmem:[%s6238_s27 + $0x110] sm:$0xff] }
  0x48   : > { %5192 = vmatprep.mubr.msk.f32.mxu1 %vm310_vm0, %v6375_v40  ;;  %5400 = vmatprep.mubr.msk.f32.mxu0 %vm310_vm0, %v6389_v42  ;;  %v6696_v40 = vld [vmem:[%s6238_s27 + $0x122] sm:$0xff] }
  0x4b   : > { %5193 = vmatmul.mubr.msk.f32.gmra.mrb[22].mxu1 %vm310_vm0, %v6386_v41  ;;  %5401 = vmatmul.mubr.msk.f32.gmra.mrb[22].mxu0 %vm310_vm0, %v6400_v43  ;;  %v6693_v41 = vld [vmem:[%s6238_s27 + $0x108] sm:$0xff] }
  0x4c   : > { %5195 = vmatprep.mubr.msk.f32.mxu1 %vm310_vm0, %v6389_v42  ;;  %5403 = vmatprep.mubr.msk.f32.mxu0 %vm310_vm0, %v6403_v44  ;;  %v6690_v42 = vld [vmem:[%s6238_s27 + $0x112] sm:$0xff] }
  0x4f   : > { %5196 = vmatmul.mubr.msk.f32.gmra.mrb[24].mxu1 %vm310_vm0, %v6400_v43  ;;  %5404 = vmatmul.mubr.msk.f32.gmra.mrb[24].mxu0 %vm310_vm0, %v6414_v45  ;;  %v6687_v43 = vld [vmem:[%s6238_s27 + $0xf8] sm:$0xff] }
  0x50   : > { %5198 = vmatprep.mubr.msk.f32.mxu1 %vm310_vm0, %v6403_v44  ;;  %5406 = vmatprep.mubr.msk.f32.mxu0 %vm310_vm0, %v6417_v46  ;;  %v6676_v44 = vld [vmem:[%s6238_s27 + $0x10a] sm:$0xff] }
  0x53   : > { %5199 = vmatmul.mubr.msk.f32.gmra.mrb[26].mxu1 %vm310_vm0, %v6414_v45  ;;  %5407 = vmatmul.mubr.msk.f32.gmra.mrb[26].mxu0 %vm310_vm0, %v6428_v47  ;;  %v6673_v45 = vld [vmem:[%s6238_s27 + $0xf0] sm:$0xff] }
  0x54   : > { %5201 = vmatprep.mubr.msk.f32.mxu1 %vm310_vm0, %v6417_v46  ;;  %5409 = vmatprep.mubr.msk.f32.mxu0 %vm310_vm0, %v6431_v48  ;;  %v6670_v46 = vld [vmem:[%s6238_s27 + $0xfa] sm:$0xff] }
  0x57   : > { %5202 = vmatmul.mubr.msk.f32.gmra.mrb[28].mxu1 %vm310_vm0, %v6428_v47  ;;  %5410 = vmatmul.mubr.msk.f32.gmra.mrb[28].mxu0 %vm310_vm0, %v6442_v49  ;;  %v6667_v47 = vld [vmem:[%s6238_s27 + $0xe0] sm:$0xff] }
  0x58   : > { %5204 = vmatprep.mubr.msk.f32.mxu1 %vm310_vm0, %v6431_v48  ;;  %5412 = vmatprep.mubr.msk.f32.mxu0 %vm310_vm0, %v6445_v50  ;;  %v6650_v50 = vld [vmem:[%s6238_s27 + $0xe2] sm:$0xff]  ;;  %v6656_v48 = vld [vmem:[%s6238_s27 + $0xf2] sm:$0xff] }
  0x5b   : > { %5205 = vmatmul.mubr.msk.f32.gmra.mrb[30].mxu1 %vm310_vm0, %v6442_v49  ;;  %5413 = vmatmul.mubr.msk.f32.gmra.mrb[30].mxu0 %vm310_vm0, %v6456_v51  ;;  %v6647_v51 = vld [vmem:[%s6238_s27 + $0xc8] sm:$0xff]  ;;  %v6653_v49 = vld [vmem:[%s6238_s27 + $0xd8] sm:$0xff] }
  0x5c   : > { %5211 = vmatprep.mubr.msk.f32.mxu1 %vm310_vm0, %v241_v52  ;;  %5419 = vmatprep.mubr.msk.f32.mxu0 %vm310_vm0, %v6460_v53  ;;  %v6613_v52 = vld [vmem:[%s6238_s27 + $0xa8] sm:$0xff] }
  0x5f   : > { %5212 = vmatmul.mubr.msk.f32.vlgmr.msra.gmra.mrb[0].mxu1 %vm310_vm0, %v242_v58  ;;  %5420 = vmatmul.mubr.msk.f32.vlgmr.msra.gmra.mrb[0].mxu0 %vm310_vm0, %v6483_v59  ;;  %v6636_v58 = vld [vmem:[%s6238_s27 + $0xda] sm:$0xff] }
  0x60   : > { %5702 = vmatpush3.bf16.msra.mxu0 %v6249_v21  ;;  %5214 = vmatprep.mubr.msk.f32.mxu1 %vm310_vm0, %v6486_v60  ;;  %v6607_v21 = vld [vmem:[%s6238_s27 + $0x98] sm:$0xff]  ;;  %v4741_v60 = vld [vmem:[%s7448_s1 + $0x80] sm:$0xff] }
  0x61   : > { %5422 = vmatprep.mubr.msk.f32.mxu0 %vm310_vm0, %v6489_v61  ;;  %5686 = vmatpush3.bf16.msra.mxu1 %v6251_v22  ;;  %v6610_v22 = vld [vmem:[%s6238_s27 + $0xb2] sm:$0xff] }
  0x62   : > { %5704 = vmatprep.subr.bf16.mxu0 %v6491_v62  ;;  %5688 = vmatprep.subr.bf16.mxu1 %v6493_v63 }
  0x63   : > { %5215 = vmatmul.mubr.msk.f32.gmra.mrb[2].mxu1 %vm310_vm0, %v6502_v0  ;;  %5423 = vmatmul.mubr.msk.f32.gmra.mrb[2].mxu0 %vm310_vm0, %v6505_v1  ;;  %v6790_v0 = vld [vmem:[%s6238_s27 + $0x18a] sm:$0xff] }
  0x64   : > { %5217 = vmatprep.mubr.msk.f32.mxu1 %vm310_vm0, %v6510_v2  ;;  %5425 = vmatprep.mubr.msk.f32.mxu0 %vm310_vm0, %v6513_v3  ;;  %7530 = vst [vmem:[#allocation41_spill] sm:$0xff] %v6790_v0 }
  0x67   : > { %5218 = vmatmul.mubr.msk.f32.gmra.mrb[4].mxu1 %vm310_vm0, %v6527_v4  ;;  %5426 = vmatmul.mubr.msk.f32.gmra.mrb[4].mxu0 %vm310_vm0, %v6530_v5 }
  0x68   : > { %5220 = vmatprep.mubr.msk.f32.mxu1 %vm310_vm0, %v6533_v6  ;;  %5428 = vmatprep.mubr.msk.f32.mxu0 %vm310_vm0, %v6536_v7 }
  0x6b   : > { %5221 = vmatmul.mubr.msk.f32.gmra.mrb[6].mxu1 %vm310_vm0, %v6547_v8  ;;  %5429 = vmatmul.mubr.msk.f32.gmra.mrb[6].mxu0 %vm310_vm0, %v6550_v9 }
  0x6c   : > { %5223 = vmatprep.mubr.msk.f32.mxu1 %vm310_vm0, %v6553_v10  ;;  %5431 = vmatprep.mubr.msk.f32.mxu0 %vm310_vm0, %v6556_v11 }
  0x6f   : > { %5224 = vmatmul.mubr.msk.f32.gmra.mrb[8].mxu1 %vm310_vm0, %v6567_v12  ;;  %5432 = vmatmul.mubr.msk.f32.gmra.mrb[8].mxu0 %vm310_vm0, %v6570_v13 }
  0x70   : > { %5226 = vmatprep.mubr.msk.f32.mxu1 %vm310_vm0, %v6573_v14  ;;  %5434 = vmatprep.mubr.msk.f32.mxu0 %vm310_vm0, %v6576_v15 }
  0x73   : > { %5227 = vmatmul.mubr.msk.f32.gmra.mrb[10].mxu1 %vm310_vm0, %v6587_v16  ;;  %5435 = vmatmul.mubr.msk.f32.gmra.mrb[10].mxu0 %vm310_vm0, %v6590_v17 }
  0x74   : > { %5229 = vmatprep.mubr.msk.f32.mxu1 %vm310_vm0, %v6593_v18  ;;  %5437 = vmatprep.mubr.msk.f32.mxu0 %vm310_vm0, %v6596_v19 }
  0x77   : > { %5230 = vmatmul.mubr.msk.f32.gmra.mrb[12].mxu1 %vm310_vm0, %v6607_v21  ;;  %5438 = vmatmul.mubr.msk.f32.gmra.mrb[12].mxu0 %vm310_vm0, %v6610_v22 }
  0x78   : > { %5232 = vmatprep.mubr.msk.f32.mxu1 %vm310_vm0, %v6613_v52  ;;  %5440 = vmatprep.mubr.msk.f32.mxu0 %vm310_vm0, %v6616_v54 }
  0x7b   : > { %5233 = vmatmul.mubr.msk.f32.gmra.mrb[14].mxu1 %vm310_vm0, %v6627_v55  ;;  %5441 = vmatmul.mubr.msk.f32.gmra.mrb[14].mxu0 %vm310_vm0, %v6630_v56 }
  0x7c   : > { %5235 = vmatprep.mubr.msk.f32.mxu1 %vm310_vm0, %v6633_v57  ;;  %5443 = vmatprep.mubr.msk.f32.mxu0 %vm310_vm0, %v6636_v58 }
  0x7f   : > { %5236 = vmatmul.mubr.msk.f32.gmra.mrb[16].mxu1 %vm310_vm0, %v6647_v51  ;;  %5444 = vmatmul.mubr.msk.f32.gmra.mrb[16].mxu0 %vm310_vm0, %v6650_v50 }
  0x80   : > { %5238 = vmatprep.mubr.msk.f32.mxu1 %vm310_vm0, %v6653_v49  ;;  %5446 = vmatprep.mubr.msk.f32.mxu0 %vm310_vm0, %v6656_v48 }
  0x83   : > { %5239 = vmatmul.mubr.msk.f32.gmra.mrb[18].mxu1 %vm310_vm0, %v6667_v47  ;;  %5447 = vmatmul.mubr.msk.f32.gmra.mrb[18].mxu0 %vm310_vm0, %v6670_v46 }
  0x84   : > { %5241 = vmatprep.mubr.msk.f32.mxu1 %vm310_vm0, %v6673_v45  ;;  %5449 = vmatprep.mubr.msk.f32.mxu0 %vm310_vm0, %v6676_v44 }
  0x87   : > { %5242 = vmatmul.mubr.msk.f32.gmra.mrb[20].mxu1 %vm310_vm0, %v6687_v43  ;;  %5450 = vmatmul.mubr.msk.f32.gmra.mrb[20].mxu0 %vm310_vm0, %v6690_v42 }
  0x88   : > { %5244 = vmatprep.mubr.msk.f32.mxu1 %vm310_vm0, %v6693_v41  ;;  %5452 = vmatprep.mubr.msk.f32.mxu0 %vm310_vm0, %v6696_v40 }
  0x8b   : > { %5245 = vmatmul.mubr.msk.f32.gmra.mrb[22].mxu1 %vm310_vm0, %v6707_v39  ;;  %5453 = vmatmul.mubr.msk.f32.gmra.mrb[22].mxu0 %vm310_vm0, %v6710_v38 }
  0x8c   : > { %5247 = vmatprep.mubr.msk.f32.mxu1 %vm310_vm0, %v6713_v37  ;;  %5455 = vmatprep.mubr.msk.f32.mxu0 %vm310_vm0, %v6716_v36 }
  0x8f   : > { %5248 = vmatmul.mubr.msk.f32.gmra.mrb[24].mxu1 %vm310_vm0, %v6727_v35  ;;  %5456 = vmatmul.mubr.msk.f32.gmra.mrb[24].mxu0 %vm310_vm0, %v6730_v34 }
  0x90   : > { %5250 = vmatprep.mubr.msk.f32.mxu1 %vm310_vm0, %v6733_v33  ;;  %5458 = vmatprep.mubr.msk.f32.mxu0 %vm310_vm0, %v6736_v32 }
  0x93   : > { %5251 = vmatmul.mubr.msk.f32.gmra.mrb[26].mxu1 %vm310_vm0, %v6747_v31  ;;  %5459 = vmatmul.mubr.msk.f32.gmra.mrb[26].mxu0 %vm310_vm0, %v6750_v30 }
  0x94   : > { %5253 = vmatprep.mubr.msk.f32.mxu1 %vm310_vm0, %v6753_v29  ;;  %5461 = vmatprep.mubr.msk.f32.mxu0 %vm310_vm0, %v6756_v28 }
  0x97   : > { %5254 = vmatmul.mubr.msk.f32.gmra.mrb[28].mxu1 %vm310_vm0, %v6767_v27  ;;  %5462 = vmatmul.mubr.msk.f32.gmra.mrb[28].mxu0 %vm310_vm0, %v6770_v26  ;;  %v4742_v26 = vld [vmem:[%s7448_s1 + $0x88] sm:$0xff] }
  0x98   : > { %5256 = vmatprep.mubr.msk.f32.mxu1 %vm310_vm0, %v6773_v25  ;;  %5464 = vmatprep.mubr.msk.f32.mxu0 %vm310_vm0, %v6776_v24  ;;  %v954_v24 = vld [vmem:[%s6238_s27 + $0xa] sm:$0xff]  ;;  %v6807_v28 = vpack.c.bf16 %v4742_v26, %v4741_v60  ;;  %v4607_v26 = vld [vmem:[%s6238_s27 + $0x198] sm:$0xff] }
  0x99   : > { %v7532_v60 = vld [vmem:[#allocation39_spill] sm:$0xff] }
  0x9b   : > { %5257 = vmatmul.mubr.msk.f32.gmra.mrb[30].mxu1 %vm310_vm0, %v6787_v23  ;;  %5465 = vmatmul.mubr.msk.f32.gmra.mrb[30].mxu0 %vm310_vm0, %v6790_v0  ;;  %v7535_v0 = vld [vmem:[#allocation36_spill] sm:$0xff] }
  0x9c   : > { %5263 = vmatprep.mubr.msk.f32.mxu1 %vm310_vm0, %v953_v20  ;;  %5471 = vmatprep.mubr.msk.f32.mxu0 %vm310_vm0, %v6510_v2  ;;  %v6916_v20 = vld [vmem:[%s6238_s27 + $0x180] sm:$0xff] }
  0x9f   : > { %5264 = vmatmul.mubr.msk.f32.vlgmr.msra.gmra.mrb[0].mxu1 %vm310_vm0, %v954_v24  ;;  %5472 = vmatmul.mubr.msk.f32.vlgmr.msra.gmra.mrb[0].mxu0 %vm310_vm0, %v6527_v4  ;;  %v6927_v24 = vld [vmem:[%s6238_s27 + $0x188] sm:$0xff] }
  0xa0   : > { %5706 = vmatpush3.bf16.msra.mxu0 %v6491_v62  ;;  %5266 = vmatprep.mubr.msk.f32.mxu1 %vm310_vm0, %v6460_v53  ;;  %v7531_v53 = vld [vmem:[#allocation38_spill] sm:$0xff]  ;;  %v7533_v62 = vld [vmem:[#allocation35_spill] sm:$0xff] }
  0xa1   : > { %5474 = vmatprep.mubr.msk.f32.mxu0 %vm310_vm0, %v6533_v6  ;;  %5690 = vmatpush3.bf16.msra.mxu1 %v6493_v63  ;;  %v7534_v63 = vld [vmem:[#allocation5_spill] sm:$0xff] }
  0xa2   : > { %5708 = vmatprep.subr.bf16.mxu0 %v6807_v28 }
  0xa3   : > { %5267 = vmatmul.mubr.msk.f32.gmra.mrb[2].mxu1 %vm310_vm0, %v6483_v59  ;;  %5475 = vmatmul.mubr.msk.f32.gmra.mrb[2].mxu0 %vm310_vm0, %v6547_v8  ;;  %v4608_v59 = vld [vmem:[%s6238_s27 + $0x1a0] sm:$0xff] }
  0xa4   : > { %5269 = vmatprep.mubr.msk.f32.mxu1 %vm310_vm0, %v6489_v61  ;;  %5477 = vmatprep.mubr.msk.f32.mxu0 %vm310_vm0, %v6553_v10 }
  0xa7   : > { %5270 = vmatmul.mubr.msk.f32.gmra.mrb[4].mxu1 %vm310_vm0, %v6505_v1  ;;  %5478 = vmatmul.mubr.msk.f32.gmra.mrb[4].mxu0 %vm310_vm0, %v6567_v12 }
  0xa8   : > { %5272 = vmatprep.mubr.msk.f32.mxu1 %vm310_vm0, %v6513_v3  ;;  %5480 = vmatprep.mubr.msk.f32.mxu0 %vm310_vm0, %v6573_v14 }
  0xab   : > { %5273 = vmatmul.mubr.msk.f32.gmra.mrb[6].mxu1 %vm310_vm0, %v6530_v5  ;;  %5481 = vmatmul.mubr.msk.f32.gmra.mrb[6].mxu0 %vm310_vm0, %v6587_v16 }
  0xac   : > { %5275 = vmatprep.mubr.msk.f32.mxu1 %vm310_vm0, %v6536_v7  ;;  %5483 = vmatprep.mubr.msk.f32.mxu0 %vm310_vm0, %v6593_v18 }
  0xaf   : > { %5276 = vmatmul.mubr.msk.f32.gmra.mrb[8].mxu1 %vm310_vm0, %v6550_v9  ;;  %5484 = vmatmul.mubr.msk.f32.gmra.mrb[8].mxu0 %vm310_vm0, %v6607_v21 }
  0xb0   : > { %5278 = vmatprep.mubr.msk.f32.mxu1 %vm310_vm0, %v6556_v11  ;;  %5486 = vmatprep.mubr.msk.f32.mxu0 %vm310_vm0, %v6613_v52 }
  0xb3   : > { %5279 = vmatmul.mubr.msk.f32.gmra.mrb[10].mxu1 %vm310_vm0, %v6570_v13  ;;  %5487 = vmatmul.mubr.msk.f32.gmra.mrb[10].mxu0 %vm310_vm0, %v6627_v55 }
  0xb4   : > { %5281 = vmatprep.mubr.msk.f32.mxu1 %vm310_vm0, %v6576_v15  ;;  %5489 = vmatprep.mubr.msk.f32.mxu0 %vm310_vm0, %v6633_v57 }
  0xb7   : > { %5282 = vmatmul.mubr.msk.f32.gmra.mrb[12].mxu1 %vm310_vm0, %v6590_v17  ;;  %5490 = vmatmul.mubr.msk.f32.gmra.mrb[12].mxu0 %vm310_vm0, %v6647_v51 }
  0xb8   : > { %5284 = vmatprep.mubr.msk.f32.mxu1 %vm310_vm0, %v6596_v19  ;;  %5492 = vmatprep.mubr.msk.f32.mxu0 %vm310_vm0, %v6653_v49 }
  0xbb   : > { %5285 = vmatmul.mubr.msk.f32.gmra.mrb[14].mxu1 %vm310_vm0, %v6610_v22  ;;  %5493 = vmatmul.mubr.msk.f32.gmra.mrb[14].mxu0 %vm310_vm0, %v6667_v47 }
  0xbc   : > { %5287 = vmatprep.mubr.msk.f32.mxu1 %vm310_vm0, %v6616_v54  ;;  %5495 = vmatprep.mubr.msk.f32.mxu0 %vm310_vm0, %v6673_v45 }
  0xbf   : > { %5288 = vmatmul.mubr.msk.f32.gmra.mrb[16].mxu1 %vm310_vm0, %v6630_v56  ;;  %5496 = vmatmul.mubr.msk.f32.gmra.mrb[16].mxu0 %vm310_vm0, %v6687_v43 }
  0xc0   : > { %5290 = vmatprep.mubr.msk.f32.mxu1 %vm310_vm0, %v6636_v58  ;;  %5498 = vmatprep.mubr.msk.f32.mxu0 %vm310_vm0, %v6693_v41 }
  0xc3   : > { %5291 = vmatmul.mubr.msk.f32.gmra.mrb[18].mxu1 %vm310_vm0, %v6650_v50  ;;  %5499 = vmatmul.mubr.msk.f32.gmra.mrb[18].mxu0 %vm310_vm0, %v6707_v39 }
  0xc4   : > { %5293 = vmatprep.mubr.msk.f32.mxu1 %vm310_vm0, %v6656_v48  ;;  %5501 = vmatprep.mubr.msk.f32.mxu0 %vm310_vm0, %v6713_v37 }
  0xc7   : > { %5294 = vmatmul.mubr.msk.f32.gmra.mrb[20].mxu1 %vm310_vm0, %v6670_v46  ;;  %5502 = vmatmul.mubr.msk.f32.gmra.mrb[20].mxu0 %vm310_vm0, %v6727_v35 }
  0xc8   : > { %5296 = vmatprep.mubr.msk.f32.mxu1 %vm310_vm0, %v6676_v44  ;;  %5504 = vmatprep.mubr.msk.f32.mxu0 %vm310_vm0, %v6733_v33 }
  0xcb   : > { %5297 = vmatmul.mubr.msk.f32.gmra.mrb[22].mxu1 %vm310_vm0, %v6690_v42  ;;  %5505 = vmatmul.mubr.msk.f32.gmra.mrb[22].mxu0 %vm310_vm0, %v6747_v31 }
  0xcc   : > { %5299 = vmatprep.mubr.msk.f32.mxu1 %vm310_vm0, %v6696_v40  ;;  %5507 = vmatprep.mubr.msk.f32.mxu0 %vm310_vm0, %v6753_v29 }
  0xcf   : > { %5300 = vmatmul.mubr.msk.f32.gmra.mrb[24].mxu1 %vm310_vm0, %v6710_v38  ;;  %5508 = vmatmul.mubr.msk.f32.gmra.mrb[24].mxu0 %vm310_vm0, %v6767_v27 }
  0xd0   : > { %5302 = vmatprep.mubr.msk.f32.mxu1 %vm310_vm0, %v6716_v36  ;;  %5510 = vmatprep.mubr.msk.f32.mxu0 %vm310_vm0, %v6773_v25 }
  0xd3   : > { %5303 = vmatmul.mubr.msk.f32.gmra.mrb[26].mxu1 %vm310_vm0, %v6730_v34  ;;  %5511 = vmatmul.mubr.msk.f32.gmra.mrb[26].mxu0 %vm310_vm0, %v6787_v23 }
  0xd4   : > { %5305 = vmatprep.mubr.msk.f32.mxu1 %vm310_vm0, %v6736_v32  ;;  %5513 = vmatprep.mubr.msk.f32.mxu0 %vm310_vm0, %v6916_v20 }
  0xd7   : > { %5306 = vmatmul.mubr.msk.f32.gmra.mrb[28].mxu1 %vm310_vm0, %v6750_v30  ;;  %5514 = vmatmul.mubr.msk.f32.gmra.mrb[28].mxu0 %vm310_vm0, %v6927_v24  ;;  %v7536_v30 = vld [vmem:[#allocation6_spill] sm:$0xff] }
  0xd8   : > { %5308 = vmatprep.mubr.msk.f32.mxu1 %vm310_vm0, %v7531_v53  ;;  %5516 = vmatprep.mubr.msk.f32.mxu0 %vm310_vm0, %v4607_v26  ;;  %v7537_v26 = vld [vmem:[#allocation7_spill] sm:$0xff] }
  0xdb   : > { %5309 = vmatmul.mubr.msk.f32.gmra.mrb[30].mxu1 %vm310_vm0, %v7532_v60  ;;  %5517 = vmatmul.mubr.msk.f32.gmra.mrb[30].mxu0 %vm310_vm0, %v4608_v59  ;;  %v7538_v59 = vld [vmem:[#allocation8_spill] sm:$0xff] }
  0xdc   : > { %5315 = vmatprep.mubr.msk.f32.mxu1 %vm310_vm0, %v7533_v62  ;;  %5523 = vmatprep.mubr.msk.f32.mxu0 %vm310_vm0, %v7534_v63 }
  0xdf   : > { %5316 = vmatmul.mubr.msk.f32.vlgmr.msra.gmra.mrb[0].mxu1 %vm310_vm0, %v7535_v0  ;;  %5524 = vmatmul.mubr.msk.f32.vlgmr.msra.gmra.mrb[0].mxu0 %vm310_vm0, %v7536_v30  ;;  %v7539_v0 = vld [vmem:[#allocation9_spill] sm:$0xff]  ;;  %v7541_v30 = vld [vmem:[#allocation11_spill] sm:$0xff] }
  0xe0   : > { %5710 = vmatpush3.bf16.msra.mxu0 %v6807_v28  ;;  %5318 = vmatprep.mubr.msk.f32.mxu1 %vm310_vm0, %v6510_v2  ;;  %v7540_v28 = vld [vmem:[#allocation10_spill] sm:$0xff]  ;;  %v7542_v2 = vld [vmem:[#allocation12_spill] sm:$0xff] }
  0xe1   : > { %5526 = vmatprep.mubr.msk.f32.mxu0 %vm310_vm0, %v7537_v26 }
  0xe3   : > { %5319 = vmatmul.mubr.msk.f32.gmra.mrb[2].mxu1 %vm310_vm0, %v6527_v4  ;;  %5527 = vmatmul.mubr.msk.f32.gmra.mrb[2].mxu0 %vm310_vm0, %v7538_v59  ;;  %v7543_v4 = vld [vmem:[#allocation13_spill] sm:$0xff] }
  0xe4   : > { %5321 = vmatprep.mubr.msk.f32.mxu1 %vm310_vm0, %v6533_v6  ;;  %5529 = vmatprep.mubr.msk.f32.mxu0 %vm310_vm0, %v7539_v0  ;;  %v7544_v6 = vld [vmem:[#allocation14_spill] sm:$0xff] }
  0xe7   : > { %5322 = vmatmul.mubr.msk.f32.gmra.mrb[4].mxu1 %vm310_vm0, %v6547_v8  ;;  %5530 = vmatmul.mubr.msk.f32.gmra.mrb[4].mxu0 %vm310_vm0, %v7540_v28  ;;  %v7545_v8 = vld [vmem:[#allocation15_spill] sm:$0xff] }
  0xe8   : > { %5324 = vmatprep.mubr.msk.f32.mxu1 %vm310_vm0, %v6553_v10  ;;  %5532 = vmatprep.mubr.msk.f32.mxu0 %vm310_vm0, %v7541_v30  ;;  %v7546_v10 = vld [vmem:[#allocation16_spill] sm:$0xff] }
  0xeb   : > { %5325 = vmatmul.mubr.msk.f32.gmra.mrb[6].mxu1 %vm310_vm0, %v6567_v12  ;;  %5533 = vmatmul.mubr.msk.f32.gmra.mrb[6].mxu0 %vm310_vm0, %v7542_v2  ;;  %v7547_v12 = vld [vmem:[#allocation17_spill] sm:$0xff] }
  0xec   : > { %5327 = vmatprep.mubr.msk.f32.mxu1 %vm310_vm0, %v6573_v14  ;;  %5535 = vmatprep.mubr.msk.f32.mxu0 %vm310_vm0, %v7543_v4  ;;  %v7548_v14 = vld [vmem:[#allocation18_spill] sm:$0xff] }
  0xef   : > { %5328 = vmatmul.mubr.msk.f32.gmra.mrb[8].mxu1 %vm310_vm0, %v6587_v16  ;;  %5536 = vmatmul.mubr.msk.f32.gmra.mrb[8].mxu0 %vm310_vm0, %v7544_v6  ;;  %v7549_v16 = vld [vmem:[#allocation19_spill] sm:$0xff]  ;;  %v7193_v6 = vld [vmem:[%s7449_s2] ss:$0 sm:$0xff] }
  0xf0   : > { %5330 = vmatprep.mubr.msk.f32.mxu1 %vm310_vm0, %v6593_v18  ;;  %5538 = vmatprep.mubr.msk.f32.mxu0 %vm310_vm0, %v7545_v8  ;;  %v7550_v18 = vld [vmem:[#allocation20_spill] sm:$0xff] }
  0xf3   : > { %5331 = vmatmul.mubr.msk.f32.gmra.mrb[10].mxu1 %vm310_vm0, %v6607_v21  ;;  %5539 = vmatmul.mubr.msk.f32.gmra.mrb[10].mxu0 %vm310_vm0, %v7546_v10  ;;  %v7551_v21 = vld [vmem:[#allocation21_spill] sm:$0xff] }
  0xf4   : > { %5333 = vmatprep.mubr.msk.f32.mxu1 %vm310_vm0, %v6613_v52  ;;  %5541 = vmatprep.mubr.msk.f32.mxu0 %vm310_vm0, %v7547_v12  ;;  %v7552_v52 = vld [vmem:[#allocation22_spill] sm:$0xff] }
  0xf7   : > { %5334 = vmatmul.mubr.msk.f32.gmra.mrb[12].mxu1 %vm310_vm0, %v6627_v55  ;;  %5542 = vmatmul.mubr.msk.f32.gmra.mrb[12].mxu0 %vm310_vm0, %v7548_v14  ;;  %v7553_v55 = vld [vmem:[#allocation23_spill] sm:$0xff] }
  0xf8   : > { %5336 = vmatprep.mubr.msk.f32.mxu1 %vm310_vm0, %v6633_v57  ;;  %5544 = vmatprep.mubr.msk.f32.mxu0 %vm310_vm0, %v7549_v16 }
  0xfb   : > { %5337 = vmatmul.mubr.msk.f32.gmra.mrb[14].mxu1 %vm310_vm0, %v6647_v51  ;;  %5545 = vmatmul.mubr.msk.f32.gmra.mrb[14].mxu0 %vm310_vm0, %v7550_v18  ;;  %v7554_v51 = vld [vmem:[#allocation24_spill] sm:$0xff] }
  0xfc   : > { %5339 = vmatprep.mubr.msk.f32.mxu1 %vm310_vm0, %v6653_v49  ;;  %5547 = vmatprep.mubr.msk.f32.mxu0 %vm310_vm0, %v7551_v21  ;;  %v7555_v49 = vld [vmem:[#allocation25_spill] sm:$0xff] }
  0xff   : > { %5340 = vmatmul.mubr.msk.f32.gmra.mrb[16].mxu1 %vm310_vm0, %v6667_v47  ;;  %5548 = vmatmul.mubr.msk.f32.gmra.mrb[16].mxu0 %vm310_vm0, %v7552_v52  ;;  %v7556_v47 = vld [vmem:[#allocation26_spill] sm:$0xff] }
 0x100   : > { %5342 = vmatprep.mubr.msk.f32.mxu1 %vm310_vm0, %v6673_v45  ;;  %5550 = vmatprep.mubr.msk.f32.mxu0 %vm310_vm0, %v7553_v55  ;;  %v7562_v45 = vld [vmem:[#allocation32_spill] sm:$0xff] }
 0x103   : > { %5343 = vmatmul.mubr.msk.f32.gmra.mrb[18].mxu1 %vm310_vm0, %v6687_v43  ;;  %5551 = vmatmul.mubr.msk.f32.gmra.mrb[18].mxu0 %vm310_vm0, %v7554_v51  ;;  %v7557_v43 = vld [vmem:[#allocation27_spill] sm:$0xff] }
 0x104   : > { %5345 = vmatprep.mubr.msk.f32.mxu1 %vm310_vm0, %v6693_v41  ;;  %5553 = vmatprep.mubr.msk.f32.mxu0 %vm310_vm0, %v7555_v49  ;;  %v7558_v41 = vld [vmem:[#allocation28_spill] sm:$0xff] }
 0x107   : > { %5346 = vmatmul.mubr.msk.f32.gmra.mrb[20].mxu1 %vm310_vm0, %v6707_v39  ;;  %5554 = vmatmul.mubr.msk.f32.gmra.mrb[20].mxu0 %vm310_vm0, %v7556_v47  ;;  %v7559_v39 = vld [vmem:[#allocation29_spill] sm:$0xff] }
 0x108   : > { %5348 = vmatprep.mubr.msk.f32.mxu1 %vm310_vm0, %v6713_v37  ;;  %5556 = vmatprep.mubr.msk.f32.mxu0 %vm310_vm0, %v7557_v43  ;;  %v7560_v37 = vld [vmem:[#allocation30_spill] sm:$0xff] }
 0x10b   : > { %5349 = vmatmul.mubr.msk.f32.gmra.mrb[22].mxu1 %vm310_vm0, %v6727_v35  ;;  %5557 = vmatmul.mubr.msk.f32.gmra.mrb[22].mxu0 %vm310_vm0, %v7558_v41  ;;  %v7561_v35 = vld [vmem:[#allocation31_spill] sm:$0xff] }
 0x10c   : > { %5351 = vmatprep.mubr.msk.f32.mxu1 %vm310_vm0, %v6733_v33  ;;  %5559 = vmatprep.mubr.msk.f32.mxu0 %vm310_vm0, %v7559_v39  ;;  %v7563_v33 = vld [vmem:[#allocation33_spill] sm:$0xff] }
 0x10f   : > { %5352 = vmatmul.mubr.msk.f32.gmra.mrb[24].mxu1 %vm310_vm0, %v6747_v31  ;;  %5560 = vmatmul.mubr.msk.f32.gmra.mrb[24].mxu0 %vm310_vm0, %v7560_v37  ;;  %v4673_v31 = vld [vmem:[%s6238_s27 + $0x199] sm:$0xff] }
 0x110   : > { %5354 = vmatprep.mubr.msk.f32.mxu1 %vm310_vm0, %v6753_v29  ;;  %5562 = vmatprep.mubr.msk.f32.mxu0 %vm310_vm0, %v7561_v35  ;;  %v7564_v29 = vld [vmem:[#allocation34_spill] sm:$0xff] }
 0x113   : > { %5355 = vmatmul.mubr.msk.f32.gmra.mrb[26].mxu1 %vm310_vm0, %v6767_v27  ;;  %5563 = vmatmul.mubr.msk.f32.gmra.mrb[26].mxu0 %vm310_vm0, %v7562_v45  ;;  %v4674_v27 = vld [vmem:[%s6238_s27 + $0x1a1] sm:$0xff] }
 0x114   : > { %5357 = vmatprep.mubr.msk.f32.mxu1 %vm310_vm0, %v6773_v25  ;;  %5565 = vmatprep.mubr.msk.f32.mxu0 %vm310_vm0, %v7563_v33  ;;  %v3811_v25 = vld [vmem:[%s7450_s3 + $0x8] sm:$0xff] }
 0x117   : > { %5358 = vmatmul.mubr.msk.f32.gmra.mrb[28].mxu1 %vm310_vm0, %v6787_v23  ;;  %5566 = vmatmul.mubr.msk.f32.gmra.mrb[28].mxu0 %vm310_vm0, %v7564_v29  ;;  %v3810_v23 = vld [vmem:[%s7450_s3] sm:$0xff] }
 0x118   : > { %5360 = vmatprep.mubr.msk.f32.mxu1 %vm310_vm0, %v6916_v20  ;;  %5568 = vmatprep.mubr.msk.f32.mxu0 %vm310_vm0, %v4673_v31 }
 0x11b   : > { %5361 = vmatmul.mubr.msk.f32.gmra.mrb[30].mxu1 %vm310_vm0, %v6927_v24  ;;  %5569 = vmatmul.mubr.msk.f32.gmra.mrb[30].mxu0 %vm310_vm0, %v4674_v27 }
 0x11c   : > { %5575 = vmatprep.mubr.msk.f32.mxu0 %vm310_vm0, %v6489_v61  ;;  %v5711_v61 = vpack.c.bf16 %v3811_v25, %v3810_v23 }
 0x11e   : > { %5712 = vmatprep.subr.bf16.mxu1 %v5711_v61 }
 0x11f   : > { %5576 = vmatmul.mubr.msk.f32.vlgmr.msra.gmra.mrb[0].mxu0 %vm310_vm0, %v6505_v1  ;;  %5714 = vmatpush3.bf16.msra.mxu1 %v5711_v61 }
 0x120   : > { %5578 = vmatprep.mubr.msk.f32.mxu0 %vm310_vm0, %v6513_v3 }
 0x123   : > { %5579 = vmatmul.mubr.msk.f32.gmra.mrb[2].mxu0 %vm310_vm0, %v6530_v5 }
 0x124   : > { %5581 = vmatprep.mubr.msk.f32.mxu0 %vm310_vm0, %v6536_v7 }
 0x127   : > { %5582 = vmatmul.mubr.msk.f32.gmra.mrb[4].mxu0 %vm310_vm0, %v6550_v9 }
 0x128   : > { %5584 = vmatprep.mubr.msk.f32.mxu0 %vm310_vm0, %v6556_v11 }
 0x12b   : > { %5585 = vmatmul.mubr.msk.f32.gmra.mrb[6].mxu0 %vm310_vm0, %v6570_v13 }
 0x12c   : > { %5587 = vmatprep.mubr.msk.f32.mxu0 %vm310_vm0, %v6576_v15 }
 0x12f   : > { %5588 = vmatmul.mubr.msk.f32.gmra.mrb[8].mxu0 %vm310_vm0, %v6590_v17 }
 0x130   : > { %5590 = vmatprep.mubr.msk.f32.mxu0 %vm310_vm0, %v6596_v19 }
 0x133   : > { %5591 = vmatmul.mubr.msk.f32.gmra.mrb[10].mxu0 %vm310_vm0, %v6610_v22 }
 0x134   : > { %5593 = vmatprep.mubr.msk.f32.mxu0 %vm310_vm0, %v6616_v54 }
 0x137   : > { %5594 = vmatmul.mubr.msk.f32.gmra.mrb[12].mxu0 %vm310_vm0, %v6630_v56 }
 0x138   : > { %5596 = vmatprep.mubr.msk.f32.mxu0 %vm310_vm0, %v6636_v58 }
 0x13b   : > { %5597 = vmatmul.mubr.msk.f32.gmra.mrb[14].mxu0 %vm310_vm0, %v6650_v50 }
 0x13c   : > { %5599 = vmatprep.mubr.msk.f32.mxu0 %vm310_vm0, %v6656_v48 }
 0x13f   : > { %5600 = vmatmul.mubr.msk.f32.gmra.mrb[16].mxu0 %vm310_vm0, %v6670_v46  ;;  %v7565_v46 = vld [vmem:[#allocation37_spill] sm:$0xff] }
 0x140   : > { %5602 = vmatprep.mubr.msk.f32.mxu0 %vm310_vm0, %v6676_v44 }
 0x143   : > { %5603 = vmatmul.mubr.msk.f32.gmra.mrb[18].mxu0 %vm310_vm0, %v6690_v42 }
 0x144   : > { %5605 = vmatprep.mubr.msk.f32.mxu0 %vm310_vm0, %v6696_v40  ;;  %v7566_v40 = vld [vmem:[#allocation40_spill] sm:$0xff] }
 0x147   : > { %5606 = vmatmul.mubr.msk.f32.gmra.mrb[20].mxu0 %vm310_vm0, %v6710_v38  ;;  %v4739_v38 = vld [vmem:[%s6238_s27 + $0x19a] sm:$0xff] }
 0x148   : > { %5608 = vmatprep.mubr.msk.f32.mxu0 %vm310_vm0, %v6716_v36  ;;  %v7567_v36 = vld [vmem:[#allocation41_spill] sm:$0xff] }
 0x14b   : > { %5609 = vmatmul.mubr.msk.f32.gmra.mrb[22].mxu0 %vm310_vm0, %v6730_v34  ;;  %v4740_v34 = vld [vmem:[%s6238_s27 + $0x1a2] sm:$0xff]  ;;  %s6035_s27 = scalar_lea.vmem %s6034_s7, 8192 }
 0x14c   : > { %5611 = vmatprep.mubr.msk.f32.mxu0 %vm310_vm0, %v6736_v32  ;;  %p6037_p2 = scmp.lt.s32.totalorder %s6035_s27, %s6029_s25 }
 0x14e   : > { %p6038_p3 = por %p6037_p2, %p6036_p1 }
 0x14f   : > { %5612 = vmatmul.mubr.msk.f32.gmra.mrb[24].mxu0 %vm310_vm0, %v7565_v46 }
 0x150   : > { %5614 = vmatprep.mubr.msk.f32.mxu0 %vm310_vm0, %v7531_v53  ;;  %p6039_p5 = pnand %p6038_p3, %p6032_p0 }
 0x153   : > { %5615 = vmatmul.mubr.msk.f32.gmra.mrb[26].mxu0 %vm310_vm0, %v7532_v60 }
 0x154   : > { %5617 = vmatprep.mubr.msk.f32.mxu0 %vm310_vm0, %v7566_v40 }
 0x157   : > { %5618 = vmatmul.mubr.msk.f32.gmra.mrb[28].mxu0 %vm310_vm0, %v7567_v36 }
 0x158   : > { %5620 = vmatprep.mubr.msk.f32.mxu0 %vm310_vm0, %v4739_v38 }
 0x15b   : > { %5621 = vmatmul.mubr.msk.f32.gmra.mrb[30].mxu0 %vm310_vm0, %v4740_v34 }
 0x1b2   : > { %v5317_v32 = vpop.f32.mrb[0].mxu1 }
 0x1b3   : > { %v1541_v42 = vpop.f32.mrb[1].mxu1 }
 0x1b6   : > { %v5320_v44 = vpop.f32.mrb[2].mxu1 }
 0x1b7   : > { %v1551_v48 = vpop.f32.mrb[3].mxu1 }
 0x1ba   : > { %v5323_v50 = vpop.f32.mrb[4].mxu1 }
 0x1bb   : > { %v1561_v1 = vpop.f32.mrb[5].mxu1 }
 0x1be   : > { %v5326_v3 = vpop.f32.mrb[6].mxu1 }
 0x1bf   : > { %v7140_v5 = vpop.f32.mrb[7].mxu1 }
 0x1c2   : > { %v7142_v7 = vpop.f32.mrb[8].mxu1 }
 0x1c3   : > { %v7144_v9 = vpop.f32.mrb[9].mxu1 }
 0x1c6   : > { %v7146_v11 = vpop.f32.mrb[10].mxu1 }
 0x1c7   : > { %v7148_v13 = vpop.f32.mrb[11].mxu1 }
 0x1ca   : > { %v7150_v15 = vpop.f32.mrb[12].mxu1 }
 0x1cb   : > { %v7152_v17 = vpop.f32.mrb[13].mxu1 }
 0x1ce   : > { %v7154_v19 = vpop.f32.mrb[14].mxu1 }
 0x1cf   : > { %v7156_v22 = vpop.f32.mrb[15].mxu1 }
 0x1d2   : > { %v7158_v54 = vpop.f32.mrb[16].mxu1 }
 0x1d3   : > { %v7160_v56 = vpop.f32.mrb[17].mxu1 }
 0x1d6   : > { %v7162_v57 = vpop.f32.mrb[18].mxu1 }
 0x1d7   : > { %v7164_v58 = vpop.f32.mrb[19].mxu1 }
 0x1da   : > { %v7166_v20 = vpop.f32.mrb[20].mxu1 }
 0x1db   : > { %v7168_v24 = vpop.f32.mrb[21].mxu1 }
 0x1de   : > { %v7170_v53 = vpop.f32.mrb[22].mxu1 }
 0x1df   : > { %v7172_v60 = vpop.f32.mrb[23].mxu1 }
 0x1e2   : > { %v7174_v62 = vpop.f32.mrb[24].mxu1 }
 0x1e3   : > { %v7176_v63 = vpop.f32.mrb[25].mxu1 }
 0x1e6   : > { %v7178_v26 = vpop.f32.mrb[26].mxu1 }
 0x1e7   : > { %v7180_v59 = vpop.f32.mrb[27].mxu1 }
 0x1ea   : > { %v7182_v0 = vpop.f32.mrb[28].mxu1 }
 0x1eb   : > { %v7184_v28 = vpop.f32.mrb[29].mxu1 }
 0x1ee   : > { %v7186_v30 = vpop.f32.mrb[30].mxu1 }
 0x1ef   : > { %v7188_v2 = vpop.f32.mrb[31].mxu1 }
 0x1f2   : > { %v5577_v4 = vpop.f32.mrb[0].mxu0 }
 0x1f3   : > { %v5715_v8 = vadd.f32 %v5577_v4, %v5317_v32  ;;  %v3484_v10 = vpop.f32.mrb[1].mxu0 }
 0x1f4   : > { %v5716_v12 = vadd.f32 %v3484_v10, %v1541_v42 }
 0x1f5   : > { %v3683_v14 = vadd.f32 %v5715_v8, %v7193_v6 }
 0x1f6   : > { %v3682_v16 = vadd.f32 %v5716_v12, %v7193_v6  ;;  %v5580_v18 = vpop.f32.mrb[2].mxu0 }
 0x1f7   : > { %v3747_v21 = vmul.f32 0.2, %v3683_v14  ;;  %v5717_v52 = vadd.f32 %v5580_v18, %v5320_v44  ;;  %v3494_v55 = vpop.f32.mrb[3].mxu0  ;;  %vm3715_vm1 = vcmp.ge.f32.partialorder %v3683_v14, 0.0 }
 0x1f8   : > { %v3746_v51 = vmul.f32 0.2, %v3682_v16  ;;  %v5718_v49 = vadd.f32 %v3494_v55, %v1551_v48  ;;  %vm3714_vm2 = vcmp.ge.f32.partialorder %v3682_v16, 0.0 }
 0x1f9   : > { %v3685_v47 = vadd.f32 %v5717_v52, %v7193_v6  ;;  %v3779_v37 = vsel %vm3715_vm1, %v3683_v14, %v3747_v21 }
 0x1fa   : > { %v3684_v43 = vadd.f32 %v5718_v49, %v7193_v6  ;;  %v5583_v41 = vpop.f32.mrb[4].mxu0  ;;  %v3778_v39 = vsel %vm3714_vm2, %v3682_v16, %v3746_v51 }
 0x1fb   : > { %v3749_v35 = vmul.f32 0.2, %v3685_v47  ;;  %v5719_v45 = vadd.f32 %v5583_v41, %v5323_v50  ;;  %v3504_v33 = vpop.f32.mrb[5].mxu0  ;;  %5627 = vmatprep.mubr.msk.f32.mxu1 %vm310_vm0, %v3778_v39  ;;  %vm3717_vm4 = vcmp.ge.f32.partialorder %v3685_v47, 0.0 }
 0x1fc   : > { %v3748_v31 = vmul.f32 0.2, %v3684_v43  ;;  %v5720_v29 = vadd.f32 %v3504_v33, %v1561_v1  ;;  %5628 = vmatmul.mubr.msk.f32.vlgmr.msra.gmra.mrb[32].mxu1 %vm310_vm0, %v3779_v37  ;;  %vm3716_vm3 = vcmp.ge.f32.partialorder %v3684_v43, 0.0 }
 0x1fd   : > { %v3687_v27 = vadd.f32 %v5719_v45, %v7193_v6  ;;  %v3781_v36 = vsel %vm3717_vm4, %v3685_v47, %v3749_v35 }
 0x1fe   : > { %v3686_v23 = vadd.f32 %v5720_v29, %v7193_v6  ;;  %v5586_v25 = vpop.f32.mrb[6].mxu0  ;;  %v3780_v61 = vsel %vm3716_vm3, %v3684_v43, %v3748_v31 }
 0x1ff   : > { %v3751_v46 = vmul.f32 0.2, %v3687_v27  ;;  %v5721_v40 = vadd.f32 %v5586_v25, %v5326_v3  ;;  %v3514_v38 = vpop.f32.mrb[7].mxu0  ;;  %5630 = vmatprep.mubr.msk.f32.mxu1 %vm310_vm0, %v3780_v61  ;;  %vm3719_vm6 = vcmp.ge.f32.partialorder %v3687_v27, 0.0 }
 0x200   : > { %v3750_v34 = vmul.f32 0.2, %v3686_v23  ;;  %v5722_v32 = vadd.f32 %v3514_v38, %v7140_v5  ;;  %5631 = vmatmul.mubr.msk.f32.gmra.mrb[34].mxu1 %vm310_vm0, %v3781_v36  ;;  %vm3718_vm5 = vcmp.ge.f32.partialorder %v3686_v23, 0.0 }
 0x201   : > { %v3689_v42 = vadd.f32 %v5721_v40, %v7193_v6  ;;  %v3783_v8 = vsel %vm3719_vm6, %v3687_v27, %v3751_v46 }
 0x202   : > { %v3688_v44 = vadd.f32 %v5722_v32, %v7193_v6  ;;  %v5589_v48 = vpop.f32.mrb[8].mxu0  ;;  %v3782_v50 = vsel %vm3718_vm5, %v3686_v23, %v3750_v34 }
 0x203   : > { %v3753_v1 = vmul.f32 0.2, %v3689_v42  ;;  %v5723_v3 = vadd.f32 %v5589_v48, %v7142_v7  ;;  %v3524_v4 = vpop.f32.mrb[9].mxu0  ;;  %5633 = vmatprep.mubr.msk.f32.mxu1 %vm310_vm0, %v3782_v50  ;;  %vm3721_vm8 = vcmp.ge.f32.partialorder %v3689_v42, 0.0 }
 0x204   : > { %v3752_v10 = vmul.f32 0.2, %v3688_v44  ;;  %v5724_v5 = vadd.f32 %v3524_v4, %v7144_v9  ;;  %5634 = vmatmul.mubr.msk.f32.gmra.mrb[36].mxu1 %vm310_vm0, %v3783_v8  ;;  %vm3720_vm7 = vcmp.ge.f32.partialorder %v3688_v44, 0.0 }
 0x205   : > { %v3691_v12 = vadd.f32 %v5723_v3, %v7193_v6  ;;  %v3785_v55 = vsel %vm3721_vm8, %v3689_v42, %v3753_v1 }
 0x206   : > { %v3690_v14 = vadd.f32 %v5724_v5, %v7193_v6  ;;  %v5592_v16 = vpop.f32.mrb[10].mxu0  ;;  %v3784_v18 = vsel %vm3720_vm7, %v3688_v44, %v3752_v10 }
 0x207   : > { %v3755_v21 = vmul.f32 0.2, %v3691_v12  ;;  %v5725_v7 = vadd.f32 %v5592_v16, %v7146_v11  ;;  %v3534_v52 = vpop.f32.mrb[11].mxu0  ;;  %5636 = vmatprep.mubr.msk.f32.mxu1 %vm310_vm0, %v3784_v18  ;;  %vm3723_vm10 = vcmp.ge.f32.partialorder %v3691_v12, 0.0 }
 0x208   : > { %v3754_v51 = vmul.f32 0.2, %v3690_v14  ;;  %v5726_v9 = vadd.f32 %v3534_v52, %v7148_v13  ;;  %5637 = vmatmul.mubr.msk.f32.gmra.mrb[38].mxu1 %vm310_vm0, %v3785_v55  ;;  %vm3722_vm9 = vcmp.ge.f32.partialorder %v3690_v14, 0.0 }
 0x209   : > { %v3693_v49 = vadd.f32 %v5725_v7, %v7193_v6  ;;  %v3787_v35 = vsel %vm3723_vm10, %v3691_v12, %v3755_v21 }
 0x20a   : > { %v3692_v47 = vadd.f32 %v5726_v9, %v7193_v6  ;;  %v5595_v43 = vpop.f32.mrb[12].mxu0  ;;  %v3786_v41 = vsel %vm3722_vm9, %v3690_v14, %v3754_v51 }
 0x20b   : > { %v3757_v39 = vmul.f32 0.2, %v3693_v49  ;;  %v5727_v11 = vadd.f32 %v5595_v43, %v7150_v15  ;;  %v3544_v37 = vpop.f32.mrb[13].mxu0  ;;  %5639 = vmatprep.mubr.msk.f32.mxu1 %vm310_vm0, %v3786_v41  ;;  %vm3725_vm12 = vcmp.ge.f32.partialorder %v3693_v49, 0.0 }
 0x20c   : > { %v3756_v45 = vmul.f32 0.2, %v3692_v47  ;;  %v5728_v13 = vadd.f32 %v3544_v37, %v7152_v17  ;;  %5640 = vmatmul.mubr.msk.f32.gmra.mrb[40].mxu1 %vm310_vm0, %v3787_v35  ;;  %vm3724_vm11 = vcmp.ge.f32.partialorder %v3692_v47, 0.0 }
 0x20d   : > { %v3695_v33 = vadd.f32 %v5727_v11, %v7193_v6  ;;  %v3789_v61 = vsel %vm3725_vm12, %v3693_v49, %v3757_v39 }
 0x20e   : > { %v3694_v31 = vadd.f32 %v5728_v13, %v7193_v6  ;;  %v5598_v29 = vpop.f32.mrb[14].mxu0  ;;  %v3788_v27 = vsel %vm3724_vm11, %v3692_v47, %v3756_v45 }
 0x20f   : > { %v3759_v23 = vmul.f32 0.2, %v3695_v33  ;;  %v5729_v15 = vadd.f32 %v5598_v29, %v7154_v19  ;;  %v3554_v25 = vpop.f32.mrb[15].mxu0  ;;  %5642 = vmatprep.mubr.msk.f32.mxu1 %vm310_vm0, %v3788_v27  ;;  %vm3727_vm14 = vcmp.ge.f32.partialorder %v3695_v33, 0.0 }
 0x210   : > { %v3758_v46 = vmul.f32 0.2, %v3694_v31  ;;  %v5730_v17 = vadd.f32 %v3554_v25, %v7156_v22  ;;  %5643 = vmatmul.mubr.msk.f32.gmra.mrb[42].mxu1 %vm310_vm0, %v3789_v61  ;;  %vm3726_vm13 = vcmp.ge.f32.partialorder %v3694_v31, 0.0 }
 0x211   : > { %v3697_v40 = vadd.f32 %v5729_v15, %v7193_v6  ;;  %v3791_v44 = vsel %vm3727_vm14, %v3695_v33, %v3759_v23 }
 0x212   : > { %v3696_v38 = vadd.f32 %v5730_v17, %v7193_v6  ;;  %v5601_v36 = vpop.f32.mrb[16].mxu0  ;;  %v3790_v34 = vsel %vm3726_vm13, %v3694_v31, %v3758_v46 }
 0x213   : > { %v3761_v32 = vmul.f32 0.2, %v3697_v40  ;;  %v5731_v19 = vadd.f32 %v5601_v36, %v7158_v54  ;;  %v3564_v42 = vpop.f32.mrb[17].mxu0  ;;  %5645 = vmatprep.mubr.msk.f32.mxu1 %vm310_vm0, %v3790_v34  ;;  %vm3729_vm1 = vcmp.ge.f32.partialorder %v3697_v40, 0.0 }
 0x214   : > { %v3760_v48 = vmul.f32 0.2, %v3696_v38  ;;  %v5732_v22 = vadd.f32 %v3564_v42, %v7160_v56  ;;  %5646 = vmatmul.mubr.msk.f32.gmra.mrb[44].mxu1 %vm310_vm0, %v3791_v44  ;;  %vm3728_vm15 = vcmp.ge.f32.partialorder %v3696_v38, 0.0 }
 0x215   : > { %v3699_v50 = vadd.f32 %v5731_v19, %v7193_v6  ;;  %v3793_v5 = vsel %vm3729_vm1, %v3697_v40, %v3761_v32 }
 0x216   : > { %v3698_v1 = vadd.f32 %v5732_v22, %v7193_v6  ;;  %v5604_v3 = vpop.f32.mrb[18].mxu0  ;;  %v3792_v4 = vsel %vm3728_vm15, %v3696_v38, %v3760_v48 }
 0x217   : > { %v3763_v8 = vmul.f32 0.2, %v3699_v50  ;;  %v5733_v54 = vadd.f32 %v5604_v3, %v7162_v57  ;;  %v3574_v10 = vpop.f32.mrb[19].mxu0  ;;  %5648 = vmatprep.mubr.msk.f32.mxu1 %vm310_vm0, %v3792_v4  ;;  %vm3731_vm3 = vcmp.ge.f32.partialorder %v3699_v50, 0.0 }
 0x218   : > { %v3762_v12 = vmul.f32 0.2, %v3698_v1  ;;  %v5734_v56 = vadd.f32 %v3574_v10, %v7164_v58  ;;  %5649 = vmatmul.mubr.msk.f32.gmra.mrb[46].mxu1 %vm310_vm0, %v3793_v5  ;;  %vm3730_vm2 = vcmp.ge.f32.partialorder %v3698_v1, 0.0 }
 0x219   : > { %v3701_v14 = vadd.f32 %v5733_v54, %v7193_v6  ;;  %v3795_v55 = vsel %vm3731_vm3, %v3699_v50, %v3763_v8  ;;  %vm4140_vm3 = vcmask 261120  }
 0x21a   : > { %v3700_v16 = vadd.f32 %v5734_v56, %v7193_v6  ;;  %v5607_v18 = vpop.f32.mrb[20].mxu0  ;;  %v3794_v21 = vsel %vm3730_vm2, %v3698_v1, %v3762_v12 }
 0x21b   : > { %v3765_v7 = vmul.f32 0.2, %v3701_v14  ;;  %v5735_v57 = vadd.f32 %v5607_v18, %v7166_v20  ;;  %v3584_v52 = vpop.f32.mrb[21].mxu0  ;;  %5651 = vmatprep.mubr.msk.f32.mxu1 %vm310_vm0, %v3794_v21  ;;  %vm3733_vm5 = vcmp.ge.f32.partialorder %v3701_v14, 0.0 }
 0x21c   : > { %v3764_v51 = vmul.f32 0.2, %v3700_v16  ;;  %v5736_v58 = vadd.f32 %v3584_v52, %v7168_v24  ;;  %5652 = vmatmul.mubr.msk.f32.gmra.mrb[48].mxu1 %vm310_vm0, %v3795_v55  ;;  %vm3732_vm4 = vcmp.ge.f32.partialorder %v3700_v16, 0.0 }
 0x21d   : > { %v3703_v9 = vadd.f32 %v5735_v57, %v7193_v6  ;;  %v3797_v11 = vsel %vm3733_vm5, %v3701_v14, %v3765_v7 }
 0x21e   : > { %v3702_v49 = vadd.f32 %v5736_v58, %v7193_v6  ;;  %v5610_v47 = vpop.f32.mrb[22].mxu0  ;;  %v3796_v43 = vsel %vm3732_vm4, %v3700_v16, %v3764_v51 }
 0x21f   : > { %v3767_v41 = vmul.f32 0.2, %v3703_v9  ;;  %v5737_v20 = vadd.f32 %v5610_v47, %v7170_v53  ;;  %v3594_v39 = vpop.f32.mrb[23].mxu0  ;;  %5654 = vmatprep.mubr.msk.f32.mxu1 %vm310_vm0, %v3796_v43  ;;  %vm3735_vm7 = vcmp.ge.f32.partialorder %v3703_v9, 0.0 }
 0x220   : > { %v3766_v37 = vmul.f32 0.2, %v3702_v49  ;;  %v5738_v24 = vadd.f32 %v3594_v39, %v7172_v60  ;;  %5655 = vmatmul.mubr.msk.f32.gmra.mrb[50].mxu1 %vm310_vm0, %v3797_v11  ;;  %vm3734_vm6 = vcmp.ge.f32.partialorder %v3702_v49, 0.0 }
 0x221   : > { %v3705_v35 = vadd.f32 %v5737_v20, %v7193_v6  ;;  %v3799_v27 = vsel %vm3735_vm7, %v3703_v9, %v3767_v41 }
 0x222   : > { %v3704_v45 = vadd.f32 %v5738_v24, %v7193_v6  ;;  %v5613_v13 = vpop.f32.mrb[24].mxu0  ;;  %v3798_v33 = vsel %vm3734_vm6, %v3702_v49, %v3766_v37 }
 0x223   : > { %v3769_v31 = vmul.f32 0.2, %v3705_v35  ;;  %v5739_v53 = vadd.f32 %v5613_v13, %v7174_v62  ;;  %v3604_v29 = vpop.f32.mrb[25].mxu0  ;;  %5657 = vmatprep.mubr.msk.f32.mxu1 %vm310_vm0, %v3798_v33  ;;  %vm3737_vm9 = vcmp.ge.f32.partialorder %v3705_v35, 0.0 }
 0x224   : > { %v3768_v23 = vmul.f32 0.2, %v3704_v45  ;;  %v5740_v60 = vadd.f32 %v3604_v29, %v7176_v63  ;;  %5658 = vmatmul.mubr.msk.f32.gmra.mrb[52].mxu1 %vm310_vm0, %v3799_v27  ;;  %vm3736_vm8 = vcmp.ge.f32.partialorder %v3704_v45, 0.0 }
 0x225   : > { %v3707_v15 = vadd.f32 %v5739_v53, %v7193_v6  ;;  %v3801_v38 = vsel %vm3737_vm9, %v3705_v35, %v3769_v31 }
 0x226   : > { %v3706_v25 = vadd.f32 %v5740_v60, %v7193_v6  ;;  %v5616_v61 = vpop.f32.mrb[26].mxu0  ;;  %v3800_v46 = vsel %vm3736_vm8, %v3704_v45, %v3768_v23 }
 0x227   : > { %v3771_v17 = vmul.f32 0.2, %v3707_v15  ;;  %v5741_v62 = vadd.f32 %v5616_v61, %v7178_v26  ;;  %v3614_v40 = vpop.f32.mrb[27].mxu0  ;;  %5660 = vmatprep.mubr.msk.f32.mxu1 %vm310_vm0, %v3800_v46  ;;  %vm3739_vm11 = vcmp.ge.f32.partialorder %v3707_v15, 0.0 }
 0x228   : > { %v3770_v36 = vmul.f32 0.2, %v3706_v25  ;;  %v5742_v63 = vadd.f32 %v3614_v40, %v7180_v59  ;;  %5661 = vmatmul.mubr.msk.f32.gmra.mrb[54].mxu1 %vm310_vm0, %v3801_v38  ;;  %vm3738_vm10 = vcmp.ge.f32.partialorder %v3706_v25, 0.0 }
 0x229   : > { %v3709_v34 = vadd.f32 %v5741_v62, %v7193_v6  ;;  %v3803_v22 = vsel %vm3739_vm11, %v3707_v15, %v3771_v17 }
 0x22a   : > { %v3708_v32 = vadd.f32 %v5742_v63, %v7193_v6  ;;  %v5619_v19 = vpop.f32.mrb[28].mxu0  ;;  %v3802_v42 = vsel %vm3738_vm10, %v3706_v25, %v3770_v36 }
 0x22b   : > { %v3773_v44 = vmul.f32 0.2, %v3709_v34  ;;  %v5743_v26 = vadd.f32 %v5619_v19, %v7182_v0  ;;  %v3624_v48 = vpop.f32.mrb[29].mxu0  ;;  %5663 = vmatprep.mubr.msk.f32.mxu1 %vm310_vm0, %v3802_v42  ;;  %vm3741_vm13 = vcmp.ge.f32.partialorder %v3709_v34, 0.0 }
 0x22c   : > { %v3772_v50 = vmul.f32 0.2, %v3708_v32  ;;  %v5744_v59 = vadd.f32 %v3624_v48, %v7184_v28  ;;  %5664 = vmatmul.mubr.msk.f32.gmra.mrb[56].mxu1 %vm310_vm0, %v3803_v22  ;;  %vm3740_vm12 = vcmp.ge.f32.partialorder %v3708_v32, 0.0 }
 0x22d   : > { %v3711_v1 = vadd.f32 %v5743_v26, %v7193_v6  ;;  %v3805_v5 = vsel %vm3741_vm13, %v3709_v34, %v3773_v44 }
 0x22e   : > { %v3710_v3 = vadd.f32 %v5744_v59, %v7193_v6  ;;  %v5622_v4 = vpop.f32.mrb[30].mxu0  ;;  %v3804_v8 = vsel %vm3740_vm12, %v3708_v32, %v3772_v50 }
 0x22f   : > { %v3775_v54 = vmul.f32 0.2, %v3711_v1  ;;  %v5745_v0 = vadd.f32 %v5622_v4, %v7186_v30  ;;  %v3634_v10 = vpop.f32.mrb[31].mxu0  ;;  %5666 = vmatprep.mubr.msk.f32.mxu1 %vm310_vm0, %v3804_v8  ;;  %vm3743_vm15 = vcmp.ge.f32.partialorder %v3711_v1, 0.0 }
 0x230   : > { %v3774_v12 = vmul.f32 0.2, %v3710_v3  ;;  %v5746_v28 = vadd.f32 %v3634_v10, %v7188_v2  ;;  %5667 = vmatmul.mubr.msk.f32.gmra.mrb[58].mxu1 %vm310_vm0, %v3805_v5  ;;  %vm3742_vm14 = vcmp.ge.f32.partialorder %v3710_v3, 0.0 }
 0x231   : > { %v3713_v56 = vadd.f32 %v5745_v0, %v7193_v6  ;;  %v3807_v30 = vsel %vm3743_vm15, %v3711_v1, %v3775_v54 }
 0x232   : > { %v3712_v14 = vadd.f32 %v5746_v28, %v7193_v6  ;;  %v3806_v16 = vsel %vm3742_vm14, %v3710_v3, %v3774_v12  ;;  %v7290_v6 = vld [vmem:[%s7451_s4] ss:$0 sm:$0xff] }
 0x233   : > { %v3777_v18 = vmul.f32 0.2, %v3713_v56  ;;  %5669 = vmatprep.mubr.msk.f32.mxu1 %vm310_vm0, %v3806_v16  ;;  %vm3745_vm2 = vcmp.ge.f32.partialorder %v3713_v56, 0.0 }
 0x234   : > { %v3776_v21 = vmul.f32 0.2, %v3712_v14  ;;  %5670 = vmatmul.mubr.msk.f32.gmra.mrb[60].mxu1 %vm310_vm0, %v3807_v30  ;;  %vm3744_vm1 = vcmp.ge.f32.partialorder %v3712_v14, 0.0 }
 0x235   : > { %v3809_v7 = vsel %vm3745_vm2, %v3713_v56, %v3777_v18 }
 0x236   : > { %v3808_v2 = vsel %vm3744_vm1, %v3712_v14, %v3776_v21 }
 0x237   : > { %5672 = vmatprep.mubr.msk.f32.mxu1 %vm310_vm0, %v3808_v2 }
 0x238   : > { %5673 = vmatmul.mubr.msk.f32.gmra.mrb[62].mxu1 %vm310_vm0, %v3809_v7 }
 0x2cf   : > { %v5629_v57 = vpop.f32.mrb[32].mxu1 }
 0x2d0   : > { %v3987_v52 = vadd.f32 %v5629_v57, %v7290_v6  ;;  %v3981_v55 = vpop.f32.mrb[33].mxu1 }
 0x2d1   : > { %v3982_v51 = vadd.f32 %v7290_v6, %v3981_v55 }
 0x2d2   : > { %4142 = vst.msk [vmem:[%s7294_s13 + $0x8] sm:$0xff] %vm4140_vm3, %v3987_v52 }
 0x2d3   : > { %4141 = vst.msk [vmem:[%s7294_s13] sm:$0xff] %vm4140_vm3, %v3982_v51  ;;  %v5632_v58 = vpop.f32.mrb[34].mxu1 }
 0x2d4   : > { %v3997_v9 = vadd.f32 %v5632_v58, %v7290_v6  ;;  %v3991_v49 = vpop.f32.mrb[35].mxu1 }
 0x2d5   : > { %v3992_v47 = vadd.f32 %v7290_v6, %v3991_v49 }
 0x2d6   : > { %4144 = vst.msk [vmem:[%s7294_s13 + $0x18] sm:$0xff] %vm4140_vm3, %v3997_v9 }
 0x2d7   : > { %4143 = vst.msk [vmem:[%s7294_s13 + $0x10] sm:$0xff] %vm4140_vm3, %v3992_v47  ;;  %v5635_v43 = vpop.f32.mrb[36].mxu1 }
 0x2d8   : > { %v4007_v41 = vadd.f32 %v5635_v43, %v7290_v6  ;;  %v4001_v20 = vpop.f32.mrb[37].mxu1 }
 0x2d9   : > { %v4002_v39 = vadd.f32 %v7290_v6, %v4001_v20 }
 0x2da   : > { %4146 = vst.msk [vmem:[%s7294_s13 + $0x28] sm:$0xff] %vm4140_vm3, %v4007_v41 }
 0x2db   : > { %4145 = vst.msk [vmem:[%s7294_s13 + $0x20] sm:$0xff] %vm4140_vm3, %v4002_v39  ;;  %v5638_v11 = vpop.f32.mrb[38].mxu1 }
 0x2dc   : > { %v4017_v37 = vadd.f32 %v5638_v11, %v7290_v6  ;;  %v4011_v24 = vpop.f32.mrb[39].mxu1 }
 0x2dd   : > { %v4012_v35 = vadd.f32 %v7290_v6, %v4011_v24 }
 0x2de   : > { %4148 = vst.msk [vmem:[%s7294_s13 + $0x38] sm:$0xff] %vm4140_vm3, %v4017_v37 }
 0x2df   : > { %4147 = vst.msk [vmem:[%s7294_s13 + $0x30] sm:$0xff] %vm4140_vm3, %v4012_v35  ;;  %v5641_v45 = vpop.f32.mrb[40].mxu1 }
 0x2e0   : > { %v4027_v13 = vadd.f32 %v5641_v45, %v7290_v6  ;;  %v4021_v33 = vpop.f32.mrb[41].mxu1 }
 0x2e1   : > { %v4022_v31 = vadd.f32 %v7290_v6, %v4021_v33 }
 0x2e2   : > { %4150 = vst.msk [vmem:[%s7294_s13 + $0x48] sm:$0xff] %vm4140_vm3, %v4027_v13 }
 0x2e3   : > { %4149 = vst.msk [vmem:[%s7294_s13 + $0x40] sm:$0xff] %vm4140_vm3, %v4022_v31  ;;  %v5644_v53 = vpop.f32.mrb[42].mxu1 }
 0x2e4   : > { %v4037_v29 = vadd.f32 %v5644_v53, %v7290_v6  ;;  %v4031_v27 = vpop.f32.mrb[43].mxu1 }
 0x2e5   : > { %v4032_v23 = vadd.f32 %v7290_v6, %v4031_v27 }
 0x2e6   : > { %4152 = vst.msk [vmem:[%s7294_s13 + $0x58] sm:$0xff] %vm4140_vm3, %v4037_v29 }
 0x2e7   : > { %4151 = vst.msk [vmem:[%s7294_s13 + $0x50] sm:$0xff] %vm4140_vm3, %v4032_v23  ;;  %v5647_v60 = vpop.f32.mrb[44].mxu1 }
 0x2e8   : > { %v4047_v15 = vadd.f32 %v5647_v60, %v7290_v6  ;;  %v4041_v25 = vpop.f32.mrb[45].mxu1 }
 0x2e9   : > { %v4042_v61 = vadd.f32 %v7290_v6, %v4041_v25 }
 0x2ea   : > { %4154 = vst.msk [vmem:[%s7294_s13 + $0x68] sm:$0xff] %vm4140_vm3, %v4047_v15 }
 0x2eb   : > { %4153 = vst.msk [vmem:[%s7294_s13 + $0x60] sm:$0xff] %vm4140_vm3, %v4042_v61  ;;  %v5650_v46 = vpop.f32.mrb[46].mxu1 }
 0x2ec   : > { %v4057_v17 = vadd.f32 %v5650_v46, %v7290_v6  ;;  %v4051_v62 = vpop.f32.mrb[47].mxu1 }
 0x2ed   : > { %v4052_v40 = vadd.f32 %v7290_v6, %v4051_v62 }
 0x2ee   : > { %4156 = vst.msk [vmem:[%s7294_s13 + $0x78] sm:$0xff] %vm4140_vm3, %v4057_v17 }
 0x2ef   : > { %4155 = vst.msk [vmem:[%s7294_s13 + $0x70] sm:$0xff] %vm4140_vm3, %v4052_v40  ;;  %v5653_v38 = vpop.f32.mrb[48].mxu1 }
 0x2f0   : > { %v4067_v36 = vadd.f32 %v5653_v38, %v7290_v6  ;;  %v4061_v63 = vpop.f32.mrb[49].mxu1 }
 0x2f1   : > { %v4062_v34 = vadd.f32 %v7290_v6, %v4061_v63 }
 0x2f2   : > { %4158 = vst.msk [vmem:[%s7294_s13 + $0x88] sm:$0xff] %vm4140_vm3, %v4067_v36 }
 0x2f3   : > { %4157 = vst.msk [vmem:[%s7294_s13 + $0x80] sm:$0xff] %vm4140_vm3, %v4062_v34  ;;  %v5656_v32 = vpop.f32.mrb[50].mxu1 }
 0x2f4   : > { %v4077_v19 = vadd.f32 %v5656_v32, %v7290_v6  ;;  %v4071_v42 = vpop.f32.mrb[51].mxu1 }
 0x2f5   : > { %v4072_v44 = vadd.f32 %v7290_v6, %v4071_v42 }
 0x2f6   : > { %4160 = vst.msk [vmem:[%s7294_s13 + $0x98] sm:$0xff] %vm4140_vm3, %v4077_v19 }
 0x2f7   : > { %4159 = vst.msk [vmem:[%s7294_s13 + $0x90] sm:$0xff] %vm4140_vm3, %v4072_v44  ;;  %v5659_v26 = vpop.f32.mrb[52].mxu1 }
 0x2f8   : > { %v4087_v48 = vadd.f32 %v5659_v26, %v7290_v6  ;;  %v4081_v22 = vpop.f32.mrb[53].mxu1 }
 0x2f9   : > { %v4082_v50 = vadd.f32 %v7290_v6, %v4081_v22 }
 0x2fa   : > { %4162 = vst.msk [vmem:[%s7294_s13 + $0xa8] sm:$0xff] %vm4140_vm3, %v4087_v48 }
 0x2fb   : > { %4161 = vst.msk [vmem:[%s7294_s13 + $0xa0] sm:$0xff] %vm4140_vm3, %v4082_v50  ;;  %v5662_v59 = vpop.f32.mrb[54].mxu1 }
 0x2fc   : > { %v4097_v1 = vadd.f32 %v5662_v59, %v7290_v6  ;;  %v4091_v3 = vpop.f32.mrb[55].mxu1 }
 0x2fd   : > { %v4092_v4 = vadd.f32 %v7290_v6, %v4091_v3 }
 0x2fe   : > { %4164 = vst.msk [vmem:[%s7294_s13 + $0xb8] sm:$0xff] %vm4140_vm3, %v4097_v1 }
 0x2ff   : > { %4163 = vst.msk [vmem:[%s7294_s13 + $0xb0] sm:$0xff] %vm4140_vm3, %v4092_v4  ;;  %v5665_v8 = vpop.f32.mrb[56].mxu1 }
 0x300   : > { %v4107_v54 = vadd.f32 %v5665_v8, %v7290_v6  ;;  %v4101_v0 = vpop.f32.mrb[57].mxu1 }
 0x301   : > { %v4102_v10 = vadd.f32 %v7290_v6, %v4101_v0 }
 0x302   : > { %4166 = vst.msk [vmem:[%s7294_s13 + $0xc8] sm:$0xff] %vm4140_vm3, %v4107_v54 }
 0x303   : > { %4165 = vst.msk [vmem:[%s7294_s13 + $0xc0] sm:$0xff] %vm4140_vm3, %v4102_v10  ;;  %v5668_v5 = vpop.f32.mrb[58].mxu1 }
 0x304   : > { %v4117_v12 = vadd.f32 %v5668_v5, %v7290_v6  ;;  %v4111_v28 = vpop.f32.mrb[59].mxu1 }
 0x305   : > { %v4112_v56 = vadd.f32 %v7290_v6, %v4111_v28 }
 0x306   : > { %4168 = vst.msk [vmem:[%s7294_s13 + $0xd8] sm:$0xff] %vm4140_vm3, %v4117_v12 }
 0x307   : > { %4167 = vst.msk [vmem:[%s7294_s13 + $0xd0] sm:$0xff] %vm4140_vm3, %v4112_v56  ;;  %v5671_v14 = vpop.f32.mrb[60].mxu1 }
 0x308   : > { %v4127_v16 = vadd.f32 %v5671_v14, %v7290_v6  ;;  %v4121_v18 = vpop.f32.mrb[61].mxu1 }
 0x309   : > { %v4122_v30 = vadd.f32 %v7290_v6, %v4121_v18 }
 0x30a   : > { %4170 = vst.msk [vmem:[%s7294_s13 + $0xe8] sm:$0xff] %vm4140_vm3, %v4127_v16 }
 0x30b   : > { %4169 = vst.msk [vmem:[%s7294_s13 + $0xe0] sm:$0xff] %vm4140_vm3, %v4122_v30  ;;  %v5674_v21 = vpop.f32.mrb[62].mxu1 }
 0x30c   : > { %v4137_v2 = vadd.f32 %v5674_v21, %v7290_v6  ;;  %v4131_v7 = vpop.f32.mrb[63].mxu1 }
 0x30d   : > { %v4132_v57 = vadd.f32 %v7290_v6, %v4131_v7 }
 0x30e   : > { %4172 = vst.msk [vmem:[%s7294_s13 + $0xf8] sm:$0xff] %vm4140_vm3, %v4137_v2 }
 0x30f   : > { %4171 = vst.msk [vmem:[%s7294_s13 + $0xf0] sm:$0xff] %vm4140_vm3, %v4132_v57 }
 0x310   : > { %6042 = shalt.err (!%p6039_p5)
}
 0x311   : > { %s6043_s8 = scalar_lea.hbm %s7390_s24, 4096  ;;  %s6047_s11 = scalar_lea.hbm %s7452_s5, 8192 }
 0x312   : > { %p6044_p6 = scmp.ne.s32.totalorder %s7390_s24, %s6043_s8  ;;  %p6048_p10 = scmp.lt.u32.totalorder %s7390_s24, %s7452_s5 }
 0x313   : > { %p6049_p11 = scmp.lt.u32.totalorder %s6047_s11, %s6043_s8  ;;  %p6051_p13 = scmp.lt.u32.totalorder %s6043_s8, %s7390_s24 }
 0x314   : > { %p6045_p7 = pnand %p6044_p6, %p6182_p4 }
 0x315   : > { %p6050_p12 = por %p6049_p11, %p6048_p10 }
 0x316   : > { %p6046_p9 = pneg %p6045_p7 }
 0x317   : > { %p6052_p0 = por %p6051_p13, %p6050_p12 }
 0x319   : > { %p6053_p1 = pnand %p6052_p0, %p6046_p9 }
 0x31b   : > { %6056 = shalt.err (!%p6053_p1)
}
 0x31c   : > { %s6110_s14 = smov 128   ;;  %s6111_s16 = smov 8  }
 0x31d   : > { %5972 = dma.vmem_to_hbm [thread:$0]  (%p6182_p4), %s7392_s15, 4096, %s7390_s24, %s7401_s21, %s6110_s14, %s6110_s14, %s6111_s16  }
 0x31e PF: > { %p5978_p2 = scmp.ge.s32.totalorder %s6107_s23, 2  ;;  %s4204_s17 = sand.u32 1, %s6087_s18  }
 0x31f   : > { %s4205_s25 = scalar_lea.sflag [#allocation3], %s4204_s17 }
 0x320   : > { %p5975_p3 = pnand %p5978_p2, %p6189_p8 }
 0x322   : > { %6082 = dma.done.wait (!%p5975_p3), %s4205_s25, 4096  }
 0x323   : > { %6084 = vsyncadd (!%p5975_p3), %s4205_s25, 4294963200  ;;  %s18_s23 = sadd.s32 1, %s6107_s23   ;;  %s7568_s18 = smov %s6091_s19 }
 0x324   : > { %p15_p5 = scmp.ge.s32.totalorder %s18_s23, 4   ;;  %s7569_s19 = smov %s6095_s20 }
 0x325   : > { %s7570_s20 = smov %s6195_s6  ;;  %s7571_s21 = smov %s6103_s22 }
 0x326   : > { %s7572_s22 = smov %s7574_s26  ;;  %17 = sbr.rel (!%p15_p5) target bundleno = 4 (0x4), region = 86 }
 0x32d   :  { %4210 = vsyncpa [#allocation3], 1 }
 0x32e   :  { %4212 = vsyncpa [#allocation3 + $0x1], 1 }

</bundles_post_ra>
